<compile_context>
chip_gen: v6e
topology: v6e:2x2x1
jax: 0.10.0
libtpu: 0.0.40
codegen_flags: <defaults>
</compile_context>

<pallas_src>
import functools

import jax
import jax.numpy as jnp
import numpy as np
from jax import lax
from jax.experimental import pallas as pl
from jax.experimental.pallas import tpu as pltpu

POOL_K = 5
POOL_S = 3
BN_EPS = 1e-5
CONV_OUT = 128          # InceptionAux 1x1 conv always has 128 output channels


# ----------------------------------------------------------------- kernel ---

def _fused_kernel(p_ref, x_ref, cw_ref, cb_ref, w1_ref, b1_ref, w2_ref,
                  o_ref, *, n, sp):
    """One grid step computes the full prologue + one fc1/fc2 feature tile.

    p_ref:  [N, SP, HW]  per-image pooling matrix (bf16, broadcast over batch)
    x_ref:  [N, C, HW]   input in native NCHW layout (spatial flattened)
    cw_ref: [C, 128]     1x1 conv weight with BN scale folded in (bf16)
    cb_ref: [1, 128]     conv bias with BN shift folded in (f32)
    w1_ref: [2048, T]    fc1 weight tile (bf16, rows permuted to the kernel's
                         (spatial, channel) flatten order)
    b1_ref: [1, T]       fc1 bias tile (f32)
    w2_ref: [T, LANE]    fc2 weight tile (bf16, cols padded to LANE)
    o_ref:  [1, N, LANE] partial fc2 output of this tile (f32)
    """
    # 1) AvgPool2d(kernel_size=5, stride=3) as a batched MXU matmul over the
    #    flattened spatial axis (same pattern as 'bqd,bkd->bqk').
    xk = x_ref[...].astype(jnp.bfloat16)                          # [N, C, HW]
    pooled = jnp.einsum("nsh,nch->nsc", p_ref[...], xk,
                        preferred_element_type=jnp.float32)       # [N, SP, C]

    # 2) 1x1 conv (channel matmul) + folded BatchNorm + ReLU.
    #    Leading-dim merge [N, SP, C] -> [N*SP, C] is layout-free.
    pooled2 = pooled.reshape(n * sp, -1).astype(jnp.bfloat16)
    y = jnp.dot(pooled2, cw_ref[...], preferred_element_type=jnp.float32)
    y = jnp.maximum(y + cb_ref[...], 0.0)                         # [N*SP, 128]

    # 3) Flatten.  Cast to bf16 BEFORE the sublane->lane relayout (halves the
    #    bytes moved).  Row-major (spatial, channel) order; the PyTorch
    #    channel-major view(N, -1) is folded into fc1's rows offline.
    feat = y.astype(jnp.bfloat16).reshape(n, sp * CONV_OUT)       # [N, 2048]

    # 4) fc1 tile + ReLU.
    # TODO(synk): nn.Dropout(p=0.7) training-mode RNG dropout not implemented
    # (identity in eval mode).
    h = jnp.dot(feat, w1_ref[...], preferred_element_type=jnp.float32)
    h = jnp.maximum(h + b1_ref[...], 0.0).astype(jnp.bfloat16)    # [N, T]

    # 5) Partial fc2 contribution of this feature tile (bias added in wrapper).
    part = jnp.dot(h, w2_ref[...], preferred_element_type=jnp.float32)
    o_ref[...] = part[None].astype(o_ref.dtype)                   # [1, N, LANE]


# ---------------------------------------------------------------- wrapper ---

@functools.partial(jax.jit, static_argnames=("sp", "tile", "n_tiles",
                                              "num_classes", "lane"))
def _forward_impl(x, pool_mat, conv_w, conv_b, fc1_w, fc1_b, fc2_w, fc2_b,
                  *, sp, tile, n_tiles, num_classes, lane):
    N, C, H, W = x.shape
    HW = H * W

    # Free reshape (contiguous view) -- no XLA transpose/copy before the call.
    x_r = x.reshape(N, C, HW)

    kernel = functools.partial(_fused_kernel, n=N, sp=sp)

    partials = pl.pallas_call(
        kernel,
        out_shape=jax.ShapeDtypeStruct((n_tiles, N, lane), jnp.float32),
        grid=(n_tiles,),
        in_specs=[
            pl.BlockSpec((N, sp, HW), lambda j: (0, 0, 0)),         # pool mat
            pl.BlockSpec((N, C, HW), lambda j: (0, 0, 0)),          # x (NCHW)
            pl.BlockSpec((C, CONV_OUT), lambda j: (0, 0)),          # conv w'
            pl.BlockSpec((1, CONV_OUT), lambda j: (0, 0)),          # conv b'
            pl.BlockSpec((sp * CONV_OUT, tile), lambda j: (0, j)),  # fc1 w tile
            pl.BlockSpec((1, tile), lambda j: (0, j)),              # fc1 b tile
            pl.BlockSpec((tile, lane), lambda j: (j, 0)),           # fc2 w tile
        ],
        out_specs=pl.BlockSpec((1, N, lane), lambda j: (j, 0, 0)),
        compiler_params=pltpu.CompilerParams(
            dimension_semantics=("parallel",),
            vmem_limit_bytes=32 * 1024 * 1024),
    )(pool_mat, x_r, conv_w, conv_b, fc1_w, fc1_b, fc2_w)

    if n_tiles > 1:
        acc = partials.sum(axis=0)          # only on megacore parts (2 tiles)
    else:
        acc = partials.reshape(N, lane)     # free; fuses with slice/bias add
    return acc[:, :num_classes] + fc2_b


def inception_aux_forward(x, prep):
    return _forward_impl(
        x, prep["pool_mat"], prep["conv_w"], prep["conv_b"],
        prep["fc1_w"], prep["fc1_b"], prep["fc2_w"], prep["fc2_b"],
        sp=prep["sp"], tile=prep["tile"], n_tiles=prep["n_tiles"],
        num_classes=prep["num_classes"], lane=prep["lane"])


# ------------------------------------------------------- param preparation --

def _num_tensorcores():
    """2 TensorCores/chip on megacore parts (v4/v5p/v7x), else 1."""
    try:
        kind = jax.devices()[0].device_kind.lower()
    except Exception:
        return 1
    if ("v4" in kind) or ("v5p" in kind) or ("7" in kind):
        return 2
    return 1


def prepare_params(params, N, C, H, W, *, n_tiles=None):
    """Offline folding: BN into conv, flatten permutation into fc1_w, bf16
    weight casts, fc2 lane padding, and the per-image pooling matrix."""
    OH = (H - POOL_K) // POOL_S + 1
    OW = (W - POOL_K) // POOL_S + 1
    SP, HW = OH * OW, H * W

    hidden = params["fc1_w"].shape[1]
    num_classes = params["fc2_w"].shape[1]
    lane = ((num_classes + 127) // 128) * 128
    assert SP * CONV_OUT == params["fc1_w"].shape[0], "fc1 input size mismatch"

    # Grid shaping: one fc1/fc2 tile per TensorCore (weight stream split).
    if n_tiles is None:
        n_tiles = _num_tensorcores()
    if hidden % n_tiles != 0:
        n_tiles = 1
    tile = hidden // n_tiles
    assert tile % 128 == 0 and tile >= 256, "keep each weight DMA >= 1 MiB"

    # BatchNorm (inference) folded into the 1x1 conv; conv weight in bf16.
    scale = params["bn_gamma"] * lax.rsqrt(params["bn_var"] + BN_EPS)  # [128]
    conv_w = (params["conv_w"] * scale[None, :]).astype(jnp.bfloat16)  # [C,128]
    conv_b = ((params["conv_b"] - params["bn_mean"]) * scale
              + params["bn_beta"]).reshape(1, CONV_OUT).astype(jnp.float32)

    # fc1 weight: torch flatten index k*SP + s  ->  kernel index s*128 + k.
    w1p = (params["fc1_w"].reshape(CONV_OUT, SP, hidden)
           .transpose(1, 0, 2).reshape(SP * CONV_OUT, hidden)
           .astype(jnp.bfloat16))
    b1 = params["fc1_b"].reshape(1, hidden).astype(jnp.float32)

    # fc2 weight padded to a multiple of 128 output lanes, bf16.
    w2p = jnp.pad(params["fc2_w"],
                  ((0, 0), (0, lane - num_classes))).astype(jnp.bfloat16)

    # Per-image AvgPool2d(5, 3) matrix [SP, HW], broadcast over batch (O(N)).
    P = np.zeros((SP, HW), np.float32)
    inv = 1.0 / (POOL_K * POOL_K)
    for oh in range(OH):
        for ow in range(OW):
            r = oh * OW + ow
            for kh in range(POOL_K):
                for kw in range(POOL_K):
                    P[r, (oh * POOL_S + kh) * W + (ow * POOL_S + kw)] = inv
    pool_mat = jnp.asarray(np.broadcast_to(P[None], (N, SP, HW)).copy(),
                           dtype=jnp.bfloat16)

    return {
        "pool_mat": pool_mat,
        "conv_w": conv_w, "conv_b": conv_b,
        "fc1_w": w1p, "fc1_b": b1,
        "fc2_w": w2p, "fc2_b": params["fc2_b"].astype(jnp.float32),
        "sp": SP, "tile": tile, "n_tiles": n_tiles,
        "num_classes": num_classes, "lane": lane,
    }


# ---------------------------------------------------------------- reference -

def reference_forward(x, params):
    N, C, H, W = x.shape
    pooled = lax.reduce_window(x, 0.0, lax.add, (1, 1, POOL_K, POOL_K),
                               (1, 1, POOL_S, POOL_S), "VALID")
    pooled = pooled / float(POOL_K * POOL_K)
    y = jnp.einsum("nchw,ck->nkhw", pooled, params["conv_w"])
    y = y + params["conv_b"].reshape(1, -1, 1, 1)
    inv_std = lax.rsqrt(params["bn_var"] + BN_EPS).reshape(1, -1, 1, 1)
    y = ((y - params["bn_mean"].reshape(1, -1, 1, 1)) * inv_std
         * params["bn_gamma"].reshape(1, -1, 1, 1)
         + params["bn_beta"].reshape(1, -1, 1, 1))
    y = jnp.maximum(y, 0.0)
    feat = y.reshape(N, -1)
    h = jnp.maximum(feat @ params["fc1_w"] + params["fc1_b"], 0.0)
    return h @ params["fc2_w"] + params["fc2_b"]


# ---------------------------------------------------------------- params ----

def init_params(key, in_channels, num_classes, *, hidden=1024, fc_in=2048):
    ks = jax.random.split(key, 10)
    return {
        # 1x1 conv weight stored transposed: [C_in, 128]
        "conv_w": 0.1 * jax.random.normal(ks[0], (in_channels, CONV_OUT), jnp.float32),
        "conv_b": 0.1 * jax.random.normal(ks[1], (CONV_OUT,), jnp.float32),
        "bn_gamma": 1.0 + 0.1 * jax.random.normal(ks[2], (CONV_OUT,), jnp.float32),
        "bn_beta": 0.1 * jax.random.normal(ks[3], (CONV_OUT,), jnp.float32),
        "bn_mean": 0.1 * jax.random.normal(ks[4], (CONV_OUT,), jnp.float32),
        "bn_var": jnp.abs(jax.random.normal(ks[5], (CONV_OUT,), jnp.float32)) + 0.5,
        # fc weights stored transposed relative to nn.Linear: [in, out]
        "fc1_w": jax.random.normal(ks[6], (fc_in, hidden), jnp.float32) / np.sqrt(fc_in),
        "fc1_b": 0.1 * jax.random.normal(ks[7], (hidden,), jnp.float32),
        "fc2_w": jax.random.normal(ks[8], (hidden, num_classes), jnp.float32) / np.sqrt(hidden),
        "fc2_b": 0.1 * jax.random.normal(ks[9], (num_classes,), jnp.float32),
    }


if __name__ == "__main__":
    key = jax.random.PRNGKey(0)
    kx, kp = jax.random.split(key)

    # avgpool(5, 3): 16x16 -> 4x4, so 128 * 4 * 4 = 2048 matches fc1's input.
    N, C_IN, H, W = 2, 4, 16, 16
    NUM_CLASSES = 10

    x = jax.random.normal(kx, (N, C_IN, H, W), jnp.float32)
    params = init_params(kp, C_IN, NUM_CLASSES)
    prep = prepare_params(params, N, C_IN, H, W)

    out = jax.block_until_ready(inception_aux_forward(x, prep))
    ref = jax.block_until_ready(reference_forward(x, params))

    assert out.shape == (N, NUM_CLASSES), out.shape
    np.testing.assert_allclose(np.asarray(out), np.asarray(ref),
                               rtol=2e-2, atol=2e-2)
    print("KERNEL_OK")
</pallas_src>

<mosaic_0001>
module attributes {stable_mosaic.version = 11 : i64} {
  func.func @_fused_kernel(%arg0: i32, %arg1: memref<2x16x256xbf16, #tpu.memory_space<vmem>>, %arg2: memref<2x4x256xf32, #tpu.memory_space<vmem>>, %arg3: memref<4x128xbf16, #tpu.memory_space<vmem>>, %arg4: memref<1x128xf32, #tpu.memory_space<vmem>>, %arg5: memref<2048x1024xbf16, #tpu.memory_space<vmem>>, %arg6: memref<1x1024xf32, #tpu.memory_space<vmem>>, %arg7: memref<1024x128xbf16, #tpu.memory_space<vmem>>, %arg8: memref<1x2x128xf32, #tpu.memory_space<vmem>>) attributes {dimension_semantics = [#tpu.dimension_semantics<parallel>], iteration_bounds = array<i64: 1>, scalar_prefetch = 0 : i64, scratch_operands = 0 : i64, tpu.core_type = #tpu.core_type<tc>, window_params = [{pipeline_mode = #tpu.pipeline_mode<synchronous>, transform_indices = @transform_0, window_bounds = array<i64: 2, 16, 256>}, {pipeline_mode = #tpu.pipeline_mode<synchronous>, transform_indices = @transform_1, window_bounds = array<i64: 2, 4, 256>}, {pipeline_mode = #tpu.pipeline_mode<synchronous>, transform_indices = @transform_2, window_bounds = array<i64: 4, 128>}, {pipeline_mode = #tpu.pipeline_mode<synchronous>, transform_indices = @transform_3, window_bounds = array<i64: 1, 128>}, {transform_indices = @transform_4, window_bounds = array<i64: 2048, 1024>}, {transform_indices = @transform_5, window_bounds = array<i64: 1, 1024>}, {transform_indices = @transform_6, window_bounds = array<i64: 1024, 128>}, {transform_indices = @transform_7, window_bounds = array<i64: 1, 2, 128>}]} {
    %c0 = arith.constant 0 : index
    %c0_0 = arith.constant 0 : index
    %c0_1 = arith.constant 0 : index
    %0 = vector.load %arg2[%c0, %c0_0, %c0_1] : memref<2x4x256xf32, #tpu.memory_space<vmem>>, vector<2x4x256xf32>
    %1 = arith.truncf %0 : vector<2x4x256xf32> to vector<2x4x256xbf16>
    %c0_2 = arith.constant 0 : index
    %c0_3 = arith.constant 0 : index
    %c0_4 = arith.constant 0 : index
    %2 = vector.load %arg1[%c0_2, %c0_3, %c0_4] : memref<2x16x256xbf16, #tpu.memory_space<vmem>>, vector<2x16x256xbf16>
    "tpu.trace_start"() <{level = 10 : i32, message = "nsh,nch->nsc"}> : () -> ()
    %cst = arith.constant dense<0.000000e+00> : vector<2x16x4xf32>
    %3 = tpu.matmul %2, %1, %cst {dimension_numbers = #tpu.dot_dimension_numbers<[2], [2], [1], [1], [0, 0, 0, 1, 1, 1], [0], [0]>} : vector<2x16x256xbf16>, vector<2x4x256xbf16>, vector<2x16x4xf32> -> vector<2x16x4xf32>
    "tpu.trace_stop"() : () -> ()
    %4 = vector.shape_cast %3 : vector<2x16x4xf32> to vector<32x4xf32>
    %5 = arith.truncf %4 : vector<32x4xf32> to vector<32x4xbf16>
    %c0_5 = arith.constant 0 : index
    %c0_6 = arith.constant 0 : index
    %6 = vector.load %arg3[%c0_5, %c0_6] : memref<4x128xbf16, #tpu.memory_space<vmem>>, vector<4x128xbf16>
    %cst_7 = arith.constant dense<0.000000e+00> : vector<32x128xf32>
    %7 = tpu.matmul %5, %6, %cst_7 {dimension_numbers = #tpu.dot_dimension_numbers<[1], [0], [0], [1], [0, 0, 1, 1], [], []>} : vector<32x4xbf16>, vector<4x128xbf16>, vector<32x128xf32> -> vector<32x128xf32>
    %c0_8 = arith.constant 0 : index
    %c0_9 = arith.constant 0 : index
    %8 = vector.load %arg4[%c0_8, %c0_9] : memref<1x128xf32, #tpu.memory_space<vmem>>, vector<1x128xf32>
    %9 = vector.broadcast %8 : vector<1x128xf32> to vector<32x128xf32>
    %10 = arith.addf %7, %9 : vector<32x128xf32>
    %cst_10 = arith.constant 0.000000e+00 : f32
    %11 = vector.broadcast %cst_10 : f32 to vector<32x128xf32>
    %12 = arith.maximumf %10, %11 : vector<32x128xf32>
    %13 = arith.truncf %12 : vector<32x128xf32> to vector<32x128xbf16>
    %14 = vector.shape_cast %13 : vector<32x128xbf16> to vector<2x2048xbf16>
    %c0_11 = arith.constant 0 : index
    %c0_12 = arith.constant 0 : index
    %15 = vector.load %arg5[%c0_11, %c0_12] : memref<2048x1024xbf16, #tpu.memory_space<vmem>>, vector<2048x1024xbf16>
    %cst_13 = arith.constant dense<0.000000e+00> : vector<2x1024xf32>
    %16 = tpu.matmul %14, %15, %cst_13 {dimension_numbers = #tpu.dot_dimension_numbers<[1], [0], [0], [1], [0, 0, 1, 1], [], []>} : vector<2x2048xbf16>, vector<2048x1024xbf16>, vector<2x1024xf32> -> vector<2x1024xf32>
    %c0_14 = arith.constant 0 : index
    %c0_15 = arith.constant 0 : index
    %17 = vector.load %arg6[%c0_14, %c0_15] : memref<1x1024xf32, #tpu.memory_space<vmem>>, vector<1x1024xf32>
    %18 = vector.broadcast %17 : vector<1x1024xf32> to vector<2x1024xf32>
    %19 = arith.addf %16, %18 : vector<2x1024xf32>
    %cst_16 = arith.constant 0.000000e+00 : f32
    %20 = vector.broadcast %cst_16 : f32 to vector<2x1024xf32>
    %21 = arith.maximumf %19, %20 : vector<2x1024xf32>
    %22 = arith.truncf %21 : vector<2x1024xf32> to vector<2x1024xbf16>
    %c0_17 = arith.constant 0 : index
    %c0_18 = arith.constant 0 : index
    %23 = vector.load %arg7[%c0_17, %c0_18] : memref<1024x128xbf16, #tpu.memory_space<vmem>>, vector<1024x128xbf16>
    %cst_19 = arith.constant dense<0.000000e+00> : vector<2x128xf32>
    %24 = tpu.matmul %22, %23, %cst_19 {dimension_numbers = #tpu.dot_dimension_numbers<[1], [0], [0], [1], [0, 0, 1, 1], [], []>} : vector<2x1024xbf16>, vector<1024x128xbf16>, vector<2x128xf32> -> vector<2x128xf32>
    %25 = vector.shape_cast %24 : vector<2x128xf32> to vector<1x2x128xf32>
    %c0_20 = arith.constant 0 : index
    %c0_21 = arith.constant 0 : index
    %c0_22 = arith.constant 0 : index
    %26 = vector.load %arg8[%c0_20, %c0_21, %c0_22] : memref<1x2x128xf32, #tpu.memory_space<vmem>>, vector<1x2x128xf32>
    tpu.vector_store %arg8[%c0_20, %c0_21, %c0_22], %25 {strides = array<i32>} : memref<1x2x128xf32, #tpu.memory_space<vmem>>, vector<1x2x128xf32>,
    return
  }
  func.func @transform_0(%arg0: i32) -> (i32, i32, i32) {
    %c0_i32 = arith.constant 0 : i32
    %c0_i32_0 = arith.constant 0 : i32
    %c0_i32_1 = arith.constant 0 : i32
    %c0_i32_2 = arith.constant 0 : i32
    return %c0_i32, %c0_i32_0, %c0_i32_1 : i32, i32, i32
  }
  func.func @transform_1(%arg0: i32) -> (i32, i32, i32) {
    %c0_i32 = arith.constant 0 : i32
    %c0_i32_0 = arith.constant 0 : i32
    %c0_i32_1 = arith.constant 0 : i32
    %c0_i32_2 = arith.constant 0 : i32
    return %c0_i32, %c0_i32_0, %c0_i32_1 : i32, i32, i32
  }
  func.func @transform_2(%arg0: i32) -> (i32, i32) {
    %c0_i32 = arith.constant 0 : i32
    %c0_i32_0 = arith.constant 0 : i32
    %c0_i32_1 = arith.constant 0 : i32
    return %c0_i32, %c0_i32_0 : i32, i32
  }
  func.func @transform_3(%arg0: i32) -> (i32, i32) {
    %c0_i32 = arith.constant 0 : i32
    %c0_i32_0 = arith.constant 0 : i32
    %c0_i32_1 = arith.constant 0 : i32
    return %c0_i32, %c0_i32_0 : i32, i32
  }
  func.func @transform_4(%arg0: i32) -> (i32, i32) {
    %c0_i32 = arith.constant 0 : i32
    %c0_i32_0 = arith.constant 0 : i32
    return %c0_i32, %arg0 : i32, i32
  }
  func.func @transform_5(%arg0: i32) -> (i32, i32) {
    %c0_i32 = arith.constant 0 : i32
    %c0_i32_0 = arith.constant 0 : i32
    return %c0_i32, %arg0 : i32, i32
  }
  func.func @transform_6(%arg0: i32) -> (i32, i32) {
    %c0_i32 = arith.constant 0 : i32
    %c0_i32_0 = arith.constant 0 : i32
    return %arg0, %c0_i32 : i32, i32
  }
  func.func @transform_7(%arg0: i32) -> (i32, i32, i32) {
    %c0_i32 = arith.constant 0 : i32
    %c0_i32_0 = arith.constant 0 : i32
    %c0_i32_1 = arith.constant 0 : i32
    return %arg0, %c0_i32, %c0_i32_0 : i32, i32, i32
  }
}

</mosaic_0001>

<bundles_post_ra>
// kernel: _forward_impl.1
= control target key start
LH: loop header
LB: loop body
LE: loop exit
PB: predicated region body
PF: predicated region fallthrough
CT: control target
= control target key end

     0   :  { %12 = vsyncpa [#allocation3], 0  ;;  %s10327_s0 = inlined_call_operand.hbm [shape: bf16[2,16,256], index: 0, kind: input, shape index: {}]   ;;  %s10328_s1 = inlined_call_operand.vmem [shape: f32[2,4,256], index: 1, kind: input, shape index: {}]   ;;  %s10329_s2 = inlined_call_operand.hbm [shape: bf16[4,128], index: 2, kind: input, shape index: {}]   ;;  %s10330_s3 = inlined_call_operand.hbm [shape: f32[1,128], index: 3, kind: input, shape index: {}]   ;;  %s10331_s4 = inlined_call_operand.hbm [shape: bf16[2048,1024], index: 4, kind: input, shape index: {}]   ;;  %s10332_s5 = inlined_call_operand.hbm [shape: f32[1,1024], index: 5, kind: input, shape index: {}]   ;;  %s10333_s6 = inlined_call_operand.hbm [shape: bf16[1024,128], index: 6, kind: input, shape index: {}]   ;;  %s10334_s7 = inlined_call_operand.vmem [shape: f32[1,2,128], index: 7, kind: output, shape index: {}]  }
   0x1   :  { %13 = vsyncpa [#allocation5], 0 }
   0x2   :  { %14 = vsyncpa [#allocation8], 0 }
   0x3   :  { %15 = vsyncpa [#allocation11], 0  ;;  %s10025_s24 = smov [#allocation4]   ;;  %s10026_s26 = smov [#allocation7]  }
   0x4   :  { %s36_s25 = sshll.u32 %s10025_s24, 4  ;;  %s55_s27 = sshll.u32 %s10026_s26, 4  ;;  %s37_s25 = int_to_ptr.vmem [resolvable:$true] %s36_s25  ;;  %s56_s27 = int_to_ptr.vmem [resolvable:$true] %s55_s27 }
   0x5   :  { %s9905_s28 = scalar_lea.vmem %s37_s25, 32  ;;  %p9910_p1 = scmp.lt.s32.totalorder %s37_s25, %s37_s25 }
   0x6   :  { %p9906_p0 = scmp.ne.s32.totalorder %s37_s25, %s9905_s28  ;;  %p9911_p2 = scmp.lt.s32.totalorder %s9905_s28, %s9905_s28 }
   0x8   :  { %p9912_p3 = por %p9911_p2, %p9910_p1 }
   0xa   :  { %p9913_p4 = pnand %p9912_p3, %p9906_p0 }
   0xc   :  { %9916 = shalt.err (!%p9913_p4)
}
   0xd   :  { %39 = dma.hbm_to_vmem [thread:$0]  %s10329_s2, 32, %s37_s25, [#allocation5]  }
   0xe   :  { %s9925_s8 = scalar_lea.vmem %s56_s27, 131072  ;;  %p9930_p6 = scmp.lt.s32.totalorder %s56_s27, %s56_s27 }
   0xf   :  { %p9926_p5 = scmp.ne.s32.totalorder %s56_s27, %s9925_s8  ;;  %p9931_p7 = scmp.lt.s32.totalorder %s9925_s8, %s9925_s8 }
  0x11   :  { %p9932_p8 = por %p9931_p7, %p9930_p6 }
  0x13   :  { %p9933_p9 = pnand %p9932_p8, %p9926_p5 }
  0x15   :  { %9936 = shalt.err (!%p9933_p9)
}
  0x16   :  { %s10027_s9 = smov 512   ;;  %s10028_s10 = smov 32  }
  0x17   :  { %61 = dma.hbm_to_vmem [thread:$0]  %s10331_s4, 131072, %s56_s27, [#allocation8], %s10027_s9, %s10027_s9, %s10028_s10  }
  0x18   :  { %s10029_s13 = smov [#allocation2]  }
  0x19   :  { %s21_s14 = sshll.u32 %s10029_s13, 4  ;;  %s22_s14 = int_to_ptr.vmem [resolvable:$true] %s21_s14 }
  0x1a   :  { %s9945_s15 = scalar_lea.vmem %s22_s14, 512  ;;  %p9950_p11 = scmp.lt.s32.totalorder %s22_s14, %s22_s14 }
  0x1b   :  { %p9946_p10 = scmp.ne.s32.totalorder %s22_s14, %s9945_s15  ;;  %p9951_p12 = scmp.lt.s32.totalorder %s9945_s15, %s9945_s15 }
  0x1d   :  { %p9952_p13 = por %p9951_p12, %p9950_p11 }
  0x1f   :  { %p9953_p0 = pnand %p9952_p13, %p9946_p10 }
  0x21   :  { %9956 = shalt.err (!%p9953_p0)
}
  0x22   :  { %s10030_s2 = smov 128   ;;  %s10031_s16 = smov 8  }
  0x23   :  { %27 = dma.hbm_to_vmem [thread:$0]  %s10327_s0, 512, %s22_s14, [#allocation3], %s10030_s2, %s10030_s2, %s10031_s16  }
  0x24   :  { %s10032_s19 = smov [#allocation6]   ;;  %s10033_s4 = smov [#allocation9]  }
  0x25   :  { %s46_s20 = sshll.u32 %s10032_s19, 4  ;;  %s68_s21 = sshll.u32 %s10033_s4, 4  ;;  %s47_s20 = int_to_ptr.vmem [resolvable:$true] %s46_s20  ;;  %s69_s21 = int_to_ptr.vmem [resolvable:$true] %s68_s21 }
  0x26   :  { %s9965_s22 = scalar_lea.vmem %s47_s20, 16  ;;  %s9969_s23 = scalar_lea.vmem %s47_s20, 32 }
  0x27   :  { %p9966_p1 = scmp.ne.s32.totalorder %s47_s20, %s9965_s22  ;;  %p9970_p2 = scmp.lt.s32.totalorder %s47_s20, %s47_s20 }
  0x28   :  { %p9971_p3 = scmp.lt.s32.totalorder %s9969_s23, %s9965_s22 }
  0x2a   :  { %p9972_p4 = por %p9971_p3, %p9970_p2 }
  0x2c   :  { %p9973_p5 = pnand %p9972_p4, %p9966_p1 }
  0x2e   :  { %9976 = shalt.err (!%p9973_p5)
}
  0x2f   :  { %49 = dma.hbm_to_vmem [thread:$0]  %s10330_s3, 16, %s47_s20, [#allocation5]  }
  0x30   :  { %s9985_s26 = scalar_lea.vmem %s69_s21, 128  ;;  %p9990_p7 = scmp.lt.s32.totalorder %s69_s21, %s69_s21 }
  0x31   :  { %p9986_p6 = scmp.ne.s32.totalorder %s69_s21, %s9985_s26  ;;  %p9991_p8 = scmp.lt.s32.totalorder %s9985_s26, %s9985_s26 }
  0x33   :  { %p9992_p9 = por %p9991_p8, %p9990_p7 }
  0x35   :  { %p9993_p10 = pnand %p9992_p9, %p9986_p6 }
  0x37   :  { %9996 = shalt.err (!%p9993_p10)
}
  0x38   :  { %71 = dma.hbm_to_vmem [thread:$0]  %s10332_s5, 128, %s69_s21, [#allocation8]  }
  0x39   :  { %s10034_s28 = smov [#allocation10]  }
  0x3a   :  { %s77_s29 = sshll.u32 %s10034_s28, 4  ;;  %s78_s29 = int_to_ptr.vmem [resolvable:$true] %s77_s29 }
  0x3b   :  { %s10005_s30 = scalar_lea.vmem %s78_s29, 8192  ;;  %p10010_p12 = scmp.lt.s32.totalorder %s78_s29, %s78_s29 }
  0x3c   :  { %p10006_p11 = scmp.ne.s32.totalorder %s78_s29, %s10005_s30  ;;  %p10011_p13 = scmp.lt.s32.totalorder %s10005_s30, %s10005_s30 }
  0x3e   :  { %p10012_p0 = por %p10011_p13, %p10010_p12 }
  0x40   :  { %p10013_p1 = pnand %p10012_p0, %p10006_p11 }
  0x42   :  { %10016 = shalt.err (!%p10013_p1)
}
  0x43   :  { %s10035_s3 = smov 64   ;;  %s10036_s8 = smov 4  }
  0x44   :  { %83 = dma.hbm_to_vmem [thread:$0]  %s10333_s6, 8192, %s78_s29, [#allocation11], %s10035_s3, %s10035_s3, %s10036_s8  }
  0x45   :  { %10017 = dma.done.wait [#allocation3], 512  }
  0x46   :  { %10018 = vsyncadd [#allocation3], 4294966784 }
  0x47   :  { %10019 = dma.done.wait [#allocation5], 48  }
  0x48   :  { %10020 = vsyncadd [#allocation5], 4294967248 }
  0x49   :  { %10021 = dma.done.wait [#allocation8], 131200  }
  0x4a   :  { %10022 = vsyncadd [#allocation8], 4294836096 }
  0x4b   :  { %10023 = dma.done.wait [#allocation11], 8192  }
  0x4c   :  { %10024 = vsyncadd [#allocation11], 4294959104  ;;  %v103_v0 = vld [vmem:[%s10328_s1] sm:$0xff]  ;;  %v104_v1 = vld [vmem:[%s10328_s1 + $0x8] sm:$0xff]  ;;  %vm238_vm0 = vcmask 1041408   ;;  %vm231_vm1 = vcmask 31744  }
  0x4d   :  { %v107_v2 = vcombine.high %v103_v0, %v103_v0  ;;  %v108_v3 = vcombine.high %v104_v1, %v104_v1  ;;  %v9826_v4 = vld [vmem:[#allocation2 + $0x4] ss:$8 sps:$4 sm:$0xff]   ;;  %v111_v5 = vpack.c.bf16 %v103_v0, %v103_v0  ;;  %v113_v6 = vpack.c.bf16 %v104_v1, %v104_v1  ;;  %v9829_v9 = vld [vmem:[#allocation2 + $0x14] ss:$8 sps:$4 sm:$0xff]   ;;  %v223_v10 = vld [vmem:[#allocation4] sm:$0x3] }
  0x4e   :  { %161 = vmatprep.mubr.bf16.mxu0 %v9826_v4  ;;  %v9824_v11 = vld [vmem:[#allocation2] ss:$8 sps:$4 sm:$0xff]   ;;  %v9827_v12 = vld [vmem:[#allocation2 + $0x10] ss:$8 sps:$4 sm:$0xff]   ;;  %212 = vmatprep.mubr.bf16.mxu1 %v9829_v9  ;;  %v240_v13 = vsel %vm238_vm0, %v223_v10, 0 }
  0x4f   :  { %v112_v7 = vpack.c.bf16 %v107_v2, %v107_v2  ;;  %v114_v8 = vpack.c.bf16 %v108_v3, %v108_v3  ;;  %v353_v14 = vld [vmem:[#allocation7 + $0x1c0] sm:$0xff] }
  0x50   :  { %v357_v15 = vld [vmem:[#allocation7 + $0x1e0] sm:$0xff] }
  0x51   :  { %143 = vmatprep.subr.bf16.mxu0 %v112_v7  ;;  %194 = vmatprep.subr.bf16.mxu1 %v114_v8  ;;  %v10104_v16 = vld [vmem:[#allocation7 + $0x5c0] sm:$0xff]  ;;  %v8679_v17 = vcombine.low %v353_v14, %v357_v15  ;;  %v8680_v18 = vcombine.high %v353_v14, %v357_v15 }
  0x52   :  { %144 = vmatpush1.bf16.xpose.msra.mxu0 %v111_v5  ;;  %195 = vmatpush1.bf16.xpose.msra.mxu1 %v113_v6  ;;  %v10106_v19 = vld [vmem:[#allocation7 + $0x5e0] sm:$0xff] }
  0x53   :  { %9808 = vmatprep.subr.msk.bf16.mxu0 %vm238_vm0, %v223_v10  ;;  %v345_v20 = vld [vmem:[#allocation7 + $0x180] sm:$0xff]  ;;  %v8807_v22 = vcombine.low %v10104_v16, %v10106_v19  ;;  %v8808_v23 = vcombine.high %v10104_v16, %v10106_v19  ;;  %6605 = vmatprep.subr.bf16.mxu1 %v8680_v18 }
  0x54   :  { %v349_v21 = vld [vmem:[#allocation7 + $0x1a0] sm:$0xff] }
  0x55   :  { %v8672_v24 = vcombine.high %v345_v20, %v349_v21  ;;  %v8671_v25 = vcombine.low %v345_v20, %v349_v21  ;;  %v337_v26 = vld [vmem:[#allocation7 + $0x140] sm:$0xff] }
  0x56   :  { %v341_v27 = vld [vmem:[#allocation7 + $0x160] sm:$0xff] }
  0x57   :  { %v8664_v28 = vcombine.high %v337_v26, %v341_v27  ;;  %v8663_v29 = vcombine.low %v337_v26, %v341_v27  ;;  %v329_v30 = vld [vmem:[#allocation7 + $0x100] sm:$0xff] }
  0x58   :  { %v333_v31 = vld [vmem:[#allocation7 + $0x120] sm:$0xff] }
  0x59   :  { %162 = vmatmul.mubr.bf16.vlgmr.msra.gmra.mxu0 %v9824_v11  ;;  %213 = vmatmul.mubr.bf16.vlgmr.msra.gmra.mxu1 %v9827_v12  ;;  %v8656_v32 = vcombine.high %v329_v30, %v333_v31  ;;  %v8655_v33 = vcombine.low %v329_v30, %v333_v31  ;;  %v321_v34 = vld [vmem:[#allocation7 + $0xc0] sm:$0xff] }
  0x5a   :  { %9803 = vmatpush3.bf16.msra.mxu0 %v240_v13  ;;  %6606 = vmatpush1.bf16.msra.mxu1 %v8679_v17  ;;  %v325_v35 = vld [vmem:[#allocation7 + $0xe0] sm:$0xff] }
  0x5b   :  { %6646 = vmatprep.subr.bf16.mxu0 %v8808_v23  ;;  %6607 = vmatprep.subr.bf16.mxu1 %v8672_v24  ;;  %v8648_v36 = vcombine.high %v321_v34, %v325_v35  ;;  %v8647_v37 = vcombine.low %v321_v34, %v325_v35  ;;  %v313_v38 = vld [vmem:[#allocation7 + $0x80] sm:$0xff] }
  0x5c   :  { %v317_v39 = vld [vmem:[#allocation7 + $0xa0] sm:$0xff] }
  0x5d   :  { %v8640_v40 = vcombine.high %v313_v38, %v317_v39  ;;  %v8639_v41 = vcombine.low %v313_v38, %v317_v39  ;;  %v305_v42 = vld [vmem:[#allocation7 + $0x40] sm:$0xff] }
  0x5e   :  { %6608 = vmatpush1.bf16.msra.mxu1 %v8671_v25  ;;  %v309_v43 = vld [vmem:[#allocation7 + $0x60] sm:$0xff] }
  0x5f   :  { %6609 = vmatprep.subr.bf16.mxu1 %v8664_v28  ;;  %v8632_v44 = vcombine.high %v305_v42, %v309_v43  ;;  %v8631_v45 = vcombine.low %v305_v42, %v309_v43  ;;  %v297_v46 = vld [vmem:[#allocation7] sm:$0xff] }
  0x60   :  { %v301_v47 = vld [vmem:[#allocation7 + $0x20] sm:$0xff] }
  0x61   :  { %v8624_v48 = vcombine.high %v297_v46, %v301_v47  ;;  %v8623_v49 = vcombine.low %v297_v46, %v301_v47  ;;  %v417_v50 = vld [vmem:[#allocation7 + $0x3c0] sm:$0xff] }
  0x62   :  { %6610 = vmatpush1.bf16.msra.mxu1 %v8663_v29  ;;  %v421_v51 = vld [vmem:[#allocation7 + $0x3e0] sm:$0xff] }
  0x63   :  { %6611 = vmatprep.subr.bf16.mxu1 %v8656_v32  ;;  %v8744_v52 = vcombine.high %v417_v50, %v421_v51  ;;  %v8743_v53 = vcombine.low %v417_v50, %v421_v51  ;;  %v409_v54 = vld [vmem:[#allocation7 + $0x380] sm:$0xff] }
  0x64   :  { %v413_v55 = vld [vmem:[#allocation7 + $0x3a0] sm:$0xff] }
  0x65   :  { %v8736_v56 = vcombine.high %v409_v54, %v413_v55  ;;  %v8735_v57 = vcombine.low %v409_v54, %v413_v55  ;;  %v401_v58 = vld [vmem:[#allocation7 + $0x340] sm:$0xff] }
  0x66   :  { %6612 = vmatpush1.bf16.msra.mxu1 %v8655_v33  ;;  %v405_v59 = vld [vmem:[#allocation7 + $0x360] sm:$0xff] }
  0x67   :  { %6613 = vmatprep.subr.bf16.mxu1 %v8648_v36  ;;  %v8728_v60 = vcombine.high %v401_v58, %v405_v59  ;;  %v8727_v61 = vcombine.low %v401_v58, %v405_v59  ;;  %v393_v62 = vld [vmem:[#allocation7 + $0x300] sm:$0xff] }
  0x68   :  { %v397_v63 = vld [vmem:[#allocation7 + $0x320] sm:$0xff] }
  0x69   :  { %v8720_v0 = vcombine.high %v393_v62, %v397_v63  ;;  %v8719_v1 = vcombine.low %v393_v62, %v397_v63  ;;  %v385_v2 = vld [vmem:[#allocation7 + $0x2c0] sm:$0xff] }
  0x6a   :  { %6614 = vmatpush1.bf16.msra.mxu1 %v8647_v37  ;;  %v389_v3 = vld [vmem:[#allocation7 + $0x2e0] sm:$0xff] }
  0x6b   :  { %6615 = vmatprep.subr.bf16.mxu1 %v8640_v40  ;;  %v8712_v4 = vcombine.high %v385_v2, %v389_v3  ;;  %v8711_v5 = vcombine.low %v385_v2, %v389_v3  ;;  %v473_v10 = vld [vmem:[#allocation7 + $0x580] sm:$0xff] }
  0x6c   :  { %v477_v11 = vld [vmem:[#allocation7 + $0x5a0] sm:$0xff] }
  0x6d   :  { %v8800_v20 = vcombine.high %v473_v10, %v477_v11  ;;  %v465_v21 = vld [vmem:[#allocation7 + $0x540] sm:$0xff]  ;;  %v8799_v24 = vcombine.low %v473_v10, %v477_v11 }
  0x6e   :  { %6616 = vmatpush1.bf16.msra.mxu1 %v8639_v41  ;;  %v469_v23 = vld [vmem:[#allocation7 + $0x560] sm:$0xff] }
  0x6f   :  { %6617 = vmatprep.subr.bf16.mxu1 %v8632_v44  ;;  %v8792_v25 = vcombine.high %v465_v21, %v469_v23  ;;  %v457_v26 = vld [vmem:[#allocation7 + $0x500] sm:$0xff]  ;;  %v8791_v28 = vcombine.low %v465_v21, %v469_v23 }
  0x70   :  { %v461_v27 = vld [vmem:[#allocation7 + $0x520] sm:$0xff] }
  0x71   :  { %v8784_v29 = vcombine.high %v457_v26, %v461_v27  ;;  %v449_v30 = vld [vmem:[#allocation7 + $0x4c0] sm:$0xff]  ;;  %v8783_v32 = vcombine.low %v457_v26, %v461_v27 }
  0x72   :  { %6618 = vmatpush1.bf16.msra.mxu1 %v8631_v45  ;;  %v453_v31 = vld [vmem:[#allocation7 + $0x4e0] sm:$0xff] }
  0x73   :  { %6619 = vmatprep.subr.bf16.mxu1 %v8624_v48  ;;  %v8776_v33 = vcombine.high %v449_v30, %v453_v31  ;;  %v441_v34 = vld [vmem:[#allocation7 + $0x480] sm:$0xff]  ;;  %v8775_v16 = vcombine.low %v449_v30, %v453_v31 }
  0x74   :  { %v445_v35 = vld [vmem:[#allocation7 + $0x4a0] sm:$0xff] }
  0x75   :  { %v8768_v19 = vcombine.high %v441_v34, %v445_v35  ;;  %v437_v36 = vld [vmem:[#allocation7 + $0x460] sm:$0xff]  ;;  %v8767_v37 = vcombine.low %v441_v34, %v445_v35  ;;  %v1323_v35 = vlaneseq }
  0x76   :  { %6620 = vmatpush1.bf16.msra.mxu1 %v8623_v49  ;;  %v425_v39 = vld [vmem:[#allocation7 + $0x400] sm:$0xff] }
  0x77   :  { %6621 = vmatprep.subr.bf16.mxu1 %v8744_v52  ;;  %v429_v40 = vld [vmem:[#allocation7 + $0x420] sm:$0xff] }
  0x78   :  { %v8752_v42 = vcombine.high %v425_v39, %v429_v40  ;;  %v545_v43 = vld [vmem:[#allocation7 + $0x7c0] sm:$0xff]  ;;  %v8751_v45 = vcombine.low %v425_v39, %v429_v40 }
  0x79   :  { %v549_v44 = vld [vmem:[#allocation7 + $0x7e0] sm:$0xff] }
  0x7a   :  { %6622 = vmatpush2.bf16.msra.mxu1 %v8743_v53  ;;  %v8872_v46 = vcombine.high %v545_v43, %v549_v44  ;;  %v537_v47 = vld [vmem:[#allocation7 + $0x780] sm:$0xff]  ;;  %v8871_v49 = vcombine.low %v545_v43, %v549_v44 }
  0x7b   :  { %6623 = vmatprep.subr.bf16.mxu1 %v8736_v56  ;;  %v541_v48 = vld [vmem:[#allocation7 + $0x7a0] sm:$0xff] }
  0x7c   :  { %v8864_v50 = vcombine.high %v537_v47, %v541_v48  ;;  %v529_v51 = vld [vmem:[#allocation7 + $0x740] sm:$0xff]  ;;  %v8863_v53 = vcombine.low %v537_v47, %v541_v48 }
  0x7d   :  { %v533_v52 = vld [vmem:[#allocation7 + $0x760] sm:$0xff] }
  0x7e   :  { %6624 = vmatpush2.bf16.msra.mxu1 %v8735_v57  ;;  %v8856_v54 = vcombine.high %v529_v51, %v533_v52  ;;  %v521_v55 = vld [vmem:[#allocation7 + $0x700] sm:$0xff]  ;;  %v8855_v57 = vcombine.low %v529_v51, %v533_v52 }
  0x7f   :  { %6625 = vmatprep.subr.bf16.mxu1 %v8728_v60  ;;  %v525_v56 = vld [vmem:[#allocation7 + $0x720] sm:$0xff] }
  0x80   :  { %v8848_v58 = vcombine.high %v521_v55, %v525_v56  ;;  %v8847_v59 = vcombine.low %v521_v55, %v525_v56  ;;  %v513_v60 = vld [vmem:[#allocation7 + $0x6c0] sm:$0xff] }
  0x81   :  { %v489_v23 = vld [vmem:[#allocation7 + $0x600] sm:$0xff] }
  0x82   :  { %6626 = vmatpush2.bf16.msra.mxu1 %v8727_v61  ;;  %v517_v61 = vld [vmem:[#allocation7 + $0x6e0] sm:$0xff] }
  0x83   :  { %6627 = vmatprep.subr.bf16.mxu1 %v8720_v0  ;;  %v8840_v62 = vcombine.high %v513_v60, %v517_v61  ;;  %v8839_v63 = vcombine.low %v513_v60, %v517_v61  ;;  %v377_v0 = vld [vmem:[#allocation7 + $0x280] sm:$0xff] }
  0x84   :  { %v609_v27 = vld [vmem:[#allocation7 + $0x9c0] sm:$0xff] }
  0x85   :  { %v10115_v31 = vld [vmem:[#allocation7 + $0xdc0] sm:$0xff] }
  0x86   :  { %6628 = vmatpush2.bf16.msra.mxu1 %v8719_v1  ;;  %v381_v1 = vld [vmem:[#allocation7 + $0x2a0] sm:$0xff] }
  0x87   :  { %6629 = vmatprep.subr.bf16.mxu1 %v8712_v4  ;;  %v8704_v2 = vcombine.high %v377_v0, %v381_v1  ;;  %v8703_v3 = vcombine.low %v377_v0, %v381_v1  ;;  %v505_v4 = vld [vmem:[#allocation7 + $0x680] sm:$0xff] }
  0x88   :  { %v729_v0 = vld [vmem:[#allocation7 + $0xd80] sm:$0xff] }
  0x89   :  { %v733_v1 = vld [vmem:[#allocation7 + $0xda0] sm:$0xff] }
  0x8a   :  { %6630 = vmatpush2.bf16.msra.mxu1 %v8711_v5  ;;  %v509_v5 = vld [vmem:[#allocation7 + $0x6a0] sm:$0xff] }
  0x8b   :  { %6631 = vmatprep.subr.bf16.mxu1 %v8704_v2 }
  0x8e   :  { %6632 = vmatpush2.bf16.msra.mxu1 %v8703_v3 }
 0x119   :  { %v163_v6 = vpop.f32.mrf.mxu0  ;;  %v214_v7 = vpop.f32.mrf.mxu1 }
 0x11b   :  { %v165_v8 = vpop.f32.mrf.mxu0  ;;  %v216_v9 = vpop.f32.mrf.mxu1 }
 0x11c   :  { %v369_v8 = vld [vmem:[#allocation7 + $0x240] sm:$0xff] }
 0x11d   :  { %v166_v12 = vpop.f32.mrf.mxu0  ;;  %v217_v13 = vpop.f32.mrf.mxu1  ;;  %v373_v9 = vld [vmem:[#allocation7 + $0x260] sm:$0xff] }
 0x11e   :  { %v221_v14 = vpack.c.bf16 %v166_v12, %v163_v6  ;;  %v222_v15 = vpack.c.bf16 %v217_v13, %v214_v7  ;;  %v8832_v6 = vcombine.high %v505_v4, %v509_v5  ;;  %v8831_v7 = vcombine.low %v505_v4, %v509_v5  ;;  %v497_v12 = vld [vmem:[#allocation7 + $0x640] sm:$0xff] }
 0x11f   :  { %v168_v17 = vpop.f32.mrf.mxu0  ;;  %v219_v18 = vpop.f32.mrf.mxu1  ;;  %v8696_v10 = vcombine.high %v369_v8, %v373_v9  ;;  %v8695_v11 = vcombine.low %v369_v8, %v373_v9  ;;  %v501_v13 = vld [vmem:[#allocation7 + $0x660] sm:$0xff] }
 0x120   :  { %9804 = vmatprep.mubr.msk.bf16.mxu0 %vm231_vm1, %v221_v14  ;;  %v8824_v14 = vcombine.high %v497_v12, %v501_v13  ;;  %v361_v17 = vld [vmem:[#allocation7 + $0x200] sm:$0xff] }
 0x121   :  { %9805 = vmatmul.mubr.msk.bf16.vlgmr.msra.gmra.mxu0 %vm231_vm1, %v222_v15  ;;  %6633 = vmatprep.subr.bf16.mxu1 %v8696_v10  ;;  %v8823_v15 = vcombine.low %v497_v12, %v501_v13  ;;  %v365_v18 = vld [vmem:[#allocation7 + $0x220] sm:$0xff]  ;;  %v9056_v13 = vcombine.high %v729_v0, %v733_v1 }
 0x122   :  { %6647 = vmatpush1.bf16.msra.mxu0 %v8807_v22  ;;  %v433_v22 = vld [vmem:[#allocation7 + $0x440] sm:$0xff]  ;;  %6634 = vmatpush2.bf16.msra.mxu1 %v8695_v11  ;;  %v8687_v21 = vcombine.low %v361_v17, %v365_v18 }
 0x123   :  { %6648 = vmatprep.subr.bf16.mxu0 %v8800_v20  ;;  %v8760_v38 = vcombine.high %v433_v22, %v437_v36  ;;  %v8759_v41 = vcombine.low %v433_v22, %v437_v36  ;;  %v8688_v20 = vcombine.high %v361_v17, %v365_v18  ;;  %v8618_v22 = vld [vmem:[#allocation6] ss:$0 sm:$0xff]  ;;  %v593_v8 = vld [vmem:[#allocation7 + $0x940] sm:$0xff] }
 0x124   :  { %v597_v9 = vld [vmem:[#allocation7 + $0x960] sm:$0xff] }
 0x125   :  { %6635 = vmatprep.subr.bf16.mxu1 %v8688_v20  ;;  %v721_v18 = vld [vmem:[#allocation7 + $0xd40] sm:$0xff] }
 0x126   :  { %6649 = vmatpush1.bf16.msra.mxu0 %v8799_v24  ;;  %v493_v24 = vld [vmem:[#allocation7 + $0x620] sm:$0xff]  ;;  %6636 = vmatpush2.bf16.msra.mxu1 %v8687_v21 }
 0x127   :  { %6650 = vmatprep.subr.bf16.mxu0 %v8792_v25  ;;  %v8816_v25 = vcombine.high %v489_v23, %v493_v24  ;;  %v8815_v26 = vcombine.low %v489_v23, %v493_v24  ;;  %v725_v20 = vld [vmem:[#allocation7 + $0xd60] sm:$0xff]  ;;  %v8920_v23 = vcombine.high %v593_v8, %v597_v9 }
 0x12a   :  { %6651 = vmatpush1.bf16.msra.mxu0 %v8791_v28  ;;  %v613_v28 = vld [vmem:[#allocation7 + $0x9e0] sm:$0xff] }
 0x12b   :  { %6652 = vmatprep.subr.bf16.mxu0 %v8784_v29  ;;  %v8936_v29 = vcombine.high %v609_v27, %v613_v28  ;;  %v8935_v30 = vcombine.low %v609_v27, %v613_v28  ;;  %v589_v27 = vld [vmem:[#allocation7 + $0x920] sm:$0xff]  ;;  %v9048_v28 = vcombine.high %v721_v18, %v725_v20 }
 0x12d   :  { %6687 = vmatprep.subr.bf16.mxu1 %v8936_v29  ;;  %v8919_v29 = vcombine.low %v593_v8, %v597_v9  ;;  %v801_v9 = vld [vmem:[#allocation7 + $0xfc0] sm:$0xff] }
 0x12e   :  { %6653 = vmatpush1.bf16.msra.mxu0 %v8783_v32  ;;  %v10117_v32 = vld [vmem:[#allocation7 + $0xde0] sm:$0xff] }
 0x12f   :  { %6654 = vmatprep.subr.bf16.mxu0 %v8776_v33  ;;  %v9064_v33 = vcombine.high %v10115_v31, %v10117_v32  ;;  %v9063_v34 = vcombine.low %v10115_v31, %v10117_v32  ;;  %v717_v31 = vld [vmem:[#allocation7 + $0xd20] sm:$0xff] }
 0x132   :  { %6655 = vmatpush1.bf16.msra.mxu0 %v8775_v16  ;;  %v10037_v16 = vmov 1966171168  }
 0x133   :  { %6656 = vmatprep.subr.bf16.mxu0 %v8768_v19  ;;  %v1373_v19 = vunpack.c.l.s4 %v10037_v16  ;;  %v581_v16 = vld [vmem:[#allocation7 + $0x8e0] sm:$0xff] }
 0x135   :  { %v1374_v39 = vunpack.c.0.s8 %v1373_v19 }
 0x136   :  { %6657 = vmatpush1.bf16.msra.mxu0 %v8767_v37 }
 0x137   :  { %6658 = vmatprep.subr.bf16.mxu0 %v8760_v38  ;;  %v10123_v38 = vshrl.u32 %v1323_v35, 7  ;;  %v577_v35 = vld [vmem:[#allocation7 + $0x8c0] sm:$0xff] }
 0x13a   :  { %6659 = vmatpush1.bf16.msra.mxu0 %v8759_v41 }
 0x13b   :  { %6660 = vmatprep.subr.bf16.mxu0 %v8752_v42 }
 0x13e   :  { %6661 = vmatpush1.bf16.msra.mxu0 %v8751_v45  ;;  %v1377_v45 = vsub.s32 %v1374_v39, %v10123_v38 }
 0x13f   :  { %6662 = vmatprep.subr.bf16.mxu0 %v8872_v46 }
 0x142   :  { %6663 = vmatpush2.bf16.msra.mxu0 %v8871_v49 }
 0x143   :  { %6664 = vmatprep.subr.bf16.mxu0 %v8864_v50 }
 0x146   :  { %6665 = vmatpush2.bf16.msra.mxu0 %v8863_v53 }
 0x147   :  { %6666 = vmatprep.subr.bf16.mxu0 %v8856_v54 }
 0x14a   :  { %6667 = vmatpush2.bf16.msra.mxu0 %v8855_v57  ;;  %v601_v57 = vld [vmem:[#allocation7 + $0x980] sm:$0xff] }
 0x14b   :  { %6668 = vmatprep.subr.bf16.mxu0 %v8848_v58  ;;  %v605_v58 = vld [vmem:[#allocation7 + $0x9a0] sm:$0xff] }
 0x14c   :  { %v8928_v3 = vcombine.high %v601_v57, %v605_v58 }
 0x14e   :  { %6669 = vmatpush2.bf16.msra.mxu0 %v8847_v59 }
 0x14f   :  { %6670 = vmatprep.subr.bf16.mxu0 %v8840_v62 }
 0x152   :  { %6671 = vmatpush2.bf16.msra.mxu0 %v8839_v63 }
 0x153   :  { %6672 = vmatprep.subr.bf16.mxu0 %v8832_v6 }
 0x156   :  { %6673 = vmatpush2.bf16.msra.mxu0 %v8831_v7  ;;  %v8927_v7 = vcombine.low %v601_v57, %v605_v58  ;;  %v557_v57 = vld [vmem:[#allocation7 + $0x820] sm:$0xff] }
 0x157   :  { %6674 = vmatprep.subr.bf16.mxu0 %v8824_v14 }
 0x15a   :  { %6675 = vmatpush2.bf16.msra.mxu0 %v8823_v15 }
 0x15b   :  { %6676 = vmatprep.subr.bf16.mxu0 %v8816_v25  ;;  %v9055_v25 = vcombine.low %v729_v0, %v733_v1  ;;  %v685_v0 = vld [vmem:[#allocation7 + $0xc20] sm:$0xff] }
 0x15e   :  { %6677 = vmatpush2.bf16.msra.mxu0 %v8815_v26  ;;  %v585_v26 = vld [vmem:[#allocation7 + $0x900] sm:$0xff] }
 0x15f   :  { %6728 = vmatprep.subr.bf16.mxu0 %v9064_v33  ;;  %v8912_v32 = vcombine.high %v585_v26, %v589_v27  ;;  %v9047_v33 = vcombine.low %v721_v18, %v725_v20  ;;  %v8911_v19 = vcombine.low %v585_v26, %v589_v27  ;;  %v665_v18 = vld [vmem:[#allocation7 + $0xb80] sm:$0xff] }
 0x160   :  { %v669_v20 = vld [vmem:[#allocation7 + $0xba0] sm:$0xff] }
 0x161   :  { %v793_v26 = vld [vmem:[#allocation7 + $0xf80] sm:$0xff] }
 0x162   :  { %v797_v27 = vld [vmem:[#allocation7 + $0xfa0] sm:$0xff] }
 0x1e1   :  { %v9806_v36 = vpop.f32.mrf.mxu0 }
 0x1e2   :  { %v285_v37 = vadd.f32 %v9806_v36, %v8618_v22  ;;  %v709_v36 = vld [vmem:[#allocation7 + $0xce0] sm:$0xff] }
 0x1e3   :  { %v276_v40 = vpop.f32.mrf.mxu0 }
 0x1e4   :  { %v277_v41 = vadd.f32 %v8618_v22, %v276_v40  ;;  %v293_v43 = vmax.f32 %v285_v37, 0.0  ;;  %v8904_v37 = vcombine.high %v577_v35, %v581_v16  ;;  %v569_v40 = vld [vmem:[#allocation7 + $0x880] sm:$0xff] }
 0x1e5   :  { %v9807_v42 = vpop.f32.mrf.mxu0 }
 0x1e6   :  { %v291_v44 = vmax.f32 %v277_v41, 0.0  ;;  %v288_v46 = vadd.f32 %v9807_v42, %v8618_v22  ;;  %v573_v41 = vld [vmem:[#allocation7 + $0x8a0] sm:$0xff] }
 0x1e7   :  { %v279_v47 = vpop.f32.mrf.mxu0 }
 0x1e8   :  { %v8621_v48 = vpack.i.bf16 %v293_v43, %v291_v44  ;;  %v280_v49 = vadd.f32 %v8618_v22, %v279_v47  ;;  %v294_v52 = vmax.f32 %v288_v46, 0.0  ;;  %v705_v22 = vld [vmem:[#allocation7 + $0xcc0] sm:$0xff]  ;;  %v8903_v43 = vcombine.low %v577_v35, %v581_v16 }
 0x1e9   :  { %v9032_v42 = vcombine.high %v705_v22, %v709_v36  ;;  %v697_v44 = vld [vmem:[#allocation7 + $0xc80] sm:$0xff]  ;;  %v8896_v46 = vcombine.high %v569_v40, %v573_v41  ;;  %v9031_v47 = vcombine.low %v705_v22, %v709_v36 }
 0x1ea   :  { %v1371_v50 = vcombine.high %v8621_v48, %v8621_v48  ;;  %v1378_v51 = vrot.slane %v8621_v48, %v1377_v45  ;;  %v292_v53 = vmax.f32 %v280_v49, 0.0  ;;  %v561_v48 = vld [vmem:[#allocation7 + $0x840] sm:$0xff] }
 0x1eb   :  { %v565_v49 = vld [vmem:[#allocation7 + $0x860] sm:$0xff] }
 0x1ec   :  { %v1385_v54 = vrot.slane %v1371_v50, %v1377_v45  ;;  %v1386_v55 = vcombine.high %v1378_v51, %v1378_v51  ;;  %v8622_v56 = vpack.i.bf16 %v294_v52, %v292_v53  ;;  %v10126_v59 = vrot.slane %v1378_v51, %v1377_v45  ;;  %v689_v52 = vld [vmem:[#allocation7 + $0xc40] sm:$0xff] }
 0x1ed   :  { %v8895_v51 = vcombine.low %v569_v40, %v573_v41  ;;  %v693_v53 = vld [vmem:[#allocation7 + $0xc60] sm:$0xff] }
 0x1ee   :  { %v1387_v60 = vcombine.high %v1385_v54, %v1385_v54  ;;  %v10128_v61 = vrot.slane %v1385_v54, %v1377_v45  ;;  %v10130_v62 = vrot.slane %v1386_v55, %v1377_v45  ;;  %v1420_v63 = vcombine.high %v8622_v56, %v8622_v56  ;;  %v785_v35 = vld [vmem:[#allocation7 + $0xf40] sm:$0xff] }
 0x1ef   :  { %v1427_v2 = vrot.slane %v8622_v56, %v1377_v45  ;;  %v10144_v12 = vcombine.high %v10126_v59, %v10126_v59  ;;  %v8888_v54 = vcombine.high %v561_v48, %v565_v49  ;;  %v553_v56 = vld [vmem:[#allocation7 + $0x800] sm:$0xff]  ;;  %v9016_v58 = vcombine.high %v689_v52, %v693_v53 }
 0x1f0   :  { %v10132_v4 = vrot.slane %v1387_v60, %v1377_v45  ;;  %v1434_v5 = vrot.slane %v1420_v63, %v1377_v45  ;;  %6637 = vmatprep.mubr.bf16.mxu1 %v10130_v62  ;;  %v10137_v6 = vcombine.high %v10130_v62, %v10130_v62  ;;  %v8887_v60 = vcombine.low %v561_v48, %v565_v49  ;;  %v681_v63 = vld [vmem:[#allocation7 + $0xc00] sm:$0xff] }
 0x1f1   :  { %v1435_v10 = vcombine.high %v1427_v2, %v1427_v2  ;;  %v10139_v11 = vrot.slane %v1427_v2, %v1377_v45  ;;  %6638 = vmatmul.mubr.bf16.vlgmr.msra.gmra.mxu1 %v10126_v59  ;;  %v8880_v1 = vcombine.high %v553_v56, %v557_v57  ;;  %v9015_v2 = vcombine.low %v689_v52, %v693_v53  ;;  %v789_v16 = vld [vmem:[#allocation7 + $0xf60] sm:$0xff] }
 0x1f2   :  { %v1436_v14 = vcombine.high %v1434_v5, %v1434_v5  ;;  %v10146_v15 = vrot.slane %v1434_v5, %v1377_v45  ;;  %6688 = vmatpush1.bf16.msra.mxu1 %v8935_v30  ;;  %6678 = vmatprep.mubr.bf16.mxu0 %v10137_v6  ;;  %v10151_v17 = vcombine.high %v10132_v4, %v10132_v4  ;;  %v713_v30 = vld [vmem:[#allocation7 + $0xd00] sm:$0xff] }
 0x1f3   :  { %v10153_v21 = vrot.slane %v1435_v10, %v1377_v45  ;;  %6719 = vmatprep.mubr.bf16.mxu1 %v10132_v4  ;;  %6679 = vmatmul.mubr.bf16.vlgmr.msra.gmra.mxu0 %v10144_v12  ;;  %v9039_v39 = vcombine.low %v713_v30, %v717_v31  ;;  %v677_v5 = vld [vmem:[#allocation7 + $0xbe0] sm:$0xff]  ;;  %v8879_v8 = vcombine.low %v553_v56, %v557_v57 }
 0x1f4   :  { %v10157_v24 = vrot.slane %v1436_v14, %v1377_v45  ;;  %6729 = vmatpush1.bf16.msra.mxu0 %v9063_v34  ;;  %6689 = vmatprep.subr.bf16.mxu1 %v8928_v3  ;;  %v9040_v34 = vcombine.high %v713_v30, %v717_v31  ;;  %v701_v45 = vld [vmem:[#allocation7 + $0xca0] sm:$0xff]  ;;  %v9007_v14 = vcombine.low %v681_v63, %v685_v0 }
 0x1f5   :  { %6760 = vmatprep.mubr.bf16.mxu0 %v10151_v17  ;;  %6730 = vmatprep.subr.bf16.mxu0 %v9056_v13  ;;  %v9024_v50 = vcombine.high %v697_v44, %v701_v45  ;;  %v9023_v55 = vcombine.low %v697_v44, %v701_v45  ;;  %v673_v3 = vld [vmem:[#allocation7 + $0xbc0] sm:$0xff] }
 0x1f6   :  { %6690 = vmatpush1.bf16.msra.mxu1 %v8927_v7  ;;  %v9008_v7 = vcombine.high %v681_v63, %v685_v0  ;;  %v805_v10 = vld [vmem:[#allocation7 + $0xfe0] sm:$0xff]  ;;  %v9000_v13 = vcombine.high %v673_v3, %v677_v5 }
 0x1f7   :  { %6691 = vmatprep.subr.bf16.mxu1 %v8920_v23  ;;  %v9128_v23 = vcombine.high %v801_v9, %v805_v10  ;;  %v657_v30 = vld [vmem:[#allocation7 + $0xb40] sm:$0xff] }
 0x1f8   :  { %6731 = vmatpush1.bf16.msra.mxu0 %v9055_v25  ;;  %v8999_v25 = vcombine.low %v673_v3, %v677_v5  ;;  %v661_v31 = vld [vmem:[#allocation7 + $0xb60] sm:$0xff] }
 0x1f9   :  { %6732 = vmatprep.subr.bf16.mxu0 %v9048_v28  ;;  %v8992_v28 = vcombine.high %v665_v18, %v669_v20  ;;  %v649_v22 = vld [vmem:[#allocation7 + $0xb00] sm:$0xff] }
 0x1fa   :  { %6692 = vmatpush1.bf16.msra.mxu1 %v8919_v29  ;;  %v9127_v29 = vcombine.low %v801_v9, %v805_v10  ;;  %v653_v36 = vld [vmem:[#allocation7 + $0xb20] sm:$0xff] }
 0x1fb   :  { %6693 = vmatprep.subr.bf16.mxu1 %v8912_v32  ;;  %v9120_v32 = vcombine.high %v793_v26, %v797_v27  ;;  %v777_v40 = vld [vmem:[#allocation7 + $0xf00] sm:$0xff] }
 0x1fc   :  { %6733 = vmatpush1.bf16.msra.mxu0 %v9047_v33  ;;  %v8991_v33 = vcombine.low %v665_v18, %v669_v20  ;;  %v781_v41 = vld [vmem:[#allocation7 + $0xf20] sm:$0xff] }
 0x1fd   :  { %6734 = vmatprep.subr.bf16.mxu0 %v9040_v34  ;;  %v8984_v34 = vcombine.high %v657_v30, %v661_v31  ;;  %v641_v44 = vld [vmem:[#allocation7 + $0xac0] sm:$0xff] }
 0x1fe   :  { %6694 = vmatpush1.bf16.msra.mxu1 %v8911_v19  ;;  %v9119_v19 = vcombine.low %v793_v26, %v797_v27  ;;  %v645_v45 = vld [vmem:[#allocation7 + $0xae0] sm:$0xff] }
 0x1ff   :  { %6695 = vmatprep.subr.bf16.mxu1 %v8904_v37  ;;  %v9112_v37 = vcombine.high %v785_v35, %v789_v16  ;;  %v769_v48 = vld [vmem:[#allocation7 + $0xec0] sm:$0xff] }
 0x200   :  { %6735 = vmatpush1.bf16.msra.mxu0 %v9039_v39  ;;  %v8983_v39 = vcombine.low %v657_v30, %v661_v31  ;;  %v773_v49 = vld [vmem:[#allocation7 + $0xee0] sm:$0xff] }
 0x201   :  { %6736 = vmatprep.subr.bf16.mxu0 %v9032_v42  ;;  %v8976_v42 = vcombine.high %v649_v22, %v653_v36  ;;  %v633_v52 = vld [vmem:[#allocation7 + $0xa80] sm:$0xff] }
 0x202   :  { %6696 = vmatpush1.bf16.msra.mxu1 %v8903_v43  ;;  %v9111_v43 = vcombine.low %v785_v35, %v789_v16  ;;  %v637_v53 = vld [vmem:[#allocation7 + $0xaa0] sm:$0xff] }
 0x203   :  { %6697 = vmatprep.subr.bf16.mxu1 %v8896_v46  ;;  %v9104_v46 = vcombine.high %v777_v40, %v781_v41  ;;  %v761_v56 = vld [vmem:[#allocation7 + $0xe80] sm:$0xff] }
 0x204   :  { %6737 = vmatpush1.bf16.msra.mxu0 %v9031_v47  ;;  %v8975_v47 = vcombine.low %v649_v22, %v653_v36  ;;  %v765_v57 = vld [vmem:[#allocation7 + $0xea0] sm:$0xff] }
 0x205   :  { %6738 = vmatprep.subr.bf16.mxu0 %v9024_v50  ;;  %v8968_v50 = vcombine.high %v641_v44, %v645_v45  ;;  %v625_v63 = vld [vmem:[#allocation7 + $0xa40] sm:$0xff] }
 0x206   :  { %6698 = vmatpush1.bf16.msra.mxu1 %v8895_v51  ;;  %v9103_v51 = vcombine.low %v777_v40, %v781_v41  ;;  %v629_v0 = vld [vmem:[#allocation7 + $0xa60] sm:$0xff] }
 0x207   :  { %6699 = vmatprep.subr.bf16.mxu1 %v8888_v54  ;;  %v9096_v54 = vcombine.high %v769_v48, %v773_v49  ;;  %v753_v3 = vld [vmem:[#allocation7 + $0xe40] sm:$0xff] }
 0x208   :  { %6739 = vmatpush1.bf16.msra.mxu0 %v9023_v55  ;;  %v8967_v55 = vcombine.low %v641_v44, %v645_v45  ;;  %v757_v5 = vld [vmem:[#allocation7 + $0xe60] sm:$0xff]  ;;  %v10168_v44 = vcombine.high %v10153_v21, %v10153_v21 }
 0x209   :  { %6740 = vmatprep.subr.bf16.mxu0 %v9016_v58  ;;  %v8960_v58 = vcombine.high %v633_v52, %v637_v53  ;;  %v617_v9 = vld [vmem:[#allocation7 + $0xa00] sm:$0xff] }
 0x20a   :  { %6700 = vmatpush1.bf16.msra.mxu1 %v8887_v60  ;;  %v9095_v60 = vcombine.low %v769_v48, %v773_v49  ;;  %v621_v10 = vld [vmem:[#allocation7 + $0xa20] sm:$0xff] }
 0x20b   :  { %6701 = vmatprep.subr.bf16.mxu1 %v8880_v1  ;;  %v9088_v1 = vcombine.high %v761_v56, %v765_v57  ;;  %v745_v18 = vld [vmem:[#allocation7 + $0xe00] sm:$0xff] }
 0x20c   :  { %6741 = vmatpush1.bf16.msra.mxu0 %v9015_v2  ;;  %v8959_v2 = vcombine.low %v633_v52, %v637_v53  ;;  %v749_v20 = vld [vmem:[#allocation7 + $0xe20] sm:$0xff] }
 0x20d   :  { %6742 = vmatprep.subr.bf16.mxu0 %v9008_v7  ;;  %v8952_v7 = vcombine.high %v625_v63, %v629_v0  ;;  %v865_v26 = vld [vmem:[#allocation7 + $0x11c0] sm:$0xff] }
 0x20e   :  { %6702 = vmatpush1.bf16.msra.mxu1 %v8879_v8  ;;  %v9087_v8 = vcombine.low %v761_v56, %v765_v57  ;;  %v869_v27 = vld [vmem:[#allocation7 + $0x11e0] sm:$0xff] }
 0x20f   :  { %6703 = vmatprep.subr.bf16.mxu1 %v9000_v13  ;;  %v9080_v13 = vcombine.high %v753_v3, %v757_v5  ;;  %v993_v30 = vld [vmem:[#allocation7 + $0x15c0] sm:$0xff] }
 0x210   :  { %6743 = vmatpush1.bf16.msra.mxu0 %v9007_v14  ;;  %v8951_v14 = vcombine.low %v625_v63, %v629_v0  ;;  %v997_v31 = vld [vmem:[#allocation7 + $0x15e0] sm:$0xff] }
 0x211   :  { %6744 = vmatprep.subr.bf16.mxu0 %v9128_v23  ;;  %v8944_v23 = vcombine.high %v617_v9, %v621_v10  ;;  %v857_v35 = vld [vmem:[#allocation7 + $0x1180] sm:$0xff] }
 0x212   :  { %6704 = vmatpush2.bf16.msra.mxu1 %v8999_v25  ;;  %v9079_v25 = vcombine.low %v753_v3, %v757_v5  ;;  %v861_v16 = vld [vmem:[#allocation7 + $0x11a0] sm:$0xff] }
 0x213   :  { %6705 = vmatprep.subr.bf16.mxu1 %v8992_v28  ;;  %v9072_v28 = vcombine.high %v745_v18, %v749_v20  ;;  %v985_v22 = vld [vmem:[#allocation7 + $0x1580] sm:$0xff]  ;;  %v9183_v45 = vcombine.low %v857_v35, %v861_v16 }
 0x214   :  { %6745 = vmatpush2.bf16.msra.mxu0 %v9127_v29  ;;  %v8943_v29 = vcombine.low %v617_v9, %v621_v10  ;;  %v989_v36 = vld [vmem:[#allocation7 + $0x15a0] sm:$0xff] }
 0x215   :  { %6746 = vmatprep.subr.bf16.mxu0 %v9120_v32  ;;  %v9192_v32 = vcombine.high %v865_v26, %v869_v27  ;;  %v849_v40 = vld [vmem:[#allocation7 + $0x1140] sm:$0xff]  ;;  %v9311_v49 = vcombine.low %v985_v22, %v989_v36 }
 0x216   :  { %6706 = vmatpush2.bf16.msra.mxu1 %v8991_v33  ;;  %v9071_v33 = vcombine.low %v745_v18, %v749_v20  ;;  %v853_v41 = vld [vmem:[#allocation7 + $0x1160] sm:$0xff] }
 0x217   :  { %6707 = vmatprep.subr.bf16.mxu1 %v8984_v34  ;;  %v9320_v34 = vcombine.high %v993_v30, %v997_v31  ;;  %v9176_v48 = vcombine.high %v849_v40, %v853_v41  ;;  %v9175_v53 = vcombine.low %v849_v40, %v853_v41 }
 0x218   :  { %6747 = vmatpush2.bf16.msra.mxu0 %v9119_v19  ;;  %v9191_v19 = vcombine.low %v865_v26, %v869_v27 }
 0x219   :  { %6748 = vmatprep.subr.bf16.mxu0 %v9112_v37  ;;  %v9184_v37 = vcombine.high %v857_v35, %v861_v16 }
 0x21a   :  { %6708 = vmatpush2.bf16.msra.mxu1 %v8983_v39  ;;  %v9319_v39 = vcombine.low %v993_v30, %v997_v31 }
 0x21b   :  { %6709 = vmatprep.subr.bf16.mxu1 %v8976_v42  ;;  %v10163_v42 = vcombine.high %v10128_v61, %v10128_v61 }
 0x21c   :  { %6749 = vmatpush2.bf16.msra.mxu0 %v9111_v43  ;;  %v9312_v43 = vcombine.high %v985_v22, %v989_v36 }
 0x21d   :  { %6750 = vmatprep.subr.bf16.mxu0 %v9104_v46  ;;  %v977_v46 = vld [vmem:[#allocation7 + $0x1540] sm:$0xff] }
 0x21e   :  { %6710 = vmatpush2.bf16.msra.mxu1 %v8975_v47  ;;  %v981_v47 = vld [vmem:[#allocation7 + $0x1560] sm:$0xff] }
 0x21f   :  { %6711 = vmatprep.subr.bf16.mxu1 %v8968_v50  ;;  %v841_v50 = vld [vmem:[#allocation7 + $0x1100] sm:$0xff]  ;;  %v9304_v52 = vcombine.high %v977_v46, %v981_v47  ;;  %v9303_v57 = vcombine.low %v977_v46, %v981_v47 }
 0x220   :  { %6751 = vmatpush2.bf16.msra.mxu0 %v9103_v51  ;;  %v845_v51 = vld [vmem:[#allocation7 + $0x1120] sm:$0xff] }
 0x221   :  { %6752 = vmatprep.subr.bf16.mxu0 %v9096_v54  ;;  %v969_v54 = vld [vmem:[#allocation7 + $0x1500] sm:$0xff]  ;;  %v9168_v56 = vcombine.high %v841_v50, %v845_v51  ;;  %v9167_v0 = vcombine.low %v841_v50, %v845_v51 }
 0x222   :  { %6712 = vmatpush2.bf16.msra.mxu1 %v8967_v55  ;;  %v973_v55 = vld [vmem:[#allocation7 + $0x1520] sm:$0xff] }
 0x223   :  { %6713 = vmatprep.subr.bf16.mxu1 %v8960_v58  ;;  %v833_v58 = vld [vmem:[#allocation7 + $0x10c0] sm:$0xff]  ;;  %v9296_v63 = vcombine.high %v969_v54, %v973_v55  ;;  %v9295_v5 = vcombine.low %v969_v54, %v973_v55 }
 0x224   :  { %6753 = vmatpush2.bf16.msra.mxu0 %v9095_v60  ;;  %v837_v60 = vld [vmem:[#allocation7 + $0x10e0] sm:$0xff] }
 0x225   :  { %6754 = vmatprep.subr.bf16.mxu0 %v9088_v1  ;;  %v961_v1 = vld [vmem:[#allocation7 + $0x14c0] sm:$0xff]  ;;  %v9160_v3 = vcombine.high %v833_v58, %v837_v60  ;;  %v9159_v10 = vcombine.low %v833_v58, %v837_v60 }
 0x226   :  { %6714 = vmatpush2.bf16.msra.mxu1 %v8959_v2  ;;  %v965_v2 = vld [vmem:[#allocation7 + $0x14e0] sm:$0xff] }
 0x227   :  { %6715 = vmatprep.subr.bf16.mxu1 %v8952_v7  ;;  %v825_v7 = vld [vmem:[#allocation7 + $0x1080] sm:$0xff]  ;;  %v9288_v9 = vcombine.high %v961_v1, %v965_v2  ;;  %v9287_v20 = vcombine.low %v961_v1, %v965_v2 }
 0x228   :  { %6755 = vmatpush2.bf16.msra.mxu0 %v9087_v8  ;;  %v829_v8 = vld [vmem:[#allocation7 + $0x10a0] sm:$0xff] }
 0x229   :  { %6756 = vmatprep.subr.bf16.mxu0 %v9080_v13  ;;  %v953_v13 = vld [vmem:[#allocation7 + $0x1480] sm:$0xff]  ;;  %v9152_v18 = vcombine.high %v825_v7, %v829_v8  ;;  %v9151_v27 = vcombine.low %v825_v7, %v829_v8 }
 0x22a   :  { %6716 = vmatpush2.bf16.msra.mxu1 %v8951_v14  ;;  %v957_v14 = vld [vmem:[#allocation7 + $0x14a0] sm:$0xff] }
 0x22b   :  { %6717 = vmatprep.subr.bf16.mxu1 %v8944_v23  ;;  %v817_v23 = vld [vmem:[#allocation7 + $0x1040] sm:$0xff]  ;;  %v9280_v26 = vcombine.high %v953_v13, %v957_v14  ;;  %v9279_v31 = vcombine.low %v953_v13, %v957_v14 }
 0x22c   :  { %6757 = vmatpush2.bf16.msra.mxu0 %v9079_v25  ;;  %v821_v25 = vld [vmem:[#allocation7 + $0x1060] sm:$0xff] }
 0x22d   :  { %6758 = vmatprep.subr.bf16.mxu0 %v9072_v28  ;;  %v945_v28 = vld [vmem:[#allocation7 + $0x1440] sm:$0xff]  ;;  %v9144_v30 = vcombine.high %v817_v23, %v821_v25  ;;  %v9143_v16 = vcombine.low %v817_v23, %v821_v25 }
 0x22e   :  { %6718 = vmatpush2.bf16.msra.mxu1 %v8943_v29  ;;  %v949_v29 = vld [vmem:[#allocation7 + $0x1460] sm:$0xff] }
 0x22f   :  { %6769 = vmatprep.subr.bf16.mxu1 %v9192_v32  ;;  %v809_v32 = vld [vmem:[#allocation7 + $0x1000] sm:$0xff]  ;;  %v9272_v35 = vcombine.high %v945_v28, %v949_v29  ;;  %v9271_v36 = vcombine.low %v945_v28, %v949_v29 }
 0x230   :  { %6759 = vmatpush2.bf16.msra.mxu0 %v9071_v33  ;;  %v813_v33 = vld [vmem:[#allocation7 + $0x1020] sm:$0xff] }
 0x231   :  { %6720 = vmatmul.mubr.bf16.vlgmr.msra.gmra.mxu1 %v10128_v61  ;;  %6810 = vmatprep.subr.bf16.mxu0 %v9320_v34  ;;  %v937_v34 = vld [vmem:[#allocation7 + $0x1400] sm:$0xff]  ;;  %v9136_v22 = vcombine.high %v809_v32, %v813_v33  ;;  %v9135_v41 = vcombine.low %v809_v32, %v813_v33 }
 0x232   :  { %6770 = vmatpush1.bf16.msra.mxu1 %v9191_v19  ;;  %6801 = vmatprep.mubr.bf16.mxu1 %v10153_v21  ;;  %v941_v19 = vld [vmem:[#allocation7 + $0x1420] sm:$0xff] }
 0x233   :  { %6761 = vmatmul.mubr.bf16.vlgmr.msra.gmra.mxu0 %v10163_v42  ;;  %6771 = vmatprep.subr.bf16.mxu1 %v9184_v37  ;;  %v929_v37 = vld [vmem:[#allocation7 + $0x13c0] sm:$0xff]  ;;  %v9264_v40 = vcombine.high %v937_v34, %v941_v19  ;;  %v9263_v47 = vcombine.low %v937_v34, %v941_v19 }
 0x234   :  { %6811 = vmatpush1.bf16.msra.mxu0 %v9319_v39  ;;  %6842 = vmatprep.mubr.bf16.mxu0 %v10168_v44  ;;  %v933_v39 = vld [vmem:[#allocation7 + $0x13e0] sm:$0xff] }
 0x235   :  { %6812 = vmatprep.subr.bf16.mxu0 %v9312_v43  ;;  %v1057_v43 = vld [vmem:[#allocation7 + $0x17c0] sm:$0xff]  ;;  %v9256_v46 = vcombine.high %v929_v37, %v933_v39  ;;  %v9255_v51 = vcombine.low %v929_v37, %v933_v39 }
 0x236   :  { %6772 = vmatpush1.bf16.msra.mxu1 %v9183_v45  ;;  %v1061_v45 = vld [vmem:[#allocation7 + $0x17e0] sm:$0xff] }
 0x237   :  { %6773 = vmatprep.subr.bf16.mxu1 %v9176_v48  ;;  %v921_v48 = vld [vmem:[#allocation7 + $0x1380] sm:$0xff]  ;;  %v9384_v50 = vcombine.high %v1057_v43, %v1061_v45  ;;  %v9383_v55 = vcombine.low %v1057_v43, %v1061_v45 }
 0x238   :  { %6813 = vmatpush1.bf16.msra.mxu0 %v9311_v49  ;;  %v925_v49 = vld [vmem:[#allocation7 + $0x13a0] sm:$0xff] }
 0x239   :  { %6814 = vmatprep.subr.bf16.mxu0 %v9304_v52  ;;  %v1049_v52 = vld [vmem:[#allocation7 + $0x1780] sm:$0xff]  ;;  %v9248_v54 = vcombine.high %v921_v48, %v925_v49  ;;  %v9247_v60 = vcombine.low %v921_v48, %v925_v49 }
 0x23a   :  { %6774 = vmatpush1.bf16.msra.mxu1 %v9175_v53  ;;  %v1053_v53 = vld [vmem:[#allocation7 + $0x17a0] sm:$0xff] }
 0x23b   :  { %6775 = vmatprep.subr.bf16.mxu1 %v9168_v56  ;;  %v913_v56 = vld [vmem:[#allocation7 + $0x1340] sm:$0xff]  ;;  %v9376_v58 = vcombine.high %v1049_v52, %v1053_v53  ;;  %v9375_v2 = vcombine.low %v1049_v52, %v1053_v53 }
 0x23c   :  { %6815 = vmatpush1.bf16.msra.mxu0 %v9303_v57  ;;  %v917_v57 = vld [vmem:[#allocation7 + $0x1360] sm:$0xff] }
 0x23d   :  { %6816 = vmatprep.subr.bf16.mxu0 %v9296_v63  ;;  %v1041_v63 = vld [vmem:[#allocation7 + $0x1740] sm:$0xff]  ;;  %v9240_v1 = vcombine.high %v913_v56, %v917_v57  ;;  %v9239_v8 = vcombine.low %v913_v56, %v917_v57 }
 0x23e   :  { %6776 = vmatpush1.bf16.msra.mxu1 %v9167_v0  ;;  %v1045_v0 = vld [vmem:[#allocation7 + $0x1760] sm:$0xff] }
 0x23f   :  { %6777 = vmatprep.subr.bf16.mxu1 %v9160_v3  ;;  %v905_v3 = vld [vmem:[#allocation7 + $0x1300] sm:$0xff]  ;;  %v9368_v7 = vcombine.high %v1041_v63, %v1045_v0  ;;  %v9367_v14 = vcombine.low %v1041_v63, %v1045_v0 }
 0x240   :  { %6817 = vmatpush1.bf16.msra.mxu0 %v9295_v5  ;;  %v909_v5 = vld [vmem:[#allocation7 + $0x1320] sm:$0xff] }
 0x241   :  { %6818 = vmatprep.subr.bf16.mxu0 %v9288_v9  ;;  %v1033_v9 = vld [vmem:[#allocation7 + $0x1700] sm:$0xff]  ;;  %v9232_v13 = vcombine.high %v905_v3, %v909_v5  ;;  %v9231_v25 = vcombine.low %v905_v3, %v909_v5 }
 0x242   :  { %6778 = vmatpush1.bf16.msra.mxu1 %v9159_v10  ;;  %v1037_v10 = vld [vmem:[#allocation7 + $0x1720] sm:$0xff] }
 0x243   :  { %6779 = vmatprep.subr.bf16.mxu1 %v9152_v18  ;;  %v897_v18 = vld [vmem:[#allocation7 + $0x12c0] sm:$0xff]  ;;  %v9360_v23 = vcombine.high %v1033_v9, %v1037_v10  ;;  %v9359_v29 = vcombine.low %v1033_v9, %v1037_v10 }
 0x244   :  { %6819 = vmatpush1.bf16.msra.mxu0 %v9287_v20  ;;  %v901_v20 = vld [vmem:[#allocation7 + $0x12e0] sm:$0xff] }
 0x245   :  { %6820 = vmatprep.subr.bf16.mxu0 %v9280_v26  ;;  %v1025_v26 = vld [vmem:[#allocation7 + $0x16c0] sm:$0xff]  ;;  %v9224_v28 = vcombine.high %v897_v18, %v901_v20  ;;  %v9223_v33 = vcombine.low %v897_v18, %v901_v20  ;;  %v10175_v18 = vcombine.high %v10139_v11, %v10139_v11 }
 0x246   :  { %6780 = vmatpush1.bf16.msra.mxu1 %v9151_v27  ;;  %v1029_v27 = vld [vmem:[#allocation7 + $0x16e0] sm:$0xff] }
 0x247   :  { %6781 = vmatprep.subr.bf16.mxu1 %v9144_v30  ;;  %v889_v30 = vld [vmem:[#allocation7 + $0x1280] sm:$0xff]  ;;  %v9352_v32 = vcombine.high %v1025_v26, %v1029_v27  ;;  %v9351_v19 = vcombine.low %v1025_v26, %v1029_v27 }
 0x248   :  { %6821 = vmatpush1.bf16.msra.mxu0 %v9279_v31  ;;  %v893_v31 = vld [vmem:[#allocation7 + $0x12a0] sm:$0xff] }
 0x249   :  { %6822 = vmatprep.subr.bf16.mxu0 %v9272_v35  ;;  %v1017_v35 = vld [vmem:[#allocation7 + $0x1680] sm:$0xff]  ;;  %v9216_v34 = vcombine.high %v889_v30, %v893_v31  ;;  %v9215_v39 = vcombine.low %v889_v30, %v893_v31 }
 0x24a   :  { %6782 = vmatpush1.bf16.msra.mxu1 %v9143_v16  ;;  %v1021_v16 = vld [vmem:[#allocation7 + $0x16a0] sm:$0xff] }
 0x24b   :  { %6783 = vmatprep.subr.bf16.mxu1 %v9136_v22  ;;  %v881_v22 = vld [vmem:[#allocation7 + $0x1240] sm:$0xff]  ;;  %v9344_v37 = vcombine.high %v1017_v35, %v1021_v16  ;;  %v9343_v45 = vcombine.low %v1017_v35, %v1021_v16 }
 0x24c   :  { %6823 = vmatpush1.bf16.msra.mxu0 %v9271_v36  ;;  %v885_v36 = vld [vmem:[#allocation7 + $0x1260] sm:$0xff] }
 0x24d   :  { %6824 = vmatprep.subr.bf16.mxu0 %v9264_v40  ;;  %v1009_v40 = vld [vmem:[#allocation7 + $0x1640] sm:$0xff]  ;;  %v9208_v43 = vcombine.high %v881_v22, %v885_v36  ;;  %v9207_v49 = vcombine.low %v881_v22, %v885_v36 }
 0x24e   :  { %6784 = vmatpush1.bf16.msra.mxu1 %v9135_v41  ;;  %v1013_v41 = vld [vmem:[#allocation7 + $0x1660] sm:$0xff] }
 0x24f   :  { %6785 = vmatprep.subr.bf16.mxu1 %v9256_v46  ;;  %v873_v46 = vld [vmem:[#allocation7 + $0x1200] sm:$0xff]  ;;  %v9336_v48 = vcombine.high %v1009_v40, %v1013_v41  ;;  %v9335_v53 = vcombine.low %v1009_v40, %v1013_v41 }
 0x250   :  { %6825 = vmatpush1.bf16.msra.mxu0 %v9263_v47  ;;  %v877_v47 = vld [vmem:[#allocation7 + $0x1220] sm:$0xff] }
 0x251   :  { %6826 = vmatprep.subr.bf16.mxu0 %v9384_v50  ;;  %v1001_v50 = vld [vmem:[#allocation7 + $0x1600] sm:$0xff]  ;;  %v9200_v52 = vcombine.high %v873_v46, %v877_v47  ;;  %v9199_v57 = vcombine.low %v873_v46, %v877_v47 }
 0x252   :  { %6786 = vmatpush2.bf16.msra.mxu1 %v9255_v51  ;;  %v1005_v51 = vld [vmem:[#allocation7 + $0x1620] sm:$0xff] }
 0x253   :  { %6787 = vmatprep.subr.bf16.mxu1 %v9248_v54  ;;  %v1121_v54 = vld [vmem:[#allocation7 + $0x19c0] sm:$0xff]  ;;  %v9328_v56 = vcombine.high %v1001_v50, %v1005_v51  ;;  %v9327_v0 = vcombine.low %v1001_v50, %v1005_v51 }
 0x254   :  { %6827 = vmatpush2.bf16.msra.mxu0 %v9383_v55  ;;  %v1125_v55 = vld [vmem:[#allocation7 + $0x19e0] sm:$0xff] }
 0x255   :  { %6828 = vmatprep.subr.bf16.mxu0 %v9376_v58  ;;  %v1249_v58 = vld [vmem:[#allocation7 + $0x1dc0] sm:$0xff]  ;;  %v9448_v63 = vcombine.high %v1121_v54, %v1125_v55  ;;  %v9447_v5 = vcombine.low %v1121_v54, %v1125_v55 }
 0x256   :  { %6788 = vmatpush2.bf16.msra.mxu1 %v9247_v60  ;;  %v1253_v60 = vld [vmem:[#allocation7 + $0x1de0] sm:$0xff] }
 0x257   :  { %6789 = vmatprep.subr.bf16.mxu1 %v9240_v1  ;;  %v1113_v1 = vld [vmem:[#allocation7 + $0x1980] sm:$0xff]  ;;  %v9576_v3 = vcombine.high %v1249_v58, %v1253_v60  ;;  %v9575_v10 = vcombine.low %v1249_v58, %v1253_v60 }
 0x258   :  { %6829 = vmatpush2.bf16.msra.mxu0 %v9375_v2  ;;  %v1117_v2 = vld [vmem:[#allocation7 + $0x19a0] sm:$0xff] }
 0x259   :  { %6830 = vmatprep.subr.bf16.mxu0 %v9368_v7  ;;  %v1241_v7 = vld [vmem:[#allocation7 + $0x1d80] sm:$0xff]  ;;  %v9440_v9 = vcombine.high %v1113_v1, %v1117_v2 }
 0x25a   :  { %6790 = vmatpush2.bf16.msra.mxu1 %v9239_v8  ;;  %v1245_v8 = vld [vmem:[#allocation7 + $0x1da0] sm:$0xff] }
 0x25b   :  { %6791 = vmatprep.subr.bf16.mxu1 %v9232_v13  ;;  %v1105_v13 = vld [vmem:[#allocation7 + $0x1940] sm:$0xff]  ;;  %v9568_v20 = vcombine.high %v1241_v7, %v1245_v8 }
 0x25c   :  { %6831 = vmatpush2.bf16.msra.mxu0 %v9367_v14  ;;  %v1109_v14 = vld [vmem:[#allocation7 + $0x1960] sm:$0xff] }
 0x25d   :  { %6832 = vmatprep.subr.bf16.mxu0 %v9360_v23  ;;  %v10180_v23 = vcombine.high %v10157_v24, %v10157_v24  ;;  %v1233_v26 = vld [vmem:[#allocation7 + $0x1d40] sm:$0xff] }
 0x25e   :  { %6792 = vmatpush2.bf16.msra.mxu1 %v9231_v25  ;;  %v9439_v25 = vcombine.low %v1113_v1, %v1117_v2  ;;  %v1237_v27 = vld [vmem:[#allocation7 + $0x1d60] sm:$0xff] }
 0x25f   :  { %6793 = vmatprep.subr.bf16.mxu1 %v9224_v28  ;;  %v9432_v28 = vcombine.high %v1105_v13, %v1109_v14  ;;  %v1097_v30 = vld [vmem:[#allocation7 + $0x1900] sm:$0xff] }
 0x260   :  { %6833 = vmatpush2.bf16.msra.mxu0 %v9359_v29  ;;  %v9567_v29 = vcombine.low %v1241_v7, %v1245_v8  ;;  %v1101_v31 = vld [vmem:[#allocation7 + $0x1920] sm:$0xff] }
 0x261   :  { %6834 = vmatprep.subr.bf16.mxu0 %v9352_v32  ;;  %v9560_v32 = vcombine.high %v1233_v26, %v1237_v27  ;;  %v1225_v35 = vld [vmem:[#allocation7 + $0x1d00] sm:$0xff] }
 0x262   :  { %6794 = vmatpush2.bf16.msra.mxu1 %v9223_v33  ;;  %v9431_v33 = vcombine.low %v1105_v13, %v1109_v14  ;;  %v1229_v16 = vld [vmem:[#allocation7 + $0x1d20] sm:$0xff] }
 0x263   :  { %6795 = vmatprep.subr.bf16.mxu1 %v9216_v34  ;;  %v9424_v34 = vcombine.high %v1097_v30, %v1101_v31  ;;  %v1089_v22 = vld [vmem:[#allocation7 + $0x18c0] sm:$0xff] }
 0x264   :  { %6835 = vmatpush2.bf16.msra.mxu0 %v9351_v19  ;;  %v9559_v19 = vcombine.low %v1233_v26, %v1237_v27  ;;  %v1093_v36 = vld [vmem:[#allocation7 + $0x18e0] sm:$0xff] }
 0x265   :  { %6836 = vmatprep.subr.bf16.mxu0 %v9344_v37  ;;  %v9552_v37 = vcombine.high %v1225_v35, %v1229_v16  ;;  %v1217_v40 = vld [vmem:[#allocation7 + $0x1cc0] sm:$0xff] }
 0x266   :  { %6796 = vmatpush2.bf16.msra.mxu1 %v9215_v39  ;;  %v9423_v39 = vcombine.low %v1097_v30, %v1101_v31  ;;  %v1221_v41 = vld [vmem:[#allocation7 + $0x1ce0] sm:$0xff] }
 0x267   :  { %6797 = vmatprep.subr.bf16.mxu1 %v9208_v43  ;;  %v9416_v43 = vcombine.high %v1089_v22, %v1093_v36  ;;  %v1081_v46 = vld [vmem:[#allocation7 + $0x1880] sm:$0xff] }
 0x268   :  { %6837 = vmatpush2.bf16.msra.mxu0 %v9343_v45  ;;  %v9551_v45 = vcombine.low %v1225_v35, %v1229_v16  ;;  %v1085_v47 = vld [vmem:[#allocation7 + $0x18a0] sm:$0xff] }
 0x269   :  { %6838 = vmatprep.subr.bf16.mxu0 %v9336_v48  ;;  %v9544_v48 = vcombine.high %v1217_v40, %v1221_v41  ;;  %v1209_v50 = vld [vmem:[#allocation7 + $0x1c80] sm:$0xff] }
 0x26a   :  { %6798 = vmatpush2.bf16.msra.mxu1 %v9207_v49  ;;  %v9415_v49 = vcombine.low %v1089_v22, %v1093_v36  ;;  %v1213_v51 = vld [vmem:[#allocation7 + $0x1ca0] sm:$0xff] }
 0x26b   :  { %6799 = vmatprep.subr.bf16.mxu1 %v9200_v52  ;;  %v9408_v52 = vcombine.high %v1081_v46, %v1085_v47  ;;  %v1073_v54 = vld [vmem:[#allocation7 + $0x1840] sm:$0xff] }
 0x26c   :  { %6839 = vmatpush2.bf16.msra.mxu0 %v9335_v53  ;;  %v9543_v53 = vcombine.low %v1217_v40, %v1221_v41  ;;  %v1077_v55 = vld [vmem:[#allocation7 + $0x1860] sm:$0xff] }
 0x26d   :  { %6840 = vmatprep.subr.bf16.mxu0 %v9328_v56  ;;  %v9536_v56 = vcombine.high %v1209_v50, %v1213_v51  ;;  %v1201_v58 = vld [vmem:[#allocation7 + $0x1c40] sm:$0xff] }
 0x26e   :  { %6800 = vmatpush2.bf16.msra.mxu1 %v9199_v57  ;;  %v9407_v57 = vcombine.low %v1081_v46, %v1085_v47  ;;  %v1205_v60 = vld [vmem:[#allocation7 + $0x1c60] sm:$0xff] }
 0x26f   :  { %6851 = vmatprep.subr.bf16.mxu1 %v9448_v63  ;;  %v9400_v63 = vcombine.high %v1073_v54, %v1077_v55  ;;  %v1065_v1 = vld [vmem:[#allocation7 + $0x1800] sm:$0xff] }
 0x270   :  { %6841 = vmatpush2.bf16.msra.mxu0 %v9327_v0  ;;  %v9535_v0 = vcombine.low %v1209_v50, %v1213_v51  ;;  %v1069_v2 = vld [vmem:[#allocation7 + $0x1820] sm:$0xff] }
 0x271   :  { %6802 = vmatmul.mubr.bf16.vlgmr.msra.gmra.mxu1 %v10139_v11  ;;  %6892 = vmatprep.subr.bf16.mxu0 %v9576_v3  ;;  %v9528_v3 = vcombine.high %v1201_v58, %v1205_v60  ;;  %v1193_v7 = vld [vmem:[#allocation7 + $0x1c00] sm:$0xff] }
 0x272   :  { %6852 = vmatpush1.bf16.msra.mxu1 %v9447_v5  ;;  %6883 = vmatprep.mubr.bf16.mxu1 %v10157_v24  ;;  %v9399_v5 = vcombine.low %v1073_v54, %v1077_v55  ;;  %v1197_v8 = vld [vmem:[#allocation7 + $0x1c20] sm:$0xff] }
 0x273   :  { %6843 = vmatmul.mubr.bf16.vlgmr.msra.gmra.mxu0 %v10175_v18  ;;  %6853 = vmatprep.subr.bf16.mxu1 %v9440_v9  ;;  %v9392_v9 = vcombine.high %v1065_v1, %v1069_v2  ;;  %v1185_v13 = vld [vmem:[#allocation7 + $0x1bc0] sm:$0xff] }
 0x274   :  { %6893 = vmatpush1.bf16.msra.mxu0 %v9575_v10  ;;  %6924 = vmatprep.mubr.bf16.mxu0 %v10180_v23  ;;  %v9527_v10 = vcombine.low %v1201_v58, %v1205_v60  ;;  %v1189_v14 = vld [vmem:[#allocation7 + $0x1be0] sm:$0xff] }
 0x275   :  { %6894 = vmatprep.subr.bf16.mxu0 %v9568_v20  ;;  %v9520_v20 = vcombine.high %v1193_v7, %v1197_v8  ;;  %v1313_v26 = vld [vmem:[#allocation7 + $0x1fc0] sm:$0xff] }
 0x276   :  { %6854 = vmatpush1.bf16.msra.mxu1 %v9439_v25  ;;  %v9391_v25 = vcombine.low %v1065_v1, %v1069_v2  ;;  %v1317_v27 = vld [vmem:[#allocation7 + $0x1fe0] sm:$0xff] }
 0x277   :  { %6855 = vmatprep.subr.bf16.mxu1 %v9432_v28  ;;  %v9512_v28 = vcombine.high %v1185_v13, %v1189_v14  ;;  %v1177_v30 = vld [vmem:[#allocation7 + $0x1b80] sm:$0xff] }
 0x278   :  { %6895 = vmatpush1.bf16.msra.mxu0 %v9567_v29  ;;  %v9519_v29 = vcombine.low %v1193_v7, %v1197_v8  ;;  %v1181_v31 = vld [vmem:[#allocation7 + $0x1ba0] sm:$0xff] }
 0x279   :  { %6896 = vmatprep.subr.bf16.mxu0 %v9560_v32  ;;  %v9640_v32 = vcombine.high %v1313_v26, %v1317_v27  ;;  %v1305_v35 = vld [vmem:[#allocation7 + $0x1f80] sm:$0xff] }
 0x27a   :  { %6856 = vmatpush1.bf16.msra.mxu1 %v9431_v33  ;;  %v9511_v33 = vcombine.low %v1185_v13, %v1189_v14  ;;  %v1309_v16 = vld [vmem:[#allocation7 + $0x1fa0] sm:$0xff] }
 0x27b   :  { %6857 = vmatprep.subr.bf16.mxu1 %v9424_v34  ;;  %v9504_v34 = vcombine.high %v1177_v30, %v1181_v31  ;;  %v1169_v22 = vld [vmem:[#allocation7 + $0x1b40] sm:$0xff] }
 0x27c   :  { %6897 = vmatpush1.bf16.msra.mxu0 %v9559_v19  ;;  %v9639_v19 = vcombine.low %v1313_v26, %v1317_v27  ;;  %v1173_v36 = vld [vmem:[#allocation7 + $0x1b60] sm:$0xff] }
 0x27d   :  { %6898 = vmatprep.subr.bf16.mxu0 %v9552_v37  ;;  %v9632_v37 = vcombine.high %v1305_v35, %v1309_v16  ;;  %v1297_v40 = vld [vmem:[#allocation7 + $0x1f40] sm:$0xff] }
 0x27e   :  { %6858 = vmatpush1.bf16.msra.mxu1 %v9423_v39  ;;  %v9503_v39 = vcombine.low %v1177_v30, %v1181_v31  ;;  %v1301_v41 = vld [vmem:[#allocation7 + $0x1f60] sm:$0xff] }
 0x27f   :  { %6859 = vmatprep.subr.bf16.mxu1 %v9416_v43  ;;  %v9496_v43 = vcombine.high %v1169_v22, %v1173_v36  ;;  %v1161_v46 = vld [vmem:[#allocation7 + $0x1b00] sm:$0xff] }
 0x280   :  { %6899 = vmatpush1.bf16.msra.mxu0 %v9551_v45  ;;  %v9631_v45 = vcombine.low %v1305_v35, %v1309_v16  ;;  %v1165_v47 = vld [vmem:[#allocation7 + $0x1b20] sm:$0xff] }
 0x281   :  { %6900 = vmatprep.subr.bf16.mxu0 %v9544_v48  ;;  %v9624_v48 = vcombine.high %v1297_v40, %v1301_v41  ;;  %v1289_v50 = vld [vmem:[#allocation7 + $0x1f00] sm:$0xff] }
 0x282   :  { %6860 = vmatpush1.bf16.msra.mxu1 %v9415_v49  ;;  %v9495_v49 = vcombine.low %v1169_v22, %v1173_v36  ;;  %v1293_v51 = vld [vmem:[#allocation7 + $0x1f20] sm:$0xff]  ;;  %v354_v22 = vld [vmem:[#allocation7 + $0x1c8] sm:$0xff] }
 0x283   :  { %6861 = vmatprep.subr.bf16.mxu1 %v9408_v52  ;;  %v9488_v52 = vcombine.high %v1161_v46, %v1165_v47  ;;  %v1153_v54 = vld [vmem:[#allocation7 + $0x1ac0] sm:$0xff]  ;;  %v358_v36 = vld [vmem:[#allocation7 + $0x1e8] sm:$0xff] }
 0x284   :  { %6901 = vmatpush1.bf16.msra.mxu0 %v9543_v53  ;;  %v9623_v53 = vcombine.low %v1297_v40, %v1301_v41  ;;  %v1157_v55 = vld [vmem:[#allocation7 + $0x1ae0] sm:$0xff]  ;;  %v1325_v40 = vsub.s32 0, %v10123_v38  ;;  %v482_v41 = vld [vmem:[#allocation7 + $0x5c8] sm:$0xff] }
 0x285   :  { %6902 = vmatprep.subr.bf16.mxu0 %v9536_v56  ;;  %v9616_v56 = vcombine.high %v1289_v50, %v1293_v51  ;;  %v1281_v58 = vld [vmem:[#allocation7 + $0x1ec0] sm:$0xff] }
 0x286   :  { %6862 = vmatpush1.bf16.msra.mxu1 %v9407_v57  ;;  %v9487_v57 = vcombine.low %v1161_v46, %v1165_v47  ;;  %v1285_v60 = vld [vmem:[#allocation7 + $0x1ee0] sm:$0xff] }
 0x287   :  { %6863 = vmatprep.subr.bf16.mxu1 %v9400_v63  ;;  %v9480_v63 = vcombine.high %v1153_v54, %v1157_v55  ;;  %v1145_v1 = vld [vmem:[#allocation7 + $0x1a80] sm:$0xff] }
 0x288   :  { %6903 = vmatpush1.bf16.msra.mxu0 %v9535_v0  ;;  %v9615_v0 = vcombine.low %v1289_v50, %v1293_v51  ;;  %v1149_v2 = vld [vmem:[#allocation7 + $0x1aa0] sm:$0xff]  ;;  %v350_v50 = vld [vmem:[#allocation7 + $0x1a8] sm:$0xff] }
 0x289   :  { %6904 = vmatprep.subr.bf16.mxu0 %v9528_v3  ;;  %v9608_v3 = vcombine.high %v1281_v58, %v1285_v60  ;;  %v1273_v7 = vld [vmem:[#allocation7 + $0x1e80] sm:$0xff] }
 0x28a   :  { %6864 = vmatpush1.bf16.msra.mxu1 %v9399_v5  ;;  %v9479_v5 = vcombine.low %v1153_v54, %v1157_v55  ;;  %v1277_v8 = vld [vmem:[#allocation7 + $0x1ea0] sm:$0xff]  ;;  %v474_v54 = vld [vmem:[#allocation7 + $0x588] sm:$0xff] }
 0x28b   :  { %6865 = vmatprep.subr.bf16.mxu1 %v9392_v9  ;;  %v9472_v9 = vcombine.high %v1145_v1, %v1149_v2  ;;  %v1137_v13 = vld [vmem:[#allocation7 + $0x1a40] sm:$0xff]  ;;  %v478_v55 = vld [vmem:[#allocation7 + $0x5a8] sm:$0xff] }
 0x28c   :  { %6905 = vmatpush1.bf16.msra.mxu0 %v9527_v10  ;;  %v9607_v10 = vcombine.low %v1281_v58, %v1285_v60  ;;  %v1141_v14 = vld [vmem:[#allocation7 + $0x1a60] sm:$0xff]  ;;  %v338_v60 = vld [vmem:[#allocation7 + $0x148] sm:$0xff] }
 0x28d   :  { %6906 = vmatprep.subr.bf16.mxu0 %v9520_v20  ;;  %v9600_v20 = vcombine.high %v1273_v7, %v1277_v8  ;;  %v1265_v26 = vld [vmem:[#allocation7 + $0x1e40] sm:$0xff] }
 0x28e   :  { %6866 = vmatpush1.bf16.msra.mxu1 %v9391_v25  ;;  %v9471_v25 = vcombine.low %v1145_v1, %v1149_v2  ;;  %v1269_v27 = vld [vmem:[#allocation7 + $0x1e60] sm:$0xff]  ;;  %v10189_v1 = vcombine.high %v10146_v15, %v10146_v15  ;;  %v8802_v2 = vcombine.high %v474_v54, %v478_v55 }
 0x28f   :  { %6867 = vmatprep.subr.bf16.mxu1 %v9512_v28  ;;  %v9464_v28 = vcombine.high %v1137_v13, %v1141_v14  ;;  %v1129_v30 = vld [vmem:[#allocation7 + $0x1a00] sm:$0xff] }
 0x290   :  { %6907 = vmatpush1.bf16.msra.mxu0 %v9519_v29  ;;  %v9599_v29 = vcombine.low %v1273_v7, %v1277_v8  ;;  %v1133_v31 = vld [vmem:[#allocation7 + $0x1a20] sm:$0xff]  ;;  %v466_v7 = vld [vmem:[#allocation7 + $0x548] sm:$0xff] }
 0x291   :  { %6908 = vmatprep.subr.bf16.mxu0 %v9640_v32  ;;  %v9592_v32 = vcombine.high %v1265_v26, %v1269_v27  ;;  %v1257_v35 = vld [vmem:[#allocation7 + $0x1e00] sm:$0xff]  ;;  %v470_v8 = vld [vmem:[#allocation7 + $0x568] sm:$0xff] }
 0x292   :  { %6868 = vmatpush2.bf16.msra.mxu1 %v9511_v33  ;;  %v9463_v33 = vcombine.low %v1137_v13, %v1141_v14  ;;  %v1261_v16 = vld [vmem:[#allocation7 + $0x1e20] sm:$0xff] }
 0x293   :  { %6869 = vmatprep.subr.bf16.mxu1 %v9504_v34  ;;  %v9456_v34 = vcombine.high %v1129_v30, %v1133_v31  ;;  %v1321_v46 = vld [vmem:[#allocation9] sm:$0xff]  ;;  %v9583_v47 = vcombine.low %v1257_v35, %v1261_v16 }
 0x294   :  { %6909 = vmatpush2.bf16.msra.mxu0 %v9639_v19  ;;  %v9591_v19 = vcombine.low %v1265_v26, %v1269_v27  ;;  %v330_v26 = vld [vmem:[#allocation7 + $0x108] sm:$0xff] }
 0x295   :  { %6910 = vmatprep.subr.bf16.mxu0 %v9632_v37  ;;  %v9584_v37 = vcombine.high %v1257_v35, %v1261_v16  ;;  %v334_v27 = vld [vmem:[#allocation7 + $0x128] sm:$0xff] }
 0x296   :  { %6870 = vmatpush2.bf16.msra.mxu1 %v9503_v39  ;;  %v9455_v39 = vcombine.low %v1129_v30, %v1133_v31  ;;  %v8794_v30 = vcombine.high %v466_v7, %v470_v8  ;;  %v462_v35 = vld [vmem:[#allocation7 + $0x528] sm:$0xff] }
 0x297   :  { %6871 = vmatprep.subr.bf16.mxu1 %v9496_v43  ;;  %v486_v43 = vld [vmem:[#allocation7 + $0x5e8] sm:$0xff] }
 0x298   :  { %6911 = vmatpush2.bf16.msra.mxu0 %v9631_v45  ;;  %v8682_v45 = vcombine.high %v354_v22, %v358_v36  ;;  %v8810_v51 = vcombine.high %v482_v41, %v486_v43 }
 0x299   :  { %6912 = vmatprep.subr.bf16.mxu0 %v9624_v48  ;;  %v1329_v48 = vsub.s32 1, %v10123_v38 }
 0x29a   :  { %6872 = vmatpush2.bf16.msra.mxu1 %v9495_v49  ;;  %v346_v49 = vld [vmem:[#allocation7 + $0x188] sm:$0xff] }
 0x29b   :  { %6873 = vmatprep.subr.bf16.mxu1 %v9488_v52  ;;  %v8681_v52 = vcombine.low %v354_v22, %v358_v36  ;;  %v1330_v58 = vrot.slane %v1321_v46, %v1329_v48  ;;  %v8793_v22 = vcombine.low %v466_v7, %v470_v8  ;;  %v322_v36 = vld [vmem:[#allocation7 + $0xc8] sm:$0xff] }
 0x29c   :  { %6913 = vmatpush2.bf16.msra.mxu0 %v9623_v53  ;;  %v1326_v53 = vrot.slane %v1321_v46, %v1325_v40  ;;  %v314_v48 = vld [vmem:[#allocation7 + $0x88] sm:$0xff] }
 0x29d   :  { %6914 = vmatprep.subr.bf16.mxu0 %v9616_v56  ;;  %v8674_v56 = vcombine.high %v346_v49, %v350_v50  ;;  %v302_v7 = vld [vmem:[#allocation7 + $0x28] sm:$0xff] }
 0x29e   :  { %6874 = vmatpush2.bf16.msra.mxu1 %v9487_v57  ;;  %v8809_v57 = vcombine.low %v482_v41, %v486_v43  ;;  %v8657_v41 = vcombine.low %v330_v26, %v334_v27  ;;  %v450_v43 = vld [vmem:[#allocation7 + $0x4c8] sm:$0xff] }
 0x29f   :  { %6875 = vmatprep.subr.bf16.mxu1 %v9480_v63  ;;  %v342_v63 = vld [vmem:[#allocation7 + $0x168] sm:$0xff] }
 0x2a0   :  { %6915 = vmatpush2.bf16.msra.mxu0 %v9615_v0  ;;  %v8666_v13 = vcombine.high %v338_v60, %v342_v63 }
 0x2a1   :  { %6916 = vmatprep.subr.bf16.mxu0 %v9608_v3 }
 0x2a2   :  { %6876 = vmatpush2.bf16.msra.mxu1 %v9479_v5  ;;  %v8673_v5 = vcombine.low %v346_v49, %v350_v50  ;;  %v318_v49 = vld [vmem:[#allocation7 + $0xa8] sm:$0xff] }
 0x2a3   :  { %6877 = vmatprep.subr.bf16.mxu1 %v9472_v9 }
 0x2a4   :  { %6917 = vmatpush2.bf16.msra.mxu0 %v9607_v10 }
 0x2a5   :  { %6918 = vmatprep.subr.bf16.mxu0 %v9600_v20 }
 0x2a6   :  { %6878 = vmatpush2.bf16.msra.mxu1 %v9471_v25  ;;  %v8801_v25 = vcombine.low %v474_v54, %v478_v55  ;;  %v8642_v54 = vcombine.high %v314_v48, %v318_v49 }
 0x2a7   :  { %6879 = vmatprep.subr.bf16.mxu1 %v9464_v28 }
 0x2a8   :  { %6919 = vmatpush2.bf16.msra.mxu0 %v9599_v29 }
 0x2a9   :  { %6920 = vmatprep.subr.bf16.mxu0 %v9592_v32  ;;  %v8665_v32 = vcombine.low %v338_v60, %v342_v63  ;;  %v8641_v60 = vcombine.low %v314_v48, %v318_v49  ;;  %v434_v63 = vld [vmem:[#allocation7 + $0x448] sm:$0xff] }
 0x2aa   :  { %6880 = vmatpush2.bf16.msra.mxu1 %v9463_v33  ;;  %v458_v33 = vld [vmem:[#allocation7 + $0x508] sm:$0xff] }
 0x2ab   :  { %6881 = vmatprep.subr.bf16.mxu1 %v9456_v34  ;;  %v8786_v40 = vcombine.high %v458_v33, %v462_v35  ;;  %v534_v48 = vld [vmem:[#allocation7 + $0x768] sm:$0xff] }
 0x2ac   :  { %6921 = vmatpush2.bf16.msra.mxu0 %v9591_v19  ;;  %v8658_v19 = vcombine.high %v330_v26, %v334_v27  ;;  %v418_v26 = vld [vmem:[#allocation7 + $0x3c8] sm:$0xff] }
 0x2ad   :  { %6922 = vmatprep.subr.bf16.mxu0 %v9584_v37  ;;  %v326_v37 = vld [vmem:[#allocation7 + $0xe8] sm:$0xff] }
 0x2ae   :  { %6882 = vmatpush2.bf16.msra.mxu1 %v9455_v39  ;;  %v8650_v46 = vcombine.high %v322_v36, %v326_v37  ;;  %v422_v27 = vld [vmem:[#allocation7 + $0x3e8] sm:$0xff] }
 0x2af   :  { %6933 = vmatprep.subr.bf16.mxu1 %v8682_v45  ;;  %v454_v45 = vld [vmem:[#allocation7 + $0x4e8] sm:$0xff] }
 0x2b0   :  { %6923 = vmatpush2.bf16.msra.mxu0 %v9583_v47  ;;  %v8785_v47 = vcombine.low %v458_v33, %v462_v35  ;;  %v8778_v50 = vcombine.high %v450_v43, %v454_v45  ;;  %v8777_v55 = vcombine.low %v450_v43, %v454_v45  ;;  %v8746_v33 = vcombine.high %v418_v26, %v422_v27  ;;  %v406_v43 = vld [vmem:[#allocation7 + $0x368] sm:$0xff] }
 0x2b1   :  { %6884 = vmatmul.mubr.bf16.vlgmr.msra.gmra.mxu1 %v10146_v15  ;;  %v6639_v0 = vpop.f32.mrf.mxu1  ;;  %6974 = vmatprep.subr.bf16.mxu0 %v8810_v51  ;;  %v8649_v51 = vcombine.low %v322_v36, %v326_v37  ;;  %v538_v36 = vld [vmem:[#allocation7 + $0x788] sm:$0xff] }
 0x2b2   :  { %v6640_v3 = vadd.f32 %v6639_v0, %v1326_v53  ;;  %6934 = vmatpush1.bf16.msra.mxu1 %v8681_v52  ;;  %6965 = vmatprep.mubr.bf16.mxu1 %v10130_v62  ;;  %v442_v52 = vld [vmem:[#allocation7 + $0x488] sm:$0xff] }
 0x2b3   :  { %6925 = vmatmul.mubr.bf16.vlgmr.msra.gmra.mxu0 %v10189_v1  ;;  %v6641_v9 = vpop.f32.mrf.mxu1  ;;  %v6680_v10 = vpop.f32.mrf.mxu0  ;;  %6935 = vmatprep.subr.bf16.mxu1 %v8674_v56  ;;  %v446_v53 = vld [vmem:[#allocation7 + $0x4a8] sm:$0xff] }
 0x2b4   :  { %v6642_v14 = vadd.f32 %v6641_v9, %v1330_v58  ;;  %v10193_v20 = vadd.f32 %v6680_v10, %v6640_v3  ;;  %6975 = vmatpush1.bf16.msra.mxu0 %v8809_v57  ;;  %7006 = vmatprep.mubr.bf16.mxu0 %v10137_v6  ;;  %v306_v56 = vld [vmem:[#allocation7 + $0x48] sm:$0xff]  ;;  %v8770_v58 = vcombine.high %v442_v52, %v446_v53 }
 0x2b5   :  { %v6643_v28 = vpop.f32.mrf.mxu1  ;;  %v6682_v29 = vpop.f32.mrf.mxu0  ;;  %6976 = vmatprep.subr.bf16.mxu0 %v8802_v2  ;;  %v310_v57 = vld [vmem:[#allocation7 + $0x68] sm:$0xff]  ;;  %v8769_v3 = vcombine.low %v442_v52, %v446_v53 }
 0x2b6   :  { %v10196_v31 = vadd.f32 %v6682_v29, %v6642_v14  ;;  %6936 = vmatpush1.bf16.msra.mxu1 %v8673_v5  ;;  %v438_v0 = vld [vmem:[#allocation7 + $0x468] sm:$0xff]  ;;  %v8634_v2 = vcombine.high %v306_v56, %v310_v57  ;;  %v8633_v9 = vcombine.low %v306_v56, %v310_v57 }
 0x2b7   :  { %v6644_v16 = vpop.f32.mrf.mxu1  ;;  %v6684_v34 = vpop.f32.mrf.mxu0  ;;  %6937 = vmatprep.subr.bf16.mxu1 %v8666_v13  ;;  %v298_v5 = vld [vmem:[#allocation7 + $0x8] sm:$0xff]  ;;  %v8762_v8 = vcombine.high %v434_v63, %v438_v0 }
 0x2b8   :  { %6977 = vmatpush1.bf16.msra.mxu0 %v8801_v25  ;;  %v426_v10 = vld [vmem:[#allocation7 + $0x408] sm:$0xff]  ;;  %v8626_v14 = vcombine.high %v298_v5, %v302_v7  ;;  %v8761_v25 = vcombine.low %v434_v63, %v438_v0  ;;  %v8625_v29 = vcombine.low %v298_v5, %v302_v7 }
 0x2b9   :  { %v6685_v39 = vpop.f32.mrf.mxu0  ;;  %6978 = vmatprep.subr.bf16.mxu0 %v8794_v30  ;;  %v430_v13 = vld [vmem:[#allocation7 + $0x428] sm:$0xff] }
 0x2ba   :  { %6938 = vmatpush1.bf16.msra.mxu1 %v8665_v32  ;;  %v8754_v28 = vcombine.high %v426_v10, %v430_v13  ;;  %v546_v30 = vld [vmem:[#allocation7 + $0x7c8] sm:$0xff]  ;;  %v8753_v35 = vcombine.low %v426_v10, %v430_v13 }
 0x2bb   :  { %6939 = vmatprep.subr.bf16.mxu1 %v8658_v19  ;;  %v550_v32 = vld [vmem:[#allocation7 + $0x7e8] sm:$0xff] }
 0x2bc   :  { %6979 = vmatpush1.bf16.msra.mxu0 %v8793_v22  ;;  %v410_v16 = vld [vmem:[#allocation7 + $0x388] sm:$0xff]  ;;  %v8874_v19 = vcombine.high %v546_v30, %v550_v32  ;;  %v8745_v22 = vcombine.low %v418_v26, %v422_v27 }
 0x2bd   :  { %6980 = vmatprep.subr.bf16.mxu0 %v8786_v40  ;;  %v414_v34 = vld [vmem:[#allocation7 + $0x3a8] sm:$0xff]  ;;  %v8873_v40 = vcombine.low %v546_v30, %v550_v32 }
 0x2be   :  { %6940 = vmatpush1.bf16.msra.mxu1 %v8657_v41  ;;  %v542_v37 = vld [vmem:[#allocation7 + $0x7a8] sm:$0xff]  ;;  %v8738_v39 = vcombine.high %v410_v16, %v414_v34 }
 0x2bf   :  { %6941 = vmatprep.subr.bf16.mxu1 %v8650_v46  ;;  %v402_v41 = vld [vmem:[#allocation7 + $0x348] sm:$0xff]  ;;  %v8866_v45 = vcombine.high %v538_v36, %v542_v37  ;;  %v8737_v46 = vcombine.low %v410_v16, %v414_v34 }
 0x2c0   :  { %6981 = vmatpush1.bf16.msra.mxu0 %v8785_v47  ;;  %v530_v47 = vld [vmem:[#allocation7 + $0x748] sm:$0xff]  ;;  %v8730_v49 = vcombine.high %v402_v41, %v406_v43 }
 0x2c1   :  { %6982 = vmatprep.subr.bf16.mxu0 %v8778_v50  ;;  %v8865_v50 = vcombine.low %v538_v36, %v542_v37  ;;  %v398_v52 = vld [vmem:[#allocation7 + $0x328] sm:$0xff]  ;;  %v8858_v53 = vcombine.high %v530_v47, %v534_v48 }
 0x2c2   :  { %6942 = vmatpush1.bf16.msra.mxu1 %v8649_v51  ;;  %v394_v51 = vld [vmem:[#allocation7 + $0x308] sm:$0xff] }
 0x2c3   :  { %6943 = vmatprep.subr.bf16.mxu1 %v8642_v54  ;;  %v8729_v54 = vcombine.low %v402_v41, %v406_v43  ;;  %v526_v56 = vld [vmem:[#allocation7 + $0x728] sm:$0xff]  ;;  %v8722_v57 = vcombine.high %v394_v51, %v398_v52 }
 0x2c4   :  { %6983 = vmatpush1.bf16.msra.mxu0 %v8777_v55  ;;  %v522_v55 = vld [vmem:[#allocation7 + $0x708] sm:$0xff] }
 0x2c5   :  { %6984 = vmatprep.subr.bf16.mxu0 %v8770_v58  ;;  %v8857_v58 = vcombine.low %v530_v47, %v534_v48  ;;  %v390_v63 = vld [vmem:[#allocation7 + $0x2e8] sm:$0xff]  ;;  %v8850_v0 = vcombine.high %v522_v55, %v526_v56 }
 0x2c6   :  { %6944 = vmatpush1.bf16.msra.mxu1 %v8641_v60  ;;  %v386_v60 = vld [vmem:[#allocation7 + $0x2c8] sm:$0xff] }
 0x2c7   :  { %6945 = vmatprep.subr.bf16.mxu1 %v8634_v2  ;;  %v8721_v2 = vcombine.low %v394_v51, %v398_v52  ;;  %v518_v5 = vld [vmem:[#allocation7 + $0x6e8] sm:$0xff]  ;;  %v8714_v7 = vcombine.high %v386_v60, %v390_v63 }
 0x2c8   :  { %6985 = vmatpush1.bf16.msra.mxu0 %v8769_v3  ;;  %v514_v3 = vld [vmem:[#allocation7 + $0x6c8] sm:$0xff] }
 0x2c9   :  { %6986 = vmatprep.subr.bf16.mxu0 %v8762_v8  ;;  %v8849_v8 = vcombine.low %v522_v55, %v526_v56  ;;  %v382_v10 = vld [vmem:[#allocation7 + $0x2a8] sm:$0xff]  ;;  %v8842_v13 = vcombine.high %v514_v3, %v518_v5 }
 0x2ca   :  { %6946 = vmatpush1.bf16.msra.mxu1 %v8633_v9  ;;  %v378_v9 = vld [vmem:[#allocation7 + $0x288] sm:$0xff] }
 0x2cb   :  { %6947 = vmatprep.subr.bf16.mxu1 %v8626_v14  ;;  %v8713_v14 = vcombine.low %v386_v60, %v390_v63  ;;  %v510_v26 = vld [vmem:[#allocation7 + $0x6a8] sm:$0xff]  ;;  %v8706_v27 = vcombine.high %v378_v9, %v382_v10 }
 0x2cc   :  { %6987 = vmatpush1.bf16.msra.mxu0 %v8761_v25  ;;  %v506_v25 = vld [vmem:[#allocation7 + $0x688] sm:$0xff] }
 0x2cd   :  { %6988 = vmatprep.subr.bf16.mxu0 %v8754_v28  ;;  %v8841_v28 = vcombine.low %v514_v3, %v518_v5  ;;  %v374_v30 = vld [vmem:[#allocation7 + $0x268] sm:$0xff]  ;;  %v8834_v32 = vcombine.high %v506_v25, %v510_v26 }
 0x2ce   :  { %6948 = vmatpush1.bf16.msra.mxu1 %v8625_v29  ;;  %v370_v29 = vld [vmem:[#allocation7 + $0x248] sm:$0xff] }
 0x2cf   :  { %6949 = vmatprep.subr.bf16.mxu1 %v8746_v33  ;;  %v8705_v33 = vcombine.low %v378_v9, %v382_v10  ;;  %v502_v16 = vld [vmem:[#allocation7 + $0x668] sm:$0xff]  ;;  %v8698_v34 = vcombine.high %v370_v29, %v374_v30 }
 0x2d0   :  { %6989 = vmatpush1.bf16.msra.mxu0 %v8753_v35  ;;  %v498_v35 = vld [vmem:[#allocation7 + $0x648] sm:$0xff] }
 0x2d1   :  { %6990 = vmatprep.subr.bf16.mxu0 %v8874_v19  ;;  %v8833_v19 = vcombine.low %v506_v25, %v510_v26  ;;  %v366_v36 = vld [vmem:[#allocation7 + $0x228] sm:$0xff]  ;;  %v8826_v37 = vcombine.high %v498_v35, %v502_v16 }
 0x2d2   :  { %6950 = vmatpush2.bf16.msra.mxu1 %v8745_v22  ;;  %v362_v22 = vld [vmem:[#allocation7 + $0x208] sm:$0xff] }
 0x2d3   :  { %6951 = vmatprep.subr.bf16.mxu1 %v8738_v39  ;;  %v8697_v39 = vcombine.low %v370_v29, %v374_v30  ;;  %v494_v41 = vld [vmem:[#allocation7 + $0x628] sm:$0xff]  ;;  %v8690_v43 = vcombine.high %v362_v22, %v366_v36 }
 0x2d4   :  { %6991 = vmatpush2.bf16.msra.mxu0 %v8873_v40  ;;  %v490_v40 = vld [vmem:[#allocation7 + $0x608] sm:$0xff] }
 0x2d5   :  { %6992 = vmatprep.subr.bf16.mxu0 %v8866_v45  ;;  %v8825_v45 = vcombine.low %v498_v35, %v502_v16  ;;  %v614_v47 = vld [vmem:[#allocation7 + $0x9e8] sm:$0xff]  ;;  %v8818_v48 = vcombine.high %v490_v40, %v494_v41 }
 0x2d6   :  { %6952 = vmatpush2.bf16.msra.mxu1 %v8737_v46  ;;  %v610_v46 = vld [vmem:[#allocation7 + $0x9c8] sm:$0xff] }
 0x2d7   :  { %6953 = vmatprep.subr.bf16.mxu1 %v8730_v49  ;;  %v8689_v49 = vcombine.low %v362_v22, %v366_v36  ;;  %v742_v51 = vld [vmem:[#allocation7 + $0xde8] sm:$0xff]  ;;  %v8938_v52 = vcombine.high %v610_v46, %v614_v47 }
 0x2d8   :  { %6993 = vmatpush2.bf16.msra.mxu0 %v8865_v50  ;;  %v738_v50 = vld [vmem:[#allocation7 + $0xdc8] sm:$0xff] }
 0x2d9   :  { %6994 = vmatprep.subr.bf16.mxu0 %v8858_v53  ;;  %v8817_v53 = vcombine.low %v490_v40, %v494_v41  ;;  %v606_v55 = vld [vmem:[#allocation7 + $0x9a8] sm:$0xff]  ;;  %v9066_v56 = vcombine.high %v738_v50, %v742_v51 }
 0x2da   :  { %6954 = vmatpush2.bf16.msra.mxu1 %v8729_v54  ;;  %v602_v54 = vld [vmem:[#allocation7 + $0x988] sm:$0xff] }
 0x2db   :  { %6955 = vmatprep.subr.bf16.mxu1 %v8722_v57  ;;  %v8937_v57 = vcombine.low %v610_v46, %v614_v47  ;;  %v734_v60 = vld [vmem:[#allocation7 + $0xda8] sm:$0xff]  ;;  %v8930_v63 = vcombine.high %v602_v54, %v606_v55  ;;  %v8929_v9 = vcombine.low %v602_v54, %v606_v55 }
 0x2dc   :  { %6995 = vmatpush2.bf16.msra.mxu0 %v8857_v58  ;;  %v730_v58 = vld [vmem:[#allocation7 + $0xd88] sm:$0xff] }
 0x2dd   :  { %6996 = vmatprep.subr.bf16.mxu0 %v8850_v0  ;;  %v9065_v0 = vcombine.low %v738_v50, %v742_v51  ;;  %v598_v3 = vld [vmem:[#allocation7 + $0x968] sm:$0xff] }
 0x2de   :  { %6956 = vmatpush2.bf16.msra.mxu1 %v8721_v2  ;;  %v594_v2 = vld [vmem:[#allocation7 + $0x948] sm:$0xff] }
 0x2df   :  { %6957 = vmatprep.subr.bf16.mxu1 %v8714_v7  ;;  %v9058_v7 = vcombine.high %v730_v58, %v734_v60  ;;  %v722_v10 = vld [vmem:[#allocation7 + $0xd48] sm:$0xff]  ;;  %v8922_v26 = vcombine.high %v594_v2, %v598_v3 }
 0x2e0   :  { %6997 = vmatpush2.bf16.msra.mxu0 %v8849_v8  ;;  %v586_v29 = vld [vmem:[#allocation7 + $0x908] sm:$0xff] }
 0x2e1   :  { %6998 = vmatprep.subr.bf16.mxu0 %v8842_v13  ;;  %v726_v13 = vld [vmem:[#allocation7 + $0xd68] sm:$0xff] }
 0x2e2   :  { %6958 = vmatpush2.bf16.msra.mxu1 %v8713_v14  ;;  %v590_v30 = vld [vmem:[#allocation7 + $0x928] sm:$0xff]  ;;  %v9050_v35 = vcombine.high %v722_v10, %v726_v13 }
 0x2e3   :  { %6959 = vmatprep.subr.bf16.mxu1 %v8706_v27  ;;  %v718_v22 = vld [vmem:[#allocation7 + $0xd28] sm:$0xff]  ;;  %v8913_v46 = vcombine.low %v586_v29, %v590_v30 }
 0x2e4   :  { %6999 = vmatpush2.bf16.msra.mxu0 %v8841_v28  ;;  %v578_v40 = vld [vmem:[#allocation7 + $0x8c8] sm:$0xff] }
 0x2e5   :  { %7000 = vmatprep.subr.bf16.mxu0 %v8834_v32  ;;  %v582_v41 = vld [vmem:[#allocation7 + $0x8e8] sm:$0xff] }
 0x2e6   :  { %6960 = vmatpush2.bf16.msra.mxu1 %v8705_v33  ;;  %v706_v47 = vld [vmem:[#allocation7 + $0xcc8] sm:$0xff]  ;;  %v8905_v54 = vcombine.low %v578_v40, %v582_v41 }
 0x2e7   :  { %6961 = vmatprep.subr.bf16.mxu1 %v8698_v34  ;;  %v8921_v34 = vcombine.low %v594_v2, %v598_v3  ;;  %v570_v51 = vld [vmem:[#allocation7 + $0x888] sm:$0xff] }
 0x2e8   :  { %7001 = vmatpush2.bf16.msra.mxu0 %v8833_v19  ;;  %v714_v19 = vld [vmem:[#allocation7 + $0xd08] sm:$0xff] }
 0x2e9   :  { %7002 = vmatprep.subr.bf16.mxu0 %v8826_v37  ;;  %v8914_v37 = vcombine.high %v586_v29, %v590_v30  ;;  %v9041_v50 = vcombine.low %v714_v19, %v718_v22  ;;  %v698_v55 = vld [vmem:[#allocation7 + $0xc88] sm:$0xff] }
 0x2ea   :  { %6962 = vmatpush2.bf16.msra.mxu1 %v8697_v39  ;;  %v9049_v39 = vcombine.low %v722_v10, %v726_v13  ;;  %v690_v3 = vld [vmem:[#allocation7 + $0xc48] sm:$0xff] }
 0x2eb   :  { %6963 = vmatprep.subr.bf16.mxu1 %v8690_v43  ;;  %v558_v10 = vld [vmem:[#allocation7 + $0x828] sm:$0xff] }
 0x2ec   :  { %7003 = vmatpush2.bf16.msra.mxu0 %v8825_v45  ;;  %v9042_v45 = vcombine.high %v714_v19, %v718_v22  ;;  %v674_v29 = vld [vmem:[#allocation7 + $0xbc8] sm:$0xff] }
 0x2ed   :  { %7004 = vmatprep.subr.bf16.mxu0 %v8818_v48  ;;  %v710_v48 = vld [vmem:[#allocation7 + $0xce8] sm:$0xff] }
 0x2ee   :  { %6964 = vmatpush2.bf16.msra.mxu1 %v8689_v49  ;;  %v8906_v49 = vcombine.high %v578_v40, %v582_v41  ;;  %v678_v30 = vld [vmem:[#allocation7 + $0xbe8] sm:$0xff] }
 0x2ef   :  { %7015 = vmatprep.subr.bf16.mxu1 %v8938_v52  ;;  %v574_v52 = vld [vmem:[#allocation7 + $0x8a8] sm:$0xff]  ;;  %v9002_v19 = vcombine.high %v674_v29, %v678_v30 }
 0x2f0   :  { %7005 = vmatpush2.bf16.msra.mxu0 %v8817_v53  ;;  %v9034_v53 = vcombine.high %v706_v47, %v710_v48  ;;  %v8897_v2 = vcombine.low %v570_v51, %v574_v52  ;;  %v794_v40 = vld [vmem:[#allocation7 + $0xf88] sm:$0xff] }
 0x2f1   :  { %v6721_v5 = vpop.f32.mrf.mxu1  ;;  %6966 = vmatmul.mubr.bf16.vlgmr.msra.gmra.mxu1 %v10126_v59  ;;  %7056 = vmatprep.subr.bf16.mxu0 %v9066_v56  ;;  %v702_v56 = vld [vmem:[#allocation7 + $0xca8] sm:$0xff] }
 0x2f2   :  { %v6722_v8 = vadd.f32 %v6721_v5, %v10193_v20  ;;  %7016 = vmatpush1.bf16.msra.mxu1 %v8937_v57  ;;  %7047 = vmatprep.mubr.bf16.mxu1 %v10132_v4  ;;  %v9057_v20 = vcombine.low %v730_v58, %v734_v60  ;;  %v8898_v57 = vcombine.high %v570_v51, %v574_v52  ;;  %v562_v60 = vld [vmem:[#allocation7 + $0x848] sm:$0xff] }
 0x2f3   :  { %v6723_v14 = vpop.f32.mrf.mxu1  ;;  %v6762_v25 = vpop.f32.mrf.mxu0  ;;  %7007 = vmatmul.mubr.bf16.vlgmr.msra.gmra.mxu0 %v10144_v12  ;;  %7017 = vmatprep.subr.bf16.mxu1 %v8930_v63  ;;  %v9033_v58 = vcombine.low %v706_v47, %v710_v48  ;;  %v566_v63 = vld [vmem:[#allocation7 + $0x868] sm:$0xff] }
 0x2f4   :  { %v6724_v27 = vadd.f32 %v6723_v14, %v10196_v31  ;;  %v10203_v28 = vadd.f32 %v6762_v25, %v6722_v8  ;;  %7057 = vmatpush1.bf16.msra.mxu0 %v9065_v0  ;;  %7088 = vmatprep.mubr.bf16.mxu0 %v10151_v17  ;;  %v9026_v0 = vcombine.high %v698_v55, %v702_v56  ;;  %v694_v5 = vld [vmem:[#allocation7 + $0xc68] sm:$0xff] }
 0x2f5   :  { %v6725_v32 = vpop.f32.mrf.mxu1  ;;  %v6764_v33 = vpop.f32.mrf.mxu0  ;;  %7058 = vmatprep.subr.bf16.mxu0 %v9058_v7  ;;  %v8890_v7 = vcombine.high %v562_v60, %v566_v63  ;;  %v9025_v8 = vcombine.low %v698_v55, %v702_v56  ;;  %v9018_v13 = vcombine.high %v690_v3, %v694_v5  ;;  %v8889_v14 = vcombine.low %v562_v60, %v566_v63  ;;  %v682_v25 = vld [vmem:[#allocation7 + $0xc08] sm:$0xff] }
 0x2f6   :  { %v10206_v16 = vadd.f32 %v6764_v33, %v6724_v27  ;;  %7018 = vmatpush1.bf16.msra.mxu1 %v8929_v9  ;;  %v554_v9 = vld [vmem:[#allocation7 + $0x808] sm:$0xff] }
 0x2f7   :  { %v6726_v36 = vpop.f32.mrf.mxu1  ;;  %v6766_v31 = vpop.f32.mrf.mxu0  ;;  %7019 = vmatprep.subr.bf16.mxu1 %v8922_v26  ;;  %v686_v26 = vld [vmem:[#allocation7 + $0xc28] sm:$0xff]  ;;  %v8882_v27 = vcombine.high %v554_v9, %v558_v10  ;;  %v8881_v33 = vcombine.low %v554_v9, %v558_v10 }
 0x2f8   :  { %7059 = vmatpush1.bf16.msra.mxu0 %v9057_v20  ;;  %v9017_v20 = vcombine.low %v690_v3, %v694_v5  ;;  %v9010_v32 = vcombine.high %v682_v25, %v686_v26  ;;  %v9009_v22 = vcombine.low %v682_v25, %v686_v26  ;;  %v666_v36 = vld [vmem:[#allocation7 + $0xb88] sm:$0xff] }
 0x2f9   :  { %v6767_v43 = vpop.f32.mrf.mxu0  ;;  %7060 = vmatprep.subr.bf16.mxu0 %v9050_v35  ;;  %v802_v35 = vld [vmem:[#allocation7 + $0xfc8] sm:$0xff] }
 0x2fa   :  { %7020 = vmatpush1.bf16.msra.mxu1 %v8921_v34  ;;  %v806_v34 = vld [vmem:[#allocation7 + $0xfe8] sm:$0xff] }
 0x2fb   :  { %7021 = vmatprep.subr.bf16.mxu1 %v8914_v37  ;;  %v670_v31 = vld [vmem:[#allocation7 + $0xba8] sm:$0xff]  ;;  %v9130_v37 = vcombine.high %v802_v35, %v806_v34 }
 0x2fc   :  { %7061 = vmatpush1.bf16.msra.mxu0 %v9049_v39  ;;  %v9001_v39 = vcombine.low %v674_v29, %v678_v30  ;;  %v798_v41 = vld [vmem:[#allocation7 + $0xfa8] sm:$0xff]  ;;  %v8994_v43 = vcombine.high %v666_v36, %v670_v31 }
 0x2fd   :  { %7062 = vmatprep.subr.bf16.mxu0 %v9042_v45  ;;  %v9129_v45 = vcombine.low %v802_v35, %v806_v34  ;;  %v662_v47 = vld [vmem:[#allocation7 + $0xb68] sm:$0xff]  ;;  %v9122_v48 = vcombine.high %v794_v40, %v798_v41 }
 0x2fe   :  { %7022 = vmatpush1.bf16.msra.mxu1 %v8913_v46  ;;  %v658_v46 = vld [vmem:[#allocation7 + $0xb48] sm:$0xff] }
 0x2ff   :  { %7023 = vmatprep.subr.bf16.mxu1 %v8906_v49  ;;  %v8993_v49 = vcombine.low %v666_v36, %v670_v31  ;;  %v790_v51 = vld [vmem:[#allocation7 + $0xf68] sm:$0xff]  ;;  %v8986_v52 = vcombine.high %v658_v46, %v662_v47 }
 0x300   :  { %7063 = vmatpush1.bf16.msra.mxu0 %v9041_v50  ;;  %v786_v50 = vld [vmem:[#allocation7 + $0xf48] sm:$0xff] }
 0x301   :  { %7064 = vmatprep.subr.bf16.mxu0 %v9034_v53  ;;  %v9121_v53 = vcombine.low %v794_v40, %v798_v41  ;;  %v654_v55 = vld [vmem:[#allocation7 + $0xb28] sm:$0xff]  ;;  %v9114_v56 = vcombine.high %v786_v50, %v790_v51 }
 0x302   :  { %7024 = vmatpush1.bf16.msra.mxu1 %v8905_v54  ;;  %v650_v54 = vld [vmem:[#allocation7 + $0xb08] sm:$0xff] }
 0x303   :  { %7025 = vmatprep.subr.bf16.mxu1 %v8898_v57  ;;  %v8985_v57 = vcombine.low %v658_v46, %v662_v47  ;;  %v782_v60 = vld [vmem:[#allocation7 + $0xf28] sm:$0xff]  ;;  %v8978_v63 = vcombine.high %v650_v54, %v654_v55 }
 0x304   :  { %7065 = vmatpush1.bf16.msra.mxu0 %v9033_v58  ;;  %v778_v58 = vld [vmem:[#allocation7 + $0xf08] sm:$0xff] }
 0x305   :  { %7066 = vmatprep.subr.bf16.mxu0 %v9026_v0  ;;  %v9113_v0 = vcombine.low %v786_v50, %v790_v51  ;;  %v646_v3 = vld [vmem:[#allocation7 + $0xae8] sm:$0xff]  ;;  %v9106_v5 = vcombine.high %v778_v58, %v782_v60 }
 0x306   :  { %7026 = vmatpush1.bf16.msra.mxu1 %v8897_v2  ;;  %v642_v2 = vld [vmem:[#allocation7 + $0xac8] sm:$0xff] }
 0x307   :  { %7027 = vmatprep.subr.bf16.mxu1 %v8890_v7  ;;  %v8977_v7 = vcombine.low %v650_v54, %v654_v55  ;;  %v774_v9 = vld [vmem:[#allocation7 + $0xee8] sm:$0xff]  ;;  %v8970_v10 = vcombine.high %v642_v2, %v646_v3 }
 0x308   :  { %7067 = vmatpush1.bf16.msra.mxu0 %v9025_v8  ;;  %v770_v8 = vld [vmem:[#allocation7 + $0xec8] sm:$0xff] }
 0x309   :  { %7068 = vmatprep.subr.bf16.mxu0 %v9018_v13  ;;  %v9105_v13 = vcombine.low %v778_v58, %v782_v60  ;;  %v638_v25 = vld [vmem:[#allocation7 + $0xaa8] sm:$0xff]  ;;  %v9098_v26 = vcombine.high %v770_v8, %v774_v9 }
 0x30a   :  { %7028 = vmatpush1.bf16.msra.mxu1 %v8889_v14  ;;  %v634_v14 = vld [vmem:[#allocation7 + $0xa88] sm:$0xff] }
 0x30b   :  { %7029 = vmatprep.subr.bf16.mxu1 %v8882_v27  ;;  %v8969_v27 = vcombine.low %v642_v2, %v646_v3  ;;  %v766_v29 = vld [vmem:[#allocation7 + $0xea8] sm:$0xff]  ;;  %v8962_v30 = vcombine.high %v634_v14, %v638_v25 }
 0x30c   :  { %7069 = vmatpush1.bf16.msra.mxu0 %v9017_v20  ;;  %v762_v20 = vld [vmem:[#allocation7 + $0xe88] sm:$0xff] }
 0x30d   :  { %7070 = vmatprep.subr.bf16.mxu0 %v9010_v32  ;;  %v9097_v32 = vcombine.low %v770_v8, %v774_v9  ;;  %v630_v35 = vld [vmem:[#allocation7 + $0xa68] sm:$0xff]  ;;  %v9090_v34 = vcombine.high %v762_v20, %v766_v29 }
 0x30e   :  { %7030 = vmatpush1.bf16.msra.mxu1 %v8881_v33  ;;  %v626_v33 = vld [vmem:[#allocation7 + $0xa48] sm:$0xff] }
 0x30f   :  { %7031 = vmatprep.subr.bf16.mxu1 %v9002_v19  ;;  %v8961_v19 = vcombine.low %v634_v14, %v638_v25  ;;  %v758_v36 = vld [vmem:[#allocation7 + $0xe68] sm:$0xff]  ;;  %v8954_v31 = vcombine.high %v626_v33, %v630_v35 }
 0x310   :  { %7071 = vmatpush1.bf16.msra.mxu0 %v9009_v22  ;;  %v754_v22 = vld [vmem:[#allocation7 + $0xe48] sm:$0xff] }
 0x311   :  { %7072 = vmatprep.subr.bf16.mxu0 %v9130_v37  ;;  %v9089_v37 = vcombine.low %v762_v20, %v766_v29  ;;  %v622_v40 = vld [vmem:[#allocation7 + $0xa28] sm:$0xff]  ;;  %v9082_v41 = vcombine.high %v754_v22, %v758_v36 }
 0x312   :  { %7032 = vmatpush2.bf16.msra.mxu1 %v9001_v39  ;;  %v618_v39 = vld [vmem:[#allocation7 + $0xa08] sm:$0xff] }
 0x313   :  { %7033 = vmatprep.subr.bf16.mxu1 %v8994_v43  ;;  %v8953_v43 = vcombine.low %v626_v33, %v630_v35  ;;  %v750_v46 = vld [vmem:[#allocation7 + $0xe28] sm:$0xff]  ;;  %v8946_v47 = vcombine.high %v618_v39, %v622_v40 }
 0x314   :  { %7073 = vmatpush2.bf16.msra.mxu0 %v9129_v45  ;;  %v746_v45 = vld [vmem:[#allocation7 + $0xe08] sm:$0xff] }
 0x315   :  { %7074 = vmatprep.subr.bf16.mxu0 %v9122_v48  ;;  %v9081_v48 = vcombine.low %v754_v22, %v758_v36  ;;  %v870_v50 = vld [vmem:[#allocation7 + $0x11e8] sm:$0xff]  ;;  %v9074_v51 = vcombine.high %v746_v45, %v750_v46 }
 0x316   :  { %7034 = vmatpush2.bf16.msra.mxu1 %v8993_v49  ;;  %v866_v49 = vld [vmem:[#allocation7 + $0x11c8] sm:$0xff] }
 0x317   :  { %7035 = vmatprep.subr.bf16.mxu1 %v8986_v52  ;;  %v8945_v52 = vcombine.low %v618_v39, %v622_v40  ;;  %v998_v54 = vld [vmem:[#allocation7 + $0x15e8] sm:$0xff]  ;;  %v9194_v55 = vcombine.high %v866_v49, %v870_v50 }
 0x318   :  { %7075 = vmatpush2.bf16.msra.mxu0 %v9121_v53  ;;  %v994_v53 = vld [vmem:[#allocation7 + $0x15c8] sm:$0xff] }
 0x319   :  { %7076 = vmatprep.subr.bf16.mxu0 %v9114_v56  ;;  %v9073_v56 = vcombine.low %v746_v45, %v750_v46  ;;  %v862_v58 = vld [vmem:[#allocation7 + $0x11a8] sm:$0xff]  ;;  %v9322_v60 = vcombine.high %v994_v53, %v998_v54 }
 0x31a   :  { %7036 = vmatpush2.bf16.msra.mxu1 %v8985_v57  ;;  %v858_v57 = vld [vmem:[#allocation7 + $0x1188] sm:$0xff] }
 0x31b   :  { %7037 = vmatprep.subr.bf16.mxu1 %v8978_v63  ;;  %v9193_v63 = vcombine.low %v866_v49, %v870_v50  ;;  %v990_v2 = vld [vmem:[#allocation7 + $0x15a8] sm:$0xff]  ;;  %v9186_v3 = vcombine.high %v858_v57, %v862_v58  ;;  %v9185_v14 = vcombine.low %v858_v57, %v862_v58 }
 0x31c   :  { %7077 = vmatpush2.bf16.msra.mxu0 %v9113_v0  ;;  %v986_v0 = vld [vmem:[#allocation7 + $0x1588] sm:$0xff] }
 0x31d   :  { %7078 = vmatprep.subr.bf16.mxu0 %v9106_v5  ;;  %v9321_v5 = vcombine.low %v994_v53, %v998_v54  ;;  %v854_v8 = vld [vmem:[#allocation7 + $0x1168] sm:$0xff] }
 0x31e   :  { %7038 = vmatpush2.bf16.msra.mxu1 %v8977_v7  ;;  %v850_v7 = vld [vmem:[#allocation7 + $0x1148] sm:$0xff] }
 0x31f   :  { %7039 = vmatprep.subr.bf16.mxu1 %v8970_v10  ;;  %v9314_v10 = vcombine.high %v986_v0, %v990_v2  ;;  %v978_v25 = vld [vmem:[#allocation7 + $0x1548] sm:$0xff]  ;;  %v9178_v29 = vcombine.high %v850_v7, %v854_v8 }
 0x320   :  { %7079 = vmatpush2.bf16.msra.mxu0 %v9105_v13  ;;  %v842_v33 = vld [vmem:[#allocation7 + $0x1108] sm:$0xff] }
 0x321   :  { %7080 = vmatprep.subr.bf16.mxu0 %v9098_v26  ;;  %v982_v26 = vld [vmem:[#allocation7 + $0x1568] sm:$0xff] }
 0x322   :  { %7040 = vmatpush2.bf16.msra.mxu1 %v8969_v27  ;;  %v846_v35 = vld [vmem:[#allocation7 + $0x1128] sm:$0xff]  ;;  %v9306_v22 = vcombine.high %v978_v25, %v982_v26 }
 0x323   :  { %7041 = vmatprep.subr.bf16.mxu1 %v8962_v30  ;;  %v974_v39 = vld [vmem:[#allocation7 + $0x1528] sm:$0xff]  ;;  %v9169_v49 = vcombine.low %v842_v33, %v846_v35 }
 0x324   :  { %7081 = vmatpush2.bf16.msra.mxu0 %v9097_v32  ;;  %v834_v45 = vld [vmem:[#allocation7 + $0x10c8] sm:$0xff] }
 0x325   :  { %7082 = vmatprep.subr.bf16.mxu0 %v9090_v34  ;;  %v838_v46 = vld [vmem:[#allocation7 + $0x10e8] sm:$0xff] }
 0x326   :  { %7042 = vmatpush2.bf16.msra.mxu1 %v8961_v19  ;;  %v962_v50 = vld [vmem:[#allocation7 + $0x14c8] sm:$0xff]  ;;  %v9161_v57 = vcombine.low %v834_v45, %v838_v46 }
 0x327   :  { %7043 = vmatprep.subr.bf16.mxu1 %v8954_v31  ;;  %v9177_v31 = vcombine.low %v850_v7, %v854_v8  ;;  %v826_v54 = vld [vmem:[#allocation7 + $0x1088] sm:$0xff] }
 0x328   :  { %7083 = vmatpush2.bf16.msra.mxu0 %v9089_v37  ;;  %v970_v37 = vld [vmem:[#allocation7 + $0x1508] sm:$0xff] }
 0x329   :  { %7084 = vmatprep.subr.bf16.mxu0 %v9082_v41  ;;  %v9170_v41 = vcombine.high %v842_v33, %v846_v35  ;;  %v9297_v53 = vcombine.low %v970_v37, %v974_v39  ;;  %v954_v58 = vld [vmem:[#allocation7 + $0x1488] sm:$0xff] }
 0x32a   :  { %7044 = vmatpush2.bf16.msra.mxu1 %v8953_v43  ;;  %v9305_v43 = vcombine.low %v978_v25, %v982_v26  ;;  %v946_v8 = vld [vmem:[#allocation7 + $0x1448] sm:$0xff] }
 0x32b   :  { %7045 = vmatprep.subr.bf16.mxu1 %v8946_v47  ;;  %v814_v25 = vld [vmem:[#allocation7 + $0x1028] sm:$0xff] }
 0x32c   :  { %7085 = vmatpush2.bf16.msra.mxu0 %v9081_v48  ;;  %v9298_v48 = vcombine.high %v970_v37, %v974_v39  ;;  %v930_v33 = vld [vmem:[#allocation7 + $0x13c8] sm:$0xff] }
 0x32d   :  { %7086 = vmatprep.subr.bf16.mxu0 %v9074_v51  ;;  %v966_v51 = vld [vmem:[#allocation7 + $0x14e8] sm:$0xff] }
 0x32e   :  { %7046 = vmatpush2.bf16.msra.mxu1 %v8945_v52  ;;  %v9162_v52 = vcombine.high %v834_v45, %v838_v46  ;;  %v934_v35 = vld [vmem:[#allocation7 + $0x13e8] sm:$0xff] }
 0x32f   :  { %7097 = vmatprep.subr.bf16.mxu1 %v9194_v55  ;;  %v830_v55 = vld [vmem:[#allocation7 + $0x10a8] sm:$0xff]  ;;  %v9258_v37 = vcombine.high %v930_v33, %v934_v35 }
 0x330   :  { %7087 = vmatpush2.bf16.msra.mxu0 %v9073_v56  ;;  %v9290_v56 = vcombine.high %v962_v50, %v966_v51  ;;  %v9153_v7 = vcombine.low %v826_v54, %v830_v55  ;;  %v1050_v45 = vld [vmem:[#allocation7 + $0x1788] sm:$0xff] }
 0x331   :  { %v6803_v9 = vpop.f32.mrf.mxu1  ;;  %7048 = vmatmul.mubr.bf16.vlgmr.msra.gmra.mxu1 %v10128_v61  ;;  %7138 = vmatprep.subr.bf16.mxu0 %v9322_v60  ;;  %v958_v60 = vld [vmem:[#allocation7 + $0x14a8] sm:$0xff] }
 0x332   :  { %v6804_v13 = vadd.f32 %v6803_v9, %v10203_v28  ;;  %7098 = vmatpush1.bf16.msra.mxu1 %v9193_v63  ;;  %7129 = vmatprep.mubr.bf16.mxu1 %v10153_v21  ;;  %v9313_v28 = vcombine.low %v986_v0, %v990_v2  ;;  %v9154_v63 = vcombine.high %v826_v54, %v830_v55  ;;  %v818_v2 = vld [vmem:[#allocation7 + $0x1048] sm:$0xff] }
 0x333   :  { %v6805_v27 = vpop.f32.mrf.mxu1  ;;  %v6844_v20 = vpop.f32.mrf.mxu0  ;;  %7089 = vmatmul.mubr.bf16.vlgmr.msra.gmra.mxu0 %v10163_v42  ;;  %7099 = vmatprep.subr.bf16.mxu1 %v9186_v3  ;;  %v9289_v0 = vcombine.low %v962_v50, %v966_v51  ;;  %v822_v3 = vld [vmem:[#allocation7 + $0x1068] sm:$0xff] }
 0x334   :  { %v6806_v30 = vadd.f32 %v6805_v27, %v10206_v16  ;;  %v10213_v32 = vadd.f32 %v6844_v20, %v6804_v13  ;;  %7139 = vmatpush1.bf16.msra.mxu0 %v9321_v5  ;;  %7170 = vmatprep.mubr.bf16.mxu0 %v10168_v44  ;;  %v9282_v5 = vcombine.high %v954_v58, %v958_v60  ;;  %v950_v9 = vld [vmem:[#allocation7 + $0x1468] sm:$0xff] }
 0x335   :  { %v6807_v34 = vpop.f32.mrf.mxu1  ;;  %v6846_v19 = vpop.f32.mrf.mxu0  ;;  %7140 = vmatprep.subr.bf16.mxu0 %v9314_v10  ;;  %v9146_v10 = vcombine.high %v818_v2, %v822_v3  ;;  %v9281_v13 = vcombine.low %v954_v58, %v958_v60  ;;  %v9274_v26 = vcombine.high %v946_v8, %v950_v9  ;;  %v9145_v27 = vcombine.low %v818_v2, %v822_v3  ;;  %v938_v20 = vld [vmem:[#allocation7 + $0x1408] sm:$0xff] }
 0x336   :  { %v10216_v36 = vadd.f32 %v6846_v19, %v6806_v30  ;;  %7100 = vmatpush1.bf16.msra.mxu1 %v9185_v14  ;;  %v810_v14 = vld [vmem:[#allocation7 + $0x1008] sm:$0xff] }
 0x337   :  { %v6808_v40 = vpop.f32.mrf.mxu1  ;;  %v6848_v16 = vpop.f32.mrf.mxu0  ;;  %7101 = vmatprep.subr.bf16.mxu1 %v9178_v29  ;;  %v942_v29 = vld [vmem:[#allocation7 + $0x1428] sm:$0xff]  ;;  %v9138_v30 = vcombine.high %v810_v14, %v814_v25  ;;  %v9137_v19 = vcombine.low %v810_v14, %v814_v25 }
 0x338   :  { %7141 = vmatpush1.bf16.msra.mxu0 %v9313_v28  ;;  %v9273_v28 = vcombine.low %v946_v8, %v950_v9  ;;  %v9266_v34 = vcombine.high %v938_v20, %v942_v29  ;;  %v9265_v39 = vcombine.low %v938_v20, %v942_v29  ;;  %v922_v40 = vld [vmem:[#allocation7 + $0x1388] sm:$0xff] }
 0x339   :  { %v6849_v47 = vpop.f32.mrf.mxu0  ;;  %7142 = vmatprep.subr.bf16.mxu0 %v9306_v22  ;;  %v1058_v22 = vld [vmem:[#allocation7 + $0x17c8] sm:$0xff] }
 0x33a   :  { %7102 = vmatpush1.bf16.msra.mxu1 %v9177_v31  ;;  %v1062_v31 = vld [vmem:[#allocation7 + $0x17e8] sm:$0xff] }
 0x33b   :  { %7103 = vmatprep.subr.bf16.mxu1 %v9170_v41  ;;  %v926_v16 = vld [vmem:[#allocation7 + $0x13a8] sm:$0xff]  ;;  %v9386_v41 = vcombine.high %v1058_v22, %v1062_v31 }
 0x33c   :  { %7143 = vmatpush1.bf16.msra.mxu0 %v9305_v43  ;;  %v9257_v43 = vcombine.low %v930_v33, %v934_v35  ;;  %v1054_v46 = vld [vmem:[#allocation7 + $0x17a8] sm:$0xff]  ;;  %v9250_v47 = vcombine.high %v922_v40, %v926_v16 }
 0x33d   :  { %7144 = vmatprep.subr.bf16.mxu0 %v9298_v48  ;;  %v9385_v48 = vcombine.low %v1058_v22, %v1062_v31  ;;  %v918_v50 = vld [vmem:[#allocation7 + $0x1368] sm:$0xff]  ;;  %v9378_v51 = vcombine.high %v1050_v45, %v1054_v46 }
 0x33e   :  { %7104 = vmatpush1.bf16.msra.mxu1 %v9169_v49  ;;  %v914_v49 = vld [vmem:[#allocation7 + $0x1348] sm:$0xff] }
 0x33f   :  { %7105 = vmatprep.subr.bf16.mxu1 %v9162_v52  ;;  %v9249_v52 = vcombine.low %v922_v40, %v926_v16  ;;  %v1046_v54 = vld [vmem:[#allocation7 + $0x1768] sm:$0xff]  ;;  %v9242_v55 = vcombine.high %v914_v49, %v918_v50 }
 0x340   :  { %7145 = vmatpush1.bf16.msra.mxu0 %v9297_v53  ;;  %v1042_v53 = vld [vmem:[#allocation7 + $0x1748] sm:$0xff] }
 0x341   :  { %7146 = vmatprep.subr.bf16.mxu0 %v9290_v56  ;;  %v9377_v56 = vcombine.low %v1050_v45, %v1054_v46  ;;  %v910_v58 = vld [vmem:[#allocation7 + $0x1328] sm:$0xff]  ;;  %v9370_v60 = vcombine.high %v1042_v53, %v1046_v54 }
 0x342   :  { %7106 = vmatpush1.bf16.msra.mxu1 %v9161_v57  ;;  %v906_v57 = vld [vmem:[#allocation7 + $0x1308] sm:$0xff] }
 0x343   :  { %7107 = vmatprep.subr.bf16.mxu1 %v9154_v63  ;;  %v9241_v63 = vcombine.low %v914_v49, %v918_v50  ;;  %v1038_v2 = vld [vmem:[#allocation7 + $0x1728] sm:$0xff]  ;;  %v9234_v3 = vcombine.high %v906_v57, %v910_v58 }
 0x344   :  { %7147 = vmatpush1.bf16.msra.mxu0 %v9289_v0  ;;  %v1034_v0 = vld [vmem:[#allocation7 + $0x1708] sm:$0xff] }
 0x345   :  { %7148 = vmatprep.subr.bf16.mxu0 %v9282_v5  ;;  %v9369_v5 = vcombine.low %v1042_v53, %v1046_v54  ;;  %v902_v8 = vld [vmem:[#allocation7 + $0x12e8] sm:$0xff]  ;;  %v9362_v9 = vcombine.high %v1034_v0, %v1038_v2 }
 0x346   :  { %7108 = vmatpush1.bf16.msra.mxu1 %v9153_v7  ;;  %v898_v7 = vld [vmem:[#allocation7 + $0x12c8] sm:$0xff] }
 0x347   :  { %7109 = vmatprep.subr.bf16.mxu1 %v9146_v10  ;;  %v9233_v10 = vcombine.low %v906_v57, %v910_v58  ;;  %v1030_v14 = vld [vmem:[#allocation7 + $0x16e8] sm:$0xff]  ;;  %v9226_v25 = vcombine.high %v898_v7, %v902_v8 }
 0x348   :  { %7149 = vmatpush1.bf16.msra.mxu0 %v9281_v13  ;;  %v1026_v13 = vld [vmem:[#allocation7 + $0x16c8] sm:$0xff] }
 0x349   :  { %7150 = vmatprep.subr.bf16.mxu0 %v9274_v26  ;;  %v9361_v26 = vcombine.low %v1034_v0, %v1038_v2  ;;  %v894_v20 = vld [vmem:[#allocation7 + $0x12a8] sm:$0xff]  ;;  %v9354_v29 = vcombine.high %v1026_v13, %v1030_v14 }
 0x34a   :  { %7110 = vmatpush1.bf16.msra.mxu1 %v9145_v27  ;;  %v890_v27 = vld [vmem:[#allocation7 + $0x1288] sm:$0xff] }
 0x34b   :  { %7111 = vmatprep.subr.bf16.mxu1 %v9138_v30  ;;  %v9225_v30 = vcombine.low %v898_v7, %v902_v8  ;;  %v1022_v33 = vld [vmem:[#allocation7 + $0x16a8] sm:$0xff]  ;;  %v9218_v35 = vcombine.high %v890_v27, %v894_v20 }
 0x34c   :  { %7151 = vmatpush1.bf16.msra.mxu0 %v9273_v28  ;;  %v1018_v28 = vld [vmem:[#allocation7 + $0x1688] sm:$0xff] }
 0x34d   :  { %7152 = vmatprep.subr.bf16.mxu0 %v9266_v34  ;;  %v9353_v34 = vcombine.low %v1026_v13, %v1030_v14  ;;  %v886_v22 = vld [vmem:[#allocation7 + $0x1268] sm:$0xff]  ;;  %v9346_v31 = vcombine.high %v1018_v28, %v1022_v33 }
 0x34e   :  { %7112 = vmatpush1.bf16.msra.mxu1 %v9137_v19  ;;  %v882_v19 = vld [vmem:[#allocation7 + $0x1248] sm:$0xff] }
 0x34f   :  { %7113 = vmatprep.subr.bf16.mxu1 %v9258_v37  ;;  %v9217_v37 = vcombine.low %v890_v27, %v894_v20  ;;  %v1014_v40 = vld [vmem:[#allocation7 + $0x1668] sm:$0xff]  ;;  %v9210_v16 = vcombine.high %v882_v19, %v886_v22 }
 0x350   :  { %7153 = vmatpush1.bf16.msra.mxu0 %v9265_v39  ;;  %v1010_v39 = vld [vmem:[#allocation7 + $0x1648] sm:$0xff] }
 0x351   :  { %7154 = vmatprep.subr.bf16.mxu0 %v9386_v41  ;;  %v9345_v41 = vcombine.low %v1018_v28, %v1022_v33  ;;  %v878_v45 = vld [vmem:[#allocation7 + $0x1228] sm:$0xff]  ;;  %v9338_v46 = vcombine.high %v1010_v39, %v1014_v40 }
 0x352   :  { %7114 = vmatpush2.bf16.msra.mxu1 %v9257_v43  ;;  %v874_v43 = vld [vmem:[#allocation7 + $0x1208] sm:$0xff] }
 0x353   :  { %7115 = vmatprep.subr.bf16.mxu1 %v9250_v47  ;;  %v9209_v47 = vcombine.low %v882_v19, %v886_v22  ;;  %v1006_v49 = vld [vmem:[#allocation7 + $0x1628] sm:$0xff]  ;;  %v9202_v50 = vcombine.high %v874_v43, %v878_v45 }
 0x354   :  { %7155 = vmatpush2.bf16.msra.mxu0 %v9385_v48  ;;  %v1002_v48 = vld [vmem:[#allocation7 + $0x1608] sm:$0xff] }
 0x355   :  { %7156 = vmatprep.subr.bf16.mxu0 %v9378_v51  ;;  %v9337_v51 = vcombine.low %v1010_v39, %v1014_v40  ;;  %v1126_v53 = vld [vmem:[#allocation7 + $0x19e8] sm:$0xff]  ;;  %v9330_v54 = vcombine.high %v1002_v48, %v1006_v49 }
 0x356   :  { %7116 = vmatpush2.bf16.msra.mxu1 %v9249_v52  ;;  %v1122_v52 = vld [vmem:[#allocation7 + $0x19c8] sm:$0xff] }
 0x357   :  { %7117 = vmatprep.subr.bf16.mxu1 %v9242_v55  ;;  %v9201_v55 = vcombine.low %v874_v43, %v878_v45  ;;  %v1254_v57 = vld [vmem:[#allocation7 + $0x1de8] sm:$0xff]  ;;  %v9450_v58 = vcombine.high %v1122_v52, %v1126_v53 }
 0x358   :  { %7157 = vmatpush2.bf16.msra.mxu0 %v9377_v56  ;;  %v1250_v56 = vld [vmem:[#allocation7 + $0x1dc8] sm:$0xff] }
 0x359   :  { %7158 = vmatprep.subr.bf16.mxu0 %v9370_v60  ;;  %v9329_v60 = vcombine.low %v1002_v48, %v1006_v49  ;;  %v1118_v0 = vld [vmem:[#allocation7 + $0x19a8] sm:$0xff]  ;;  %v9578_v2 = vcombine.high %v1250_v56, %v1254_v57 }
 0x35a   :  { %7118 = vmatpush2.bf16.msra.mxu1 %v9241_v63  ;;  %v1114_v63 = vld [vmem:[#allocation7 + $0x1988] sm:$0xff] }
 0x35b   :  { %7119 = vmatprep.subr.bf16.mxu1 %v9234_v3  ;;  %v9449_v3 = vcombine.low %v1122_v52, %v1126_v53  ;;  %v1246_v7 = vld [vmem:[#allocation7 + $0x1da8] sm:$0xff]  ;;  %v9442_v8 = vcombine.high %v1114_v63, %v1118_v0  ;;  %v9441_v27 = vcombine.low %v1114_v63, %v1118_v0 }
 0x35c   :  { %7159 = vmatpush2.bf16.msra.mxu0 %v9369_v5  ;;  %v1242_v5 = vld [vmem:[#allocation7 + $0x1d88] sm:$0xff] }
 0x35d   :  { %7160 = vmatprep.subr.bf16.mxu0 %v9362_v9  ;;  %v9577_v9 = vcombine.low %v1250_v56, %v1254_v57  ;;  %v1110_v13 = vld [vmem:[#allocation7 + $0x1968] sm:$0xff] }
 0x35e   :  { %7120 = vmatpush2.bf16.msra.mxu1 %v9233_v10  ;;  %v1106_v10 = vld [vmem:[#allocation7 + $0x1948] sm:$0xff] }
 0x35f   :  { %7121 = vmatprep.subr.bf16.mxu1 %v9226_v25  ;;  %v9570_v25 = vcombine.high %v1242_v5, %v1246_v7  ;;  %v1234_v20 = vld [vmem:[#allocation7 + $0x1d48] sm:$0xff]  ;;  %v9434_v33 = vcombine.high %v1106_v10, %v1110_v13 }
 0x360   :  { %7161 = vmatpush2.bf16.msra.mxu0 %v9361_v26  ;;  %v1098_v19 = vld [vmem:[#allocation7 + $0x1908] sm:$0xff] }
 0x361   :  { %7162 = vmatprep.subr.bf16.mxu0 %v9354_v29  ;;  %v1238_v29 = vld [vmem:[#allocation7 + $0x1d68] sm:$0xff] }
 0x362   :  { %7122 = vmatpush2.bf16.msra.mxu1 %v9225_v30  ;;  %v1102_v22 = vld [vmem:[#allocation7 + $0x1928] sm:$0xff]  ;;  %v9562_v39 = vcombine.high %v1234_v20, %v1238_v29 }
 0x363   :  { %7123 = vmatprep.subr.bf16.mxu1 %v9218_v35  ;;  %v1230_v43 = vld [vmem:[#allocation7 + $0x1d28] sm:$0xff]  ;;  %v9425_v52 = vcombine.low %v1098_v19, %v1102_v22 }
 0x364   :  { %7163 = vmatpush2.bf16.msra.mxu0 %v9353_v34  ;;  %v1090_v48 = vld [vmem:[#allocation7 + $0x18c8] sm:$0xff] }
 0x365   :  { %7164 = vmatprep.subr.bf16.mxu0 %v9346_v31  ;;  %v1094_v49 = vld [vmem:[#allocation7 + $0x18e8] sm:$0xff] }
 0x366   :  { %7124 = vmatpush2.bf16.msra.mxu1 %v9217_v37  ;;  %v1218_v53 = vld [vmem:[#allocation7 + $0x1cc8] sm:$0xff]  ;;  %v9417_v63 = vcombine.low %v1090_v48, %v1094_v49 }
 0x367   :  { %7125 = vmatprep.subr.bf16.mxu1 %v9210_v16  ;;  %v9433_v16 = vcombine.low %v1106_v10, %v1110_v13  ;;  %v1082_v57 = vld [vmem:[#allocation7 + $0x1888] sm:$0xff] }
 0x368   :  { %7165 = vmatpush2.bf16.msra.mxu0 %v9345_v41  ;;  %v1226_v41 = vld [vmem:[#allocation7 + $0x1d08] sm:$0xff] }
 0x369   :  { %7166 = vmatprep.subr.bf16.mxu0 %v9338_v46  ;;  %v9426_v46 = vcombine.high %v1098_v19, %v1102_v22  ;;  %v9553_v56 = vcombine.low %v1226_v41, %v1230_v43  ;;  %v1210_v0 = vld [vmem:[#allocation7 + $0x1c88] sm:$0xff] }
 0x36a   :  { %7126 = vmatpush2.bf16.msra.mxu1 %v9209_v47  ;;  %v9561_v47 = vcombine.low %v1234_v20, %v1238_v29  ;;  %v1202_v13 = vld [vmem:[#allocation7 + $0x1c48] sm:$0xff] }
 0x36b   :  { %7127 = vmatprep.subr.bf16.mxu1 %v9202_v50  ;;  %v1070_v20 = vld [vmem:[#allocation7 + $0x1828] sm:$0xff] }
 0x36c   :  { %7167 = vmatpush2.bf16.msra.mxu0 %v9337_v51  ;;  %v9554_v51 = vcombine.high %v1226_v41, %v1230_v43  ;;  %v1186_v19 = vld [vmem:[#allocation7 + $0x1bc8] sm:$0xff] }
 0x36d   :  { %7168 = vmatprep.subr.bf16.mxu0 %v9330_v54  ;;  %v1222_v54 = vld [vmem:[#allocation7 + $0x1ce8] sm:$0xff] }
 0x36e   :  { %7128 = vmatpush2.bf16.msra.mxu1 %v9201_v55  ;;  %v9418_v55 = vcombine.high %v1090_v48, %v1094_v49  ;;  %v1190_v22 = vld [vmem:[#allocation7 + $0x1be8] sm:$0xff] }
 0x36f   :  { %7179 = vmatprep.subr.bf16.mxu1 %v9450_v58  ;;  %v1086_v58 = vld [vmem:[#allocation7 + $0x18a8] sm:$0xff]  ;;  %v9514_v41 = vcombine.high %v1186_v19, %v1190_v22 }
 0x370   :  { %7169 = vmatpush2.bf16.msra.mxu0 %v9329_v60  ;;  %v9546_v60 = vcombine.high %v1218_v53, %v1222_v54  ;;  %v9409_v10 = vcombine.low %v1082_v57, %v1086_v58  ;;  %v1306_v48 = vld [vmem:[#allocation7 + $0x1f88] sm:$0xff] }
 0x371   :  { %v6885_v14 = vpop.f32.mrf.mxu1  ;;  %7130 = vmatmul.mubr.bf16.vlgmr.msra.gmra.mxu1 %v10139_v11  ;;  %7220 = vmatprep.subr.bf16.mxu0 %v9578_v2  ;;  %v1214_v2 = vld [vmem:[#allocation7 + $0x1ca8] sm:$0xff] }
 0x372   :  { %v6886_v26 = vadd.f32 %v6885_v14, %v10213_v32  ;;  %7180 = vmatpush1.bf16.msra.mxu1 %v9449_v3  ;;  %7211 = vmatprep.mubr.bf16.mxu1 %v10157_v24  ;;  %v9569_v32 = vcombine.low %v1242_v5, %v1246_v7  ;;  %v9410_v3 = vcombine.high %v1082_v57, %v1086_v58  ;;  %v1074_v7 = vld [vmem:[#allocation7 + $0x1848] sm:$0xff] }
 0x373   :  { %v6887_v30 = vpop.f32.mrf.mxu1  ;;  %v6926_v28 = vpop.f32.mrf.mxu0  ;;  %7171 = vmatmul.mubr.bf16.vlgmr.msra.gmra.mxu0 %v10175_v18  ;;  %7181 = vmatprep.subr.bf16.mxu1 %v9442_v8  ;;  %v9545_v5 = vcombine.low %v1218_v53, %v1222_v54  ;;  %v1078_v8 = vld [vmem:[#allocation7 + $0x1868] sm:$0xff] }
 0x374   :  { %v6888_v35 = vadd.f32 %v6887_v30, %v10216_v36  ;;  %v10223_v34 = vadd.f32 %v6926_v28, %v6886_v26  ;;  %7221 = vmatpush1.bf16.msra.mxu0 %v9577_v9  ;;  %7252 = vmatprep.mubr.bf16.mxu0 %v10180_v23  ;;  %v9538_v9 = vcombine.high %v1210_v0, %v1214_v2  ;;  %v1206_v14 = vld [vmem:[#allocation7 + $0x1c68] sm:$0xff] }
 0x375   :  { %v6889_v31 = vpop.f32.mrf.mxu1  ;;  %v6928_v37 = vpop.f32.mrf.mxu0  ;;  %7222 = vmatprep.subr.bf16.mxu0 %v9570_v25  ;;  %v9402_v25 = vcombine.high %v1074_v7, %v1078_v8  ;;  %v9537_v26 = vcombine.low %v1210_v0, %v1214_v2  ;;  %v9530_v29 = vcombine.high %v1202_v13, %v1206_v14  ;;  %v9401_v30 = vcombine.low %v1074_v7, %v1078_v8  ;;  %v1194_v28 = vld [vmem:[#allocation7 + $0x1c08] sm:$0xff] }
 0x376   :  { %v10226_v40 = vadd.f32 %v6928_v37, %v6888_v35  ;;  %7182 = vmatpush1.bf16.msra.mxu1 %v9441_v27  ;;  %v1066_v27 = vld [vmem:[#allocation7 + $0x1808] sm:$0xff] }
 0x377   :  { %v6890_v45 = vpop.f32.mrf.mxu1  ;;  %v6930_v36 = vpop.f32.mrf.mxu0  ;;  %7183 = vmatprep.subr.bf16.mxu1 %v9434_v33  ;;  %v1198_v33 = vld [vmem:[#allocation7 + $0x1c28] sm:$0xff]  ;;  %v9394_v35 = vcombine.high %v1066_v27, %v1070_v20  ;;  %v9393_v37 = vcombine.low %v1066_v27, %v1070_v20 }
 0x378   :  { %7223 = vmatpush1.bf16.msra.mxu0 %v9569_v32  ;;  %v9529_v32 = vcombine.low %v1202_v13, %v1206_v14  ;;  %v9522_v31 = vcombine.high %v1194_v28, %v1198_v33  ;;  %v9521_v43 = vcombine.low %v1194_v28, %v1198_v33  ;;  %v1178_v45 = vld [vmem:[#allocation7 + $0x1b88] sm:$0xff] }
 0x379   :  { %v6931_v50 = vpop.f32.mrf.mxu0  ;;  %7224 = vmatprep.subr.bf16.mxu0 %v9562_v39  ;;  %v1314_v39 = vld [vmem:[#allocation7 + $0x1fc8] sm:$0xff] }
 0x37a   :  { %7184 = vmatpush1.bf16.msra.mxu1 %v9433_v16  ;;  %v1318_v16 = vld [vmem:[#allocation7 + $0x1fe8] sm:$0xff] }
 0x37b   :  { %7185 = vmatprep.subr.bf16.mxu1 %v9426_v46  ;;  %v1182_v36 = vld [vmem:[#allocation7 + $0x1ba8] sm:$0xff]  ;;  %v9642_v46 = vcombine.high %v1314_v39, %v1318_v16 }
 0x37c   :  { %7225 = vmatpush1.bf16.msra.mxu0 %v9561_v47  ;;  %v9513_v47 = vcombine.low %v1186_v19, %v1190_v22  ;;  %v1310_v49 = vld [vmem:[#allocation7 + $0x1fa8] sm:$0xff]  ;;  %v9506_v50 = vcombine.high %v1178_v45, %v1182_v36 }
 0x37d   :  { %7226 = vmatprep.subr.bf16.mxu0 %v9554_v51  ;;  %v9641_v51 = vcombine.low %v1314_v39, %v1318_v16  ;;  %v1174_v53 = vld [vmem:[#allocation7 + $0x1b68] sm:$0xff]  ;;  %v9634_v54 = vcombine.high %v1306_v48, %v1310_v49 }
 0x37e   :  { %7186 = vmatpush1.bf16.msra.mxu1 %v9425_v52  ;;  %v1170_v52 = vld [vmem:[#allocation7 + $0x1b48] sm:$0xff] }
 0x37f   :  { %7187 = vmatprep.subr.bf16.mxu1 %v9418_v55  ;;  %v9505_v55 = vcombine.low %v1178_v45, %v1182_v36  ;;  %v1302_v57 = vld [vmem:[#allocation7 + $0x1f68] sm:$0xff]  ;;  %v9498_v58 = vcombine.high %v1170_v52, %v1174_v53 }
 0x380   :  { %7227 = vmatpush1.bf16.msra.mxu0 %v9553_v56  ;;  %v1298_v56 = vld [vmem:[#allocation7 + $0x1f48] sm:$0xff] }
 0x381   :  { %7228 = vmatprep.subr.bf16.mxu0 %v9546_v60  ;;  %v9633_v60 = vcombine.low %v1306_v48, %v1310_v49  ;;  %v1166_v0 = vld [vmem:[#allocation7 + $0x1b28] sm:$0xff]  ;;  %v9626_v2 = vcombine.high %v1298_v56, %v1302_v57 }
 0x382   :  { %7188 = vmatpush1.bf16.msra.mxu1 %v9417_v63  ;;  %v1162_v63 = vld [vmem:[#allocation7 + $0x1b08] sm:$0xff] }
 0x383   :  { %7189 = vmatprep.subr.bf16.mxu1 %v9410_v3  ;;  %v9497_v3 = vcombine.low %v1170_v52, %v1174_v53  ;;  %v1294_v7 = vld [vmem:[#allocation7 + $0x1f28] sm:$0xff]  ;;  %v9490_v8 = vcombine.high %v1162_v63, %v1166_v0 }
 0x384   :  { %7229 = vmatpush1.bf16.msra.mxu0 %v9545_v5  ;;  %v1290_v5 = vld [vmem:[#allocation7 + $0x1f08] sm:$0xff] }
 0x385   :  { %7230 = vmatprep.subr.bf16.mxu0 %v9538_v9  ;;  %v9625_v9 = vcombine.low %v1298_v56, %v1302_v57  ;;  %v1158_v13 = vld [vmem:[#allocation7 + $0x1ae8] sm:$0xff]  ;;  %v9618_v14 = vcombine.high %v1290_v5, %v1294_v7  ;;  %v359_v56 = vld [vmem:[#allocation7 + $0x1f0] sm:$0xff] }
 0x386   :  { %7190 = vmatpush1.bf16.msra.mxu1 %v9409_v10  ;;  %v1154_v10 = vld [vmem:[#allocation7 + $0x1ac8] sm:$0xff] }
 0x387   :  { %7191 = vmatprep.subr.bf16.mxu1 %v9402_v25  ;;  %v9489_v25 = vcombine.low %v1162_v63, %v1166_v0  ;;  %v1286_v27 = vld [vmem:[#allocation7 + $0x1ee8] sm:$0xff]  ;;  %v9482_v20 = vcombine.high %v1154_v10, %v1158_v13  ;;  %v483_v63 = vld [vmem:[#allocation7 + $0x5d0] sm:$0xff] }
 0x388   :  { %7231 = vmatpush1.bf16.msra.mxu0 %v9537_v26  ;;  %v1282_v26 = vld [vmem:[#allocation7 + $0x1ec8] sm:$0xff]  ;;  %v487_v0 = vld [vmem:[#allocation7 + $0x5f0] sm:$0xff] }
 0x389   :  { %7232 = vmatprep.subr.bf16.mxu0 %v9530_v29  ;;  %v9617_v29 = vcombine.low %v1290_v5, %v1294_v7  ;;  %v1150_v28 = vld [vmem:[#allocation7 + $0x1aa8] sm:$0xff]  ;;  %v9610_v33 = vcombine.high %v1282_v26, %v1286_v27  ;;  %v1337_v5 = vsub.s32 3, %v10123_v38  ;;  %v347_v7 = vld [vmem:[#allocation7 + $0x190] sm:$0xff] }
 0x38a   :  { %7192 = vmatpush1.bf16.msra.mxu1 %v9401_v30  ;;  %v1146_v30 = vld [vmem:[#allocation7 + $0x1a88] sm:$0xff] }
 0x38b   :  { %7193 = vmatprep.subr.bf16.mxu1 %v9394_v35  ;;  %v9481_v35 = vcombine.low %v1154_v10, %v1158_v13  ;;  %v1278_v19 = vld [vmem:[#allocation7 + $0x1ea8] sm:$0xff]  ;;  %v9474_v22 = vcombine.high %v1146_v30, %v1150_v28  ;;  %v9894_v10 = vld [vmem:[#allocation9] sm:$0xff] }
 0x38c   :  { %7233 = vmatpush1.bf16.msra.mxu0 %v9529_v32  ;;  %v1274_v32 = vld [vmem:[#allocation7 + $0x1e88] sm:$0xff] }
 0x38d   :  { %7234 = vmatprep.subr.bf16.mxu0 %v9522_v31  ;;  %v9609_v31 = vcombine.low %v1282_v26, %v1286_v27  ;;  %v1142_v39 = vld [vmem:[#allocation7 + $0x1a68] sm:$0xff]  ;;  %v9602_v16 = vcombine.high %v1274_v32, %v1278_v19  ;;  %v479_v26 = vld [vmem:[#allocation7 + $0x5b0] sm:$0xff] }
 0x38e   :  { %7194 = vmatpush1.bf16.msra.mxu1 %v9393_v37  ;;  %v1138_v37 = vld [vmem:[#allocation7 + $0x1a48] sm:$0xff] }
 0x38f   :  { %7195 = vmatprep.subr.bf16.mxu1 %v9514_v41  ;;  %v9473_v41 = vcombine.low %v1146_v30, %v1150_v28  ;;  %v1270_v45 = vld [vmem:[#allocation7 + $0x1e68] sm:$0xff]  ;;  %v9466_v36 = vcombine.high %v1138_v37, %v1142_v39  ;;  %v339_v30 = vld [vmem:[#allocation7 + $0x150] sm:$0xff] }
 0x390   :  { %7235 = vmatpush1.bf16.msra.mxu0 %v9521_v43  ;;  %v1266_v43 = vld [vmem:[#allocation7 + $0x1e48] sm:$0xff]  ;;  %v343_v28 = vld [vmem:[#allocation7 + $0x170] sm:$0xff] }
 0x391   :  { %7236 = vmatprep.subr.bf16.mxu0 %v9642_v46  ;;  %v9601_v46 = vcombine.low %v1274_v32, %v1278_v19  ;;  %v1134_v48 = vld [vmem:[#allocation7 + $0x1a28] sm:$0xff]  ;;  %v9594_v49 = vcombine.high %v1266_v43, %v1270_v45 }
 0x392   :  { %7196 = vmatpush2.bf16.msra.mxu1 %v9513_v47  ;;  %v1130_v47 = vld [vmem:[#allocation7 + $0x1a08] sm:$0xff] }
 0x393   :  { %7197 = vmatprep.subr.bf16.mxu1 %v9506_v50  ;;  %v9465_v50 = vcombine.low %v1138_v37, %v1142_v39  ;;  %v1262_v52 = vld [vmem:[#allocation7 + $0x1e28] sm:$0xff]  ;;  %v9458_v53 = vcombine.high %v1130_v47, %v1134_v48 }
 0x394   :  { %7237 = vmatpush2.bf16.msra.mxu0 %v9641_v51  ;;  %v1258_v51 = vld [vmem:[#allocation7 + $0x1e08] sm:$0xff] }
 0x395   :  { %7238 = vmatprep.subr.bf16.mxu0 %v9634_v54  ;;  %v9593_v54 = vcombine.low %v1266_v43, %v1270_v45  ;;  %v9586_v57 = vcombine.high %v1258_v51, %v1262_v52 }
 0x396   :  { %7198 = vmatpush2.bf16.msra.mxu1 %v9505_v55  ;;  %v355_v55 = vld [vmem:[#allocation7 + $0x1d0] sm:$0xff] }
 0x397   :  { %7199 = vmatprep.subr.bf16.mxu1 %v9498_v58  ;;  %v9457_v58 = vcombine.low %v1130_v47, %v1134_v48 }
 0x398   :  { %7239 = vmatpush2.bf16.msra.mxu0 %v9633_v60  ;;  %v1333_v60 = vsub.s32 2, %v10123_v38 }
 0x399   :  { %7240 = vmatprep.subr.bf16.mxu0 %v9626_v2  ;;  %v8684_v2 = vcombine.high %v355_v55, %v359_v56 }
 0x39a   :  { %7200 = vmatpush2.bf16.msra.mxu1 %v9497_v3  ;;  %v9585_v3 = vcombine.low %v1258_v51, %v1262_v52  ;;  %v1334_v13 = vrot.slane %v9894_v10, %v1333_v60  ;;  %v8667_v51 = vcombine.low %v339_v30, %v343_v28  ;;  %v459_v52 = vld [vmem:[#allocation7 + $0x510] sm:$0xff] }
 0x39b   :  { %7201 = vmatprep.subr.bf16.mxu1 %v9490_v8  ;;  %v351_v8 = vld [vmem:[#allocation7 + $0x1b0] sm:$0xff] }
 0x39c   :  { %7241 = vmatpush2.bf16.msra.mxu0 %v9625_v9  ;;  %v8812_v9 = vcombine.high %v483_v63, %v487_v0  ;;  %v8676_v27 = vcombine.high %v347_v7, %v351_v8  ;;  %v8675_v19 = vcombine.low %v347_v7, %v351_v8  ;;  %v327_v60 = vld [vmem:[#allocation7 + $0xf0] sm:$0xff] }
 0x39d   :  { %7242 = vmatprep.subr.bf16.mxu0 %v9618_v14  ;;  %v8683_v14 = vcombine.low %v355_v55, %v359_v56 }
 0x39e   :  { %7202 = vmatpush2.bf16.msra.mxu1 %v9489_v25  ;;  %v475_v25 = vld [vmem:[#allocation7 + $0x590] sm:$0xff] }
 0x39f   :  { %7203 = vmatprep.subr.bf16.mxu1 %v9482_v20  ;;  %v1338_v20 = vrot.slane %v9894_v10, %v1337_v5  ;;  %v8803_v45 = vcombine.low %v475_v25, %v479_v26  ;;  %v455_v5 = vld [vmem:[#allocation7 + $0x4f0] sm:$0xff] }
 0x3a0   :  { %7243 = vmatpush2.bf16.msra.mxu0 %v9617_v29  ;;  %v8811_v29 = vcombine.low %v483_v63, %v487_v0  ;;  %v319_v10 = vld [vmem:[#allocation7 + $0xb0] sm:$0xff] }
 0x3a1   :  { %7244 = vmatprep.subr.bf16.mxu0 %v9610_v33 }
 0x3a2   :  { %7204 = vmatpush2.bf16.msra.mxu1 %v9481_v35  ;;  %v8804_v35 = vcombine.high %v475_v25, %v479_v26  ;;  %v443_v25 = vld [vmem:[#allocation7 + $0x490] sm:$0xff] }
 0x3a3   :  { %7205 = vmatprep.subr.bf16.mxu1 %v9474_v22  ;;  %v467_v22 = vld [vmem:[#allocation7 + $0x550] sm:$0xff] }
 0x3a4   :  { %7245 = vmatpush2.bf16.msra.mxu0 %v9609_v31  ;;  %v471_v31 = vld [vmem:[#allocation7 + $0x570] sm:$0xff] }
 0x3a5   :  { %7246 = vmatprep.subr.bf16.mxu0 %v9602_v16  ;;  %v8668_v16 = vcombine.high %v339_v30, %v343_v28  ;;  %v447_v26 = vld [vmem:[#allocation7 + $0x4b0] sm:$0xff] }
 0x3a6   :  { %7206 = vmatpush2.bf16.msra.mxu1 %v9473_v41  ;;  %v311_v30 = vld [vmem:[#allocation7 + $0x70] sm:$0xff]  ;;  %v8772_v28 = vcombine.high %v443_v25, %v447_v26 }
 0x3a7   :  { %7207 = vmatprep.subr.bf16.mxu1 %v9466_v36  ;;  %v331_v36 = vld [vmem:[#allocation7 + $0x110] sm:$0xff] }
 0x3a8   :  { %7247 = vmatpush2.bf16.msra.mxu0 %v9601_v46  ;;  %v335_v46 = vld [vmem:[#allocation7 + $0x130] sm:$0xff] }
 0x3a9   :  { %7248 = vmatprep.subr.bf16.mxu0 %v9594_v49  ;;  %v8796_v49 = vcombine.high %v467_v22, %v471_v31  ;;  %v8660_v56 = vcombine.high %v331_v36, %v335_v46 }
 0x3aa   :  { %7208 = vmatpush2.bf16.msra.mxu1 %v9465_v50 }
 0x3ab   :  { %7209 = vmatprep.subr.bf16.mxu1 %v9458_v53  ;;  %v463_v53 = vld [vmem:[#allocation7 + $0x530] sm:$0xff] }
 0x3ac   :  { %7249 = vmatpush2.bf16.msra.mxu0 %v9593_v54  ;;  %v8788_v0 = vcombine.high %v459_v52, %v463_v53  ;;  %v8787_v8 = vcombine.low %v459_v52, %v463_v53  ;;  %v547_v52 = vld [vmem:[#allocation7 + $0x7d0] sm:$0xff] }
 0x3ad   :  { %7250 = vmatprep.subr.bf16.mxu0 %v9586_v57  ;;  %v8795_v57 = vcombine.low %v467_v22, %v471_v31  ;;  %v8771_v22 = vcombine.low %v443_v25, %v447_v26  ;;  %v299_v31 = vld [vmem:[#allocation7 + $0x10] sm:$0xff] }
 0x3ae   :  { %7210 = vmatpush2.bf16.msra.mxu1 %v9457_v58  ;;  %v323_v58 = vld [vmem:[#allocation7 + $0xd0] sm:$0xff] }
 0x3af   :  { %7261 = vmatprep.subr.bf16.mxu1 %v8684_v2  ;;  %v8659_v2 = vcombine.low %v331_v36, %v335_v46  ;;  %v8652_v7 = vcombine.high %v323_v58, %v327_v60  ;;  %v551_v53 = vld [vmem:[#allocation7 + $0x7f0] sm:$0xff] }
 0x3b0   :  { %7251 = vmatpush2.bf16.msra.mxu0 %v9585_v3  ;;  %v451_v3 = vld [vmem:[#allocation7 + $0x4d0] sm:$0xff] }
 0x3b1   :  { %v6967_v33 = vpop.f32.mrf.mxu1  ;;  %7212 = vmatmul.mubr.bf16.vlgmr.msra.gmra.mxu1 %v10146_v15  ;;  %7302 = vmatprep.subr.bf16.mxu0 %v8812_v9  ;;  %v315_v9 = vld [vmem:[#allocation7 + $0x90] sm:$0xff] }
 0x3b2   :  { %v6968_v32 = vadd.f32 %v6967_v33, %v1334_v13  ;;  %7262 = vmatpush1.bf16.msra.mxu1 %v8683_v14  ;;  %7293 = vmatprep.mubr.bf16.mxu1 %v10130_v62  ;;  %v8780_v13 = vcombine.high %v451_v3, %v455_v5  ;;  %v8651_v14 = vcombine.low %v323_v58, %v327_v60  ;;  %v395_v26 = vld [vmem:[#allocation7 + $0x310] sm:$0xff] }
 0x3b3   :  { %v6969_v37 = vpop.f32.mrf.mxu1  ;;  %v7008_v39 = vpop.f32.mrf.mxu0  ;;  %7253 = vmatmul.mubr.bf16.vlgmr.msra.gmra.mxu0 %v10189_v1  ;;  %7263 = vmatprep.subr.bf16.mxu1 %v8676_v27  ;;  %v8644_v27 = vcombine.high %v315_v9, %v319_v10  ;;  %v8643_v33 = vcombine.low %v315_v9, %v319_v10  ;;  %v8876_v58 = vcombine.high %v547_v52, %v551_v53  ;;  %v531_v10 = vld [vmem:[#allocation7 + $0x750] sm:$0xff] }
 0x3b4   :  { %v6970_v41 = vadd.f32 %v6969_v37, %v1338_v20  ;;  %v10233_v43 = vadd.f32 %v7008_v39, %v6968_v32  ;;  %7303 = vmatpush1.bf16.msra.mxu0 %v8811_v29  ;;  %7334 = vmatprep.mubr.bf16.mxu0 %v10137_v6  ;;  %v8779_v20 = vcombine.low %v451_v3, %v455_v5  ;;  %v307_v29 = vld [vmem:[#allocation7 + $0x50] sm:$0xff] }
 0x3b5   :  { %v6971_v47 = vpop.f32.mrf.mxu1  ;;  %v7010_v48 = vpop.f32.mrf.mxu0  ;;  %7304 = vmatprep.subr.bf16.mxu0 %v8804_v35  ;;  %v435_v35 = vld [vmem:[#allocation7 + $0x450] sm:$0xff]  ;;  %v8875_v3 = vcombine.low %v547_v52, %v551_v53 }
 0x3b6   :  { %v10236_v50 = vadd.f32 %v7010_v48, %v6970_v41  ;;  %7264 = vmatpush1.bf16.msra.mxu1 %v8675_v19  ;;  %v439_v32 = vld [vmem:[#allocation7 + $0x470] sm:$0xff]  ;;  %v8636_v19 = vcombine.high %v307_v29, %v311_v30 }
 0x3b7   :  { %v6972_v54 = vpop.f32.mrf.mxu1  ;;  %v7012_v55 = vpop.f32.mrf.mxu0  ;;  %7265 = vmatprep.subr.bf16.mxu1 %v8668_v16  ;;  %v303_v37 = vld [vmem:[#allocation7 + $0x30] sm:$0xff]  ;;  %v8764_v39 = vcombine.high %v435_v35, %v439_v32  ;;  %v8635_v16 = vcombine.low %v307_v29, %v311_v30  ;;  %v8763_v46 = vcombine.low %v435_v35, %v439_v32 }
 0x3b8   :  { %7305 = vmatpush1.bf16.msra.mxu0 %v8803_v45  ;;  %v427_v41 = vld [vmem:[#allocation7 + $0x410] sm:$0xff]  ;;  %v8628_v36 = vcombine.high %v299_v31, %v303_v37 }
 0x3b9   :  { %v7013_v63 = vpop.f32.mrf.mxu0  ;;  %7306 = vmatprep.subr.bf16.mxu0 %v8796_v49  ;;  %v431_v45 = vld [vmem:[#allocation7 + $0x430] sm:$0xff] }
 0x3ba   :  { %7266 = vmatpush1.bf16.msra.mxu1 %v8667_v51  ;;  %v419_v47 = vld [vmem:[#allocation7 + $0x3d0] sm:$0xff]  ;;  %v8756_v49 = vcombine.high %v427_v41, %v431_v45  ;;  %v8627_v51 = vcombine.low %v299_v31, %v303_v37  ;;  %v8755_v55 = vcombine.low %v427_v41, %v431_v45 }
 0x3bb   :  { %7267 = vmatprep.subr.bf16.mxu1 %v8660_v56  ;;  %v423_v48 = vld [vmem:[#allocation7 + $0x3f0] sm:$0xff] }
 0x3bc   :  { %7307 = vmatpush1.bf16.msra.mxu0 %v8795_v57  ;;  %v8748_v54 = vcombine.high %v419_v47, %v423_v48  ;;  %v411_v56 = vld [vmem:[#allocation7 + $0x390] sm:$0xff]  ;;  %v8747_v60 = vcombine.low %v419_v47, %v423_v48 }
 0x3bd   :  { %7308 = vmatprep.subr.bf16.mxu0 %v8788_v0  ;;  %v415_v57 = vld [vmem:[#allocation7 + $0x3b0] sm:$0xff] }
 0x3be   :  { %7268 = vmatpush1.bf16.msra.mxu1 %v8659_v2  ;;  %v539_v63 = vld [vmem:[#allocation7 + $0x790] sm:$0xff]  ;;  %v8740_v2 = vcombine.high %v411_v56, %v415_v57  ;;  %v8739_v9 = vcombine.low %v411_v56, %v415_v57 }
 0x3bf   :  { %7269 = vmatprep.subr.bf16.mxu1 %v8652_v7  ;;  %v543_v0 = vld [vmem:[#allocation7 + $0x7b0] sm:$0xff] }
 0x3c0   :  { %7309 = vmatpush1.bf16.msra.mxu0 %v8787_v8  ;;  %v403_v5 = vld [vmem:[#allocation7 + $0x350] sm:$0xff]  ;;  %v8868_v8 = vcombine.high %v539_v63, %v543_v0  ;;  %v8867_v25 = vcombine.low %v539_v63, %v543_v0 }
 0x3c1   :  { %7310 = vmatprep.subr.bf16.mxu0 %v8780_v13  ;;  %v407_v7 = vld [vmem:[#allocation7 + $0x370] sm:$0xff] }
 0x3c2   :  { %7270 = vmatpush1.bf16.msra.mxu1 %v8651_v14  ;;  %v535_v13 = vld [vmem:[#allocation7 + $0x770] sm:$0xff]  ;;  %v8732_v14 = vcombine.high %v403_v5, %v407_v7  ;;  %v8731_v29 = vcombine.low %v403_v5, %v407_v7 }
 0x3c3   :  { %7271 = vmatprep.subr.bf16.mxu1 %v8644_v27  ;;  %v399_v27 = vld [vmem:[#allocation7 + $0x330] sm:$0xff]  ;;  %v8859_v35 = vcombine.low %v531_v10, %v535_v13 }
 0x3c4   :  { %7311 = vmatpush1.bf16.msra.mxu0 %v8779_v20  ;;  %v8860_v20 = vcombine.high %v531_v10, %v535_v13  ;;  %v523_v30 = vld [vmem:[#allocation7 + $0x710] sm:$0xff]  ;;  %v8723_v31 = vcombine.low %v395_v26, %v399_v27 }
 0x3c5   :  { %7312 = vmatprep.subr.bf16.mxu0 %v8772_v28  ;;  %v527_v28 = vld [vmem:[#allocation7 + $0x730] sm:$0xff] }
 0x3c6   :  { %7272 = vmatpush1.bf16.msra.mxu1 %v8643_v33  ;;  %v8724_v33 = vcombine.high %v395_v26, %v399_v27  ;;  %v387_v32 = vld [vmem:[#allocation7 + $0x2d0] sm:$0xff]  ;;  %v8851_v41 = vcombine.low %v523_v30, %v527_v28 }
 0x3c7   :  { %7273 = vmatprep.subr.bf16.mxu1 %v8636_v19  ;;  %v391_v19 = vld [vmem:[#allocation7 + $0x2f0] sm:$0xff] }
 0x3c8   :  { %7313 = vmatpush1.bf16.msra.mxu0 %v8771_v22  ;;  %v8852_v22 = vcombine.high %v523_v30, %v527_v28  ;;  %v515_v37 = vld [vmem:[#allocation7 + $0x6d0] sm:$0xff]  ;;  %v8715_v47 = vcombine.low %v387_v32, %v391_v19 }
 0x3c9   :  { %7314 = vmatprep.subr.bf16.mxu0 %v8764_v39  ;;  %v519_v39 = vld [vmem:[#allocation7 + $0x6f0] sm:$0xff] }
 0x3ca   :  { %7274 = vmatpush1.bf16.msra.mxu1 %v8635_v16  ;;  %v8716_v16 = vcombine.high %v387_v32, %v391_v19  ;;  %v379_v45 = vld [vmem:[#allocation7 + $0x290] sm:$0xff]  ;;  %v8843_v52 = vcombine.low %v515_v37, %v519_v39 }
 0x3cb   :  { %7275 = vmatprep.subr.bf16.mxu1 %v8628_v36  ;;  %v383_v36 = vld [vmem:[#allocation7 + $0x2b0] sm:$0xff] }
 0x3cc   :  { %7315 = vmatpush1.bf16.msra.mxu0 %v8763_v46  ;;  %v8844_v46 = vcombine.high %v515_v37, %v519_v39  ;;  %v507_v48 = vld [vmem:[#allocation7 + $0x690] sm:$0xff]  ;;  %v8707_v56 = vcombine.low %v379_v45, %v383_v36 }
 0x3cd   :  { %7316 = vmatprep.subr.bf16.mxu0 %v8756_v49  ;;  %v511_v49 = vld [vmem:[#allocation7 + $0x6b0] sm:$0xff] }
 0x3ce   :  { %7276 = vmatpush1.bf16.msra.mxu1 %v8627_v51  ;;  %v8708_v51 = vcombine.high %v379_v45, %v383_v36  ;;  %v371_v53 = vld [vmem:[#allocation7 + $0x250] sm:$0xff]  ;;  %v8835_v63 = vcombine.low %v507_v48, %v511_v49 }
 0x3cf   :  { %7277 = vmatprep.subr.bf16.mxu1 %v8748_v54  ;;  %v375_v54 = vld [vmem:[#allocation7 + $0x270] sm:$0xff] }
 0x3d0   :  { %7317 = vmatpush1.bf16.msra.mxu0 %v8755_v55  ;;  %v8836_v55 = vcombine.high %v507_v48, %v511_v49  ;;  %v499_v57 = vld [vmem:[#allocation7 + $0x650] sm:$0xff]  ;;  %v8699_v5 = vcombine.low %v371_v53, %v375_v54 }
 0x3d1   :  { %7318 = vmatprep.subr.bf16.mxu0 %v8876_v58  ;;  %v503_v58 = vld [vmem:[#allocation7 + $0x670] sm:$0xff] }
 0x3d2   :  { %7278 = vmatpush2.bf16.msra.mxu1 %v8747_v60  ;;  %v8700_v60 = vcombine.high %v371_v53, %v375_v54  ;;  %v363_v0 = vld [vmem:[#allocation7 + $0x210] sm:$0xff]  ;;  %v8827_v10 = vcombine.low %v499_v57, %v503_v58 }
 0x3d3   :  { %7279 = vmatprep.subr.bf16.mxu1 %v8740_v2  ;;  %v367_v2 = vld [vmem:[#allocation7 + $0x230] sm:$0xff] }
 0x3d4   :  { %7319 = vmatpush2.bf16.msra.mxu0 %v8875_v3  ;;  %v8828_v3 = vcombine.high %v499_v57, %v503_v58  ;;  %v491_v7 = vld [vmem:[#allocation7 + $0x610] sm:$0xff]  ;;  %v8691_v26 = vcombine.low %v363_v0, %v367_v2 }
 0x3d5   :  { %7320 = vmatprep.subr.bf16.mxu0 %v8868_v8  ;;  %v495_v8 = vld [vmem:[#allocation7 + $0x630] sm:$0xff] }
 0x3d6   :  { %7280 = vmatpush2.bf16.msra.mxu1 %v8739_v9  ;;  %v8692_v9 = vcombine.high %v363_v0, %v367_v2  ;;  %v611_v13 = vld [vmem:[#allocation7 + $0x9d0] sm:$0xff]  ;;  %v8819_v30 = vcombine.low %v491_v7, %v495_v8 }
 0x3d7   :  { %7281 = vmatprep.subr.bf16.mxu1 %v8732_v14  ;;  %v615_v14 = vld [vmem:[#allocation7 + $0x9f0] sm:$0xff] }
 0x3d8   :  { %7321 = vmatpush2.bf16.msra.mxu0 %v8867_v25  ;;  %v8820_v25 = vcombine.high %v491_v7, %v495_v8  ;;  %v739_v27 = vld [vmem:[#allocation7 + $0xdd0] sm:$0xff]  ;;  %v8939_v32 = vcombine.low %v611_v13, %v615_v14 }
 0x3d9   :  { %7322 = vmatprep.subr.bf16.mxu0 %v8860_v20  ;;  %v743_v20 = vld [vmem:[#allocation7 + $0xdf0] sm:$0xff] }
 0x3da   :  { %7282 = vmatpush2.bf16.msra.mxu1 %v8731_v29  ;;  %v8940_v29 = vcombine.high %v611_v13, %v615_v14  ;;  %v603_v28 = vld [vmem:[#allocation7 + $0x990] sm:$0xff]  ;;  %v9067_v37 = vcombine.low %v739_v27, %v743_v20 }
 0x3db   :  { %7283 = vmatprep.subr.bf16.mxu1 %v8724_v33  ;;  %v607_v33 = vld [vmem:[#allocation7 + $0x9b0] sm:$0xff] }
 0x3dc   :  { %7323 = vmatpush2.bf16.msra.mxu0 %v8859_v35  ;;  %v9068_v35 = vcombine.high %v739_v27, %v743_v20  ;;  %v731_v19 = vld [vmem:[#allocation7 + $0xd90] sm:$0xff] }
 0x3dd   :  { %7324 = vmatprep.subr.bf16.mxu0 %v8852_v22  ;;  %v735_v22 = vld [vmem:[#allocation7 + $0xdb0] sm:$0xff] }
 0x3de   :  { %7284 = vmatpush2.bf16.msra.mxu1 %v8723_v31  ;;  %v8932_v31 = vcombine.high %v603_v28, %v607_v33  ;;  %v595_v39 = vld [vmem:[#allocation7 + $0x950] sm:$0xff]  ;;  %v9060_v45 = vcombine.high %v731_v19, %v735_v22 }
 0x3df   :  { %7285 = vmatprep.subr.bf16.mxu1 %v8716_v16  ;;  %v599_v16 = vld [vmem:[#allocation7 + $0x970] sm:$0xff] }
 0x3e0   :  { %7325 = vmatpush2.bf16.msra.mxu0 %v8851_v41  ;;  %v727_v48 = vld [vmem:[#allocation7 + $0xd70] sm:$0xff]  ;;  %v8923_v0 = vcombine.low %v595_v39, %v599_v16 }
 0x3e1   :  { %7326 = vmatprep.subr.bf16.mxu0 %v8844_v46  ;;  %v8931_v46 = vcombine.low %v603_v28, %v607_v33  ;;  %v715_v2 = vld [vmem:[#allocation7 + $0xd10] sm:$0xff] }
 0x3e2   :  { %7286 = vmatpush2.bf16.msra.mxu1 %v8715_v47  ;;  %v723_v47 = vld [vmem:[#allocation7 + $0xd50] sm:$0xff] }
 0x3e3   :  { %7287 = vmatprep.subr.bf16.mxu1 %v8708_v51  ;;  %v9051_v8 = vcombine.low %v723_v47, %v727_v48  ;;  %v711_v27 = vld [vmem:[#allocation7 + $0xcf0] sm:$0xff] }
 0x3e4   :  { %7327 = vmatpush2.bf16.msra.mxu0 %v8843_v52  ;;  %v8924_v52 = vcombine.high %v595_v39, %v599_v16  ;;  %v575_v28 = vld [vmem:[#allocation7 + $0x8b0] sm:$0xff] }
 0x3e5   :  { %7328 = vmatprep.subr.bf16.mxu0 %v8836_v55  ;;  %v587_v55 = vld [vmem:[#allocation7 + $0x910] sm:$0xff] }
 0x3e6   :  { %7288 = vmatpush2.bf16.msra.mxu1 %v8707_v56  ;;  %v591_v56 = vld [vmem:[#allocation7 + $0x930] sm:$0xff] }
 0x3e7   :  { %7289 = vmatprep.subr.bf16.mxu1 %v8700_v60  ;;  %v9052_v60 = vcombine.high %v723_v47, %v727_v48  ;;  %v8916_v7 = vcombine.high %v587_v55, %v591_v56  ;;  %v567_v39 = vld [vmem:[#allocation7 + $0x870] sm:$0xff] }
 0x3e8   :  { %7329 = vmatpush2.bf16.msra.mxu0 %v8835_v63  ;;  %v555_v48 = vld [vmem:[#allocation7 + $0x810] sm:$0xff] }
 0x3e9   :  { %7330 = vmatprep.subr.bf16.mxu0 %v8828_v3  ;;  %v719_v3 = vld [vmem:[#allocation7 + $0xd30] sm:$0xff] }
 0x3ea   :  { %7290 = vmatpush2.bf16.msra.mxu1 %v8699_v5  ;;  %v9044_v14 = vcombine.high %v715_v2, %v719_v3 }
 0x3eb   :  { %7291 = vmatprep.subr.bf16.mxu1 %v8692_v9  ;;  %v579_v9 = vld [vmem:[#allocation7 + $0x8d0] sm:$0xff] }
 0x3ec   :  { %7331 = vmatpush2.bf16.msra.mxu0 %v8827_v10  ;;  %v583_v10 = vld [vmem:[#allocation7 + $0x8f0] sm:$0xff] }
 0x3ed   :  { %7332 = vmatprep.subr.bf16.mxu0 %v8820_v25  ;;  %v8915_v25 = vcombine.low %v587_v55, %v591_v56  ;;  %v8908_v20 = vcombine.high %v579_v9, %v583_v10 }
 0x3ee   :  { %7292 = vmatpush2.bf16.msra.mxu1 %v8691_v26  ;;  %v707_v26 = vld [vmem:[#allocation7 + $0xcd0] sm:$0xff] }
 0x3ef   :  { %7343 = vmatprep.subr.bf16.mxu1 %v8940_v29  ;;  %v9043_v29 = vcombine.low %v715_v2, %v719_v3  ;;  %v9036_v33 = vcombine.high %v707_v26, %v711_v27  ;;  %v803_v2 = vld [vmem:[#allocation7 + $0xfd0] sm:$0xff] }
 0x3f0   :  { %7333 = vmatpush2.bf16.msra.mxu0 %v8819_v30  ;;  %v571_v30 = vld [vmem:[#allocation7 + $0x890] sm:$0xff] }
 0x3f1   :  { %v7049_v41 = vpop.f32.mrf.mxu1  ;;  %7294 = vmatmul.mubr.bf16.vlgmr.msra.gmra.mxu1 %v10126_v59  ;;  %7384 = vmatprep.subr.bf16.mxu0 %v9068_v35  ;;  %v8907_v35 = vcombine.low %v579_v9, %v583_v10  ;;  %v807_v3 = vld [vmem:[#allocation7 + $0xff0] sm:$0xff] }
 0x3f2   :  { %v7050_v36 = vadd.f32 %v7049_v41, %v10233_v43  ;;  %7344 = vmatpush1.bf16.msra.mxu1 %v8939_v32  ;;  %7375 = vmatprep.mubr.bf16.mxu1 %v10132_v4  ;;  %v9059_v43 = vcombine.low %v731_v19, %v735_v22  ;;  %v699_v32 = vld [vmem:[#allocation7 + $0xc90] sm:$0xff]  ;;  %v8900_v22 = vcombine.high %v571_v30, %v575_v28 }
 0x3f3   :  { %v7051_v49 = vpop.f32.mrf.mxu1  ;;  %v7090_v51 = vpop.f32.mrf.mxu0  ;;  %7335 = vmatmul.mubr.bf16.vlgmr.msra.gmra.mxu0 %v10144_v12  ;;  %7345 = vmatprep.subr.bf16.mxu1 %v8932_v31  ;;  %v703_v19 = vld [vmem:[#allocation7 + $0xcb0] sm:$0xff]  ;;  %v9035_v31 = vcombine.low %v707_v26, %v711_v27  ;;  %v8899_v41 = vcombine.low %v571_v30, %v575_v28  ;;  %v9132_v9 = vcombine.high %v803_v2, %v807_v3 }
 0x3f4   :  { %v7052_v53 = vadd.f32 %v7051_v49, %v10236_v50  ;;  %v10243_v54 = vadd.f32 %v7090_v51, %v7050_v36  ;;  %7385 = vmatpush1.bf16.msra.mxu0 %v9067_v37  ;;  %7416 = vmatprep.mubr.bf16.mxu0 %v10151_v17  ;;  %v563_v37 = vld [vmem:[#allocation7 + $0x850] sm:$0xff]  ;;  %v9028_v16 = vcombine.high %v699_v32, %v703_v19 }
 0x3f5   :  { %v7053_v57 = vpop.f32.mrf.mxu1  ;;  %v7092_v58 = vpop.f32.mrf.mxu0  ;;  %7386 = vmatprep.subr.bf16.mxu0 %v9060_v45  ;;  %v691_v45 = vld [vmem:[#allocation7 + $0xc50] sm:$0xff]  ;;  %v9027_v47 = vcombine.low %v699_v32, %v703_v19  ;;  %v9131_v26 = vcombine.low %v803_v2, %v807_v3 }
 0x3f6   :  { %v10246_v63 = vadd.f32 %v7092_v58, %v7052_v53  ;;  %7346 = vmatpush1.bf16.msra.mxu1 %v8931_v46  ;;  %v695_v36 = vld [vmem:[#allocation7 + $0xc70] sm:$0xff]  ;;  %v8892_v46 = vcombine.high %v563_v37, %v567_v39 }
 0x3f7   :  { %v7054_v5 = vpop.f32.mrf.mxu1  ;;  %v7094_v50 = vpop.f32.mrf.mxu0  ;;  %7347 = vmatprep.subr.bf16.mxu1 %v8924_v52  ;;  %v559_v49 = vld [vmem:[#allocation7 + $0x830] sm:$0xff]  ;;  %v9020_v51 = vcombine.high %v691_v45, %v695_v36  ;;  %v8891_v52 = vcombine.low %v563_v37, %v567_v39  ;;  %v9019_v56 = vcombine.low %v691_v45, %v695_v36 }
 0x3f8   :  { %7387 = vmatpush1.bf16.msra.mxu0 %v9059_v43  ;;  %v683_v53 = vld [vmem:[#allocation7 + $0xc10] sm:$0xff]  ;;  %v8884_v55 = vcombine.high %v555_v48, %v559_v49 }
 0x3f9   :  { %v7095_v13 = vpop.f32.mrf.mxu0  ;;  %7388 = vmatprep.subr.bf16.mxu0 %v9052_v60  ;;  %v687_v43 = vld [vmem:[#allocation7 + $0xc30] sm:$0xff] }
 0x3fa   :  { %7348 = vmatpush1.bf16.msra.mxu1 %v8923_v0  ;;  %v675_v57 = vld [vmem:[#allocation7 + $0xbd0] sm:$0xff]  ;;  %v9012_v60 = vcombine.high %v683_v53, %v687_v43  ;;  %v8883_v0 = vcombine.low %v555_v48, %v559_v49  ;;  %v9011_v50 = vcombine.low %v683_v53, %v687_v43 }
 0x3fb   :  { %7349 = vmatprep.subr.bf16.mxu1 %v8916_v7  ;;  %v679_v58 = vld [vmem:[#allocation7 + $0xbf0] sm:$0xff] }
 0x3fc   :  { %7389 = vmatpush1.bf16.msra.mxu0 %v9051_v8  ;;  %v9004_v5 = vcombine.high %v675_v57, %v679_v58  ;;  %v667_v7 = vld [vmem:[#allocation7 + $0xb90] sm:$0xff]  ;;  %v9003_v10 = vcombine.low %v675_v57, %v679_v58 }
 0x3fd   :  { %7390 = vmatprep.subr.bf16.mxu0 %v9044_v14  ;;  %v671_v8 = vld [vmem:[#allocation7 + $0xbb0] sm:$0xff] }
 0x3fe   :  { %7350 = vmatpush1.bf16.msra.mxu1 %v8915_v25  ;;  %v795_v13 = vld [vmem:[#allocation7 + $0xf90] sm:$0xff]  ;;  %v8996_v25 = vcombine.high %v667_v7, %v671_v8  ;;  %v8995_v30 = vcombine.low %v667_v7, %v671_v8 }
 0x3ff   :  { %7351 = vmatprep.subr.bf16.mxu1 %v8908_v20  ;;  %v799_v14 = vld [vmem:[#allocation7 + $0xfb0] sm:$0xff] }
 0x400   :  { %7391 = vmatpush1.bf16.msra.mxu0 %v9043_v29  ;;  %v659_v27 = vld [vmem:[#allocation7 + $0xb50] sm:$0xff]  ;;  %v9124_v29 = vcombine.high %v795_v13, %v799_v14  ;;  %v9123_v32 = vcombine.low %v795_v13, %v799_v14 }
 0x401   :  { %7392 = vmatprep.subr.bf16.mxu0 %v9036_v33  ;;  %v663_v20 = vld [vmem:[#allocation7 + $0xb70] sm:$0xff] }
 0x402   :  { %7352 = vmatpush1.bf16.msra.mxu1 %v8907_v35  ;;  %v787_v28 = vld [vmem:[#allocation7 + $0xf50] sm:$0xff]  ;;  %v8988_v35 = vcombine.high %v659_v27, %v663_v20  ;;  %v8987_v37 = vcombine.low %v659_v27, %v663_v20 }
 0x403   :  { %7353 = vmatprep.subr.bf16.mxu1 %v8900_v22  ;;  %v791_v33 = vld [vmem:[#allocation7 + $0xf70] sm:$0xff] }
 0x404   :  { %7393 = vmatpush1.bf16.msra.mxu0 %v9035_v31  ;;  %v651_v19 = vld [vmem:[#allocation7 + $0xb10] sm:$0xff]  ;;  %v9116_v31 = vcombine.high %v787_v28, %v791_v33  ;;  %v9115_v45 = vcombine.low %v787_v28, %v791_v33 }
 0x405   :  { %7394 = vmatprep.subr.bf16.mxu0 %v9028_v16  ;;  %v655_v22 = vld [vmem:[#allocation7 + $0xb30] sm:$0xff] }
 0x406   :  { %7354 = vmatpush1.bf16.msra.mxu1 %v8899_v41  ;;  %v779_v39 = vld [vmem:[#allocation7 + $0xf10] sm:$0xff]  ;;  %v8980_v41 = vcombine.high %v651_v19, %v655_v22  ;;  %v8979_v48 = vcombine.low %v651_v19, %v655_v22 }
 0x407   :  { %7355 = vmatprep.subr.bf16.mxu1 %v8892_v46  ;;  %v783_v16 = vld [vmem:[#allocation7 + $0xf30] sm:$0xff] }
 0x408   :  { %7395 = vmatpush1.bf16.msra.mxu0 %v9027_v47  ;;  %v643_v36 = vld [vmem:[#allocation7 + $0xad0] sm:$0xff]  ;;  %v9108_v47 = vcombine.high %v779_v39, %v783_v16  ;;  %v9107_v53 = vcombine.low %v779_v39, %v783_v16 }
 0x409   :  { %7396 = vmatprep.subr.bf16.mxu0 %v9020_v51  ;;  %v647_v46 = vld [vmem:[#allocation7 + $0xaf0] sm:$0xff] }
 0x40a   :  { %7356 = vmatpush1.bf16.msra.mxu1 %v8891_v52  ;;  %v771_v49 = vld [vmem:[#allocation7 + $0xed0] sm:$0xff]  ;;  %v8972_v52 = vcombine.high %v643_v36, %v647_v46  ;;  %v8971_v57 = vcombine.low %v643_v36, %v647_v46 }
 0x40b   :  { %7357 = vmatprep.subr.bf16.mxu1 %v8884_v55  ;;  %v775_v51 = vld [vmem:[#allocation7 + $0xef0] sm:$0xff] }
 0x40c   :  { %7397 = vmatpush1.bf16.msra.mxu0 %v9019_v56  ;;  %v635_v43 = vld [vmem:[#allocation7 + $0xa90] sm:$0xff]  ;;  %v9100_v56 = vcombine.high %v771_v49, %v775_v51  ;;  %v9099_v2 = vcombine.low %v771_v49, %v775_v51 }
 0x40d   :  { %7398 = vmatprep.subr.bf16.mxu0 %v9012_v60  ;;  %v639_v55 = vld [vmem:[#allocation7 + $0xab0] sm:$0xff] }
 0x40e   :  { %7358 = vmatpush1.bf16.msra.mxu1 %v8883_v0  ;;  %v763_v58 = vld [vmem:[#allocation7 + $0xe90] sm:$0xff]  ;;  %v8964_v0 = vcombine.high %v635_v43, %v639_v55  ;;  %v8963_v7 = vcombine.low %v635_v43, %v639_v55 }
 0x40f   :  { %7359 = vmatprep.subr.bf16.mxu1 %v9004_v5  ;;  %v767_v60 = vld [vmem:[#allocation7 + $0xeb0] sm:$0xff] }
 0x410   :  { %7399 = vmatpush1.bf16.msra.mxu0 %v9011_v50  ;;  %v627_v3 = vld [vmem:[#allocation7 + $0xa50] sm:$0xff]  ;;  %v9092_v50 = vcombine.high %v763_v58, %v767_v60  ;;  %v9091_v13 = vcombine.low %v763_v58, %v767_v60 }
 0x411   :  { %7400 = vmatprep.subr.bf16.mxu0 %v9132_v9  ;;  %v631_v5 = vld [vmem:[#allocation7 + $0xa70] sm:$0xff] }
 0x412   :  { %7360 = vmatpush2.bf16.msra.mxu1 %v9003_v10  ;;  %v755_v8 = vld [vmem:[#allocation7 + $0xe50] sm:$0xff]  ;;  %v8956_v10 = vcombine.high %v627_v3, %v631_v5  ;;  %v8955_v27 = vcombine.low %v627_v3, %v631_v5 }
 0x413   :  { %7361 = vmatprep.subr.bf16.mxu1 %v8996_v25  ;;  %v759_v9 = vld [vmem:[#allocation7 + $0xe70] sm:$0xff] }
 0x414   :  { %7401 = vmatpush2.bf16.msra.mxu0 %v9131_v26  ;;  %v619_v14 = vld [vmem:[#allocation7 + $0xa10] sm:$0xff]  ;;  %v9084_v26 = vcombine.high %v755_v8, %v759_v9  ;;  %v9083_v28 = vcombine.low %v755_v8, %v759_v9 }
 0x415   :  { %7402 = vmatprep.subr.bf16.mxu0 %v9124_v29  ;;  %v623_v25 = vld [vmem:[#allocation7 + $0xa30] sm:$0xff] }
 0x416   :  { %7362 = vmatpush2.bf16.msra.mxu1 %v8995_v30  ;;  %v747_v20 = vld [vmem:[#allocation7 + $0xe10] sm:$0xff]  ;;  %v8948_v30 = vcombine.high %v619_v14, %v623_v25  ;;  %v8947_v19 = vcombine.low %v619_v14, %v623_v25 }
 0x417   :  { %7363 = vmatprep.subr.bf16.mxu1 %v8988_v35  ;;  %v751_v29 = vld [vmem:[#allocation7 + $0xe30] sm:$0xff] }
 0x418   :  { %7403 = vmatpush2.bf16.msra.mxu0 %v9123_v32  ;;  %v867_v33 = vld [vmem:[#allocation7 + $0x11d0] sm:$0xff]  ;;  %v9076_v32 = vcombine.high %v747_v20, %v751_v29  ;;  %v9075_v39 = vcombine.low %v747_v20, %v751_v29 }
 0x419   :  { %7404 = vmatprep.subr.bf16.mxu0 %v9116_v31  ;;  %v871_v35 = vld [vmem:[#allocation7 + $0x11f0] sm:$0xff] }
 0x41a   :  { %7364 = vmatpush2.bf16.msra.mxu1 %v8987_v37  ;;  %v995_v22 = vld [vmem:[#allocation7 + $0x15d0] sm:$0xff]  ;;  %v9196_v37 = vcombine.high %v867_v33, %v871_v35  ;;  %v9195_v36 = vcombine.low %v867_v33, %v871_v35 }
 0x41b   :  { %7365 = vmatprep.subr.bf16.mxu1 %v8980_v41  ;;  %v999_v31 = vld [vmem:[#allocation7 + $0x15f0] sm:$0xff] }
 0x41c   :  { %7405 = vmatpush2.bf16.msra.mxu0 %v9115_v45  ;;  %v859_v16 = vld [vmem:[#allocation7 + $0x1190] sm:$0xff]  ;;  %v9324_v45 = vcombine.high %v995_v22, %v999_v31  ;;  %v9323_v49 = vcombine.low %v995_v22, %v999_v31 }
 0x41d   :  { %7406 = vmatprep.subr.bf16.mxu0 %v9108_v47  ;;  %v863_v41 = vld [vmem:[#allocation7 + $0x11b0] sm:$0xff] }
 0x41e   :  { %7366 = vmatpush2.bf16.msra.mxu1 %v8979_v48  ;;  %v987_v46 = vld [vmem:[#allocation7 + $0x1590] sm:$0xff]  ;;  %v9188_v48 = vcombine.high %v859_v16, %v863_v41 }
 0x41f   :  { %7367 = vmatprep.subr.bf16.mxu1 %v8972_v52  ;;  %v991_v47 = vld [vmem:[#allocation7 + $0x15b0] sm:$0xff] }
 0x420   :  { %7407 = vmatpush2.bf16.msra.mxu0 %v9107_v53  ;;  %v851_v51 = vld [vmem:[#allocation7 + $0x1150] sm:$0xff]  ;;  %v9316_v43 = vcombine.high %v987_v46, %v991_v47 }
 0x421   :  { %7408 = vmatprep.subr.bf16.mxu0 %v9100_v56  ;;  %v855_v52 = vld [vmem:[#allocation7 + $0x1170] sm:$0xff]  ;;  %v9187_v56 = vcombine.low %v859_v16, %v863_v41 }
 0x422   :  { %7368 = vmatpush2.bf16.msra.mxu1 %v8971_v57  ;;  %v979_v57 = vld [vmem:[#allocation7 + $0x1550] sm:$0xff]  ;;  %v9179_v14 = vcombine.low %v851_v51, %v855_v52 }
 0x423   :  { %7369 = vmatprep.subr.bf16.mxu1 %v8964_v0  ;;  %v983_v58 = vld [vmem:[#allocation7 + $0x1570] sm:$0xff] }
 0x424   :  { %7409 = vmatpush2.bf16.msra.mxu0 %v9099_v2  ;;  %v9180_v2 = vcombine.high %v851_v51, %v855_v52  ;;  %v971_v25 = vld [vmem:[#allocation7 + $0x1510] sm:$0xff]  ;;  %v9307_v29 = vcombine.low %v979_v57, %v983_v58 }
 0x425   :  { %7410 = vmatprep.subr.bf16.mxu0 %v9092_v50  ;;  %v843_v50 = vld [vmem:[#allocation7 + $0x1110] sm:$0xff] }
 0x426   :  { %7370 = vmatpush2.bf16.msra.mxu1 %v8963_v7  ;;  %v847_v7 = vld [vmem:[#allocation7 + $0x1130] sm:$0xff] }
 0x427   :  { %7371 = vmatprep.subr.bf16.mxu1 %v8956_v10  ;;  %v9308_v10 = vcombine.high %v979_v57, %v983_v58  ;;  %v9172_v20 = vcombine.high %v843_v50, %v847_v7  ;;  %v967_v22 = vld [vmem:[#allocation7 + $0x14f0] sm:$0xff] }
 0x428   :  { %7411 = vmatpush2.bf16.msra.mxu0 %v9091_v13  ;;  %v831_v16 = vld [vmem:[#allocation7 + $0x10b0] sm:$0xff] }
 0x429   :  { %7412 = vmatprep.subr.bf16.mxu0 %v9084_v26  ;;  %v975_v26 = vld [vmem:[#allocation7 + $0x1530] sm:$0xff] }
 0x42a   :  { %7372 = vmatpush2.bf16.msra.mxu1 %v8955_v27  ;;  %v9300_v35 = vcombine.high %v971_v25, %v975_v26  ;;  %v823_v51 = vld [vmem:[#allocation7 + $0x1070] sm:$0xff] }
 0x42b   :  { %7373 = vmatprep.subr.bf16.mxu1 %v8948_v30  ;;  %v835_v30 = vld [vmem:[#allocation7 + $0x10d0] sm:$0xff] }
 0x42c   :  { %7413 = vmatpush2.bf16.msra.mxu0 %v9083_v28  ;;  %v839_v28 = vld [vmem:[#allocation7 + $0x10f0] sm:$0xff] }
 0x42d   :  { %7414 = vmatprep.subr.bf16.mxu0 %v9076_v32  ;;  %v9171_v32 = vcombine.low %v843_v50, %v847_v7  ;;  %v9164_v31 = vcombine.high %v835_v30, %v839_v28  ;;  %v811_v58 = vld [vmem:[#allocation7 + $0x1010] sm:$0xff] }
 0x42e   :  { %7374 = vmatpush2.bf16.msra.mxu1 %v8947_v19  ;;  %v963_v19 = vld [vmem:[#allocation7 + $0x14d0] sm:$0xff] }
 0x42f   :  { %7425 = vmatprep.subr.bf16.mxu1 %v9196_v37  ;;  %v9299_v37 = vcombine.low %v971_v25, %v975_v26  ;;  %v9292_v41 = vcombine.high %v963_v19, %v967_v22  ;;  %v1059_v25 = vld [vmem:[#allocation7 + $0x17d0] sm:$0xff] }
 0x430   :  { %7415 = vmatpush2.bf16.msra.mxu0 %v9075_v39  ;;  %v827_v39 = vld [vmem:[#allocation7 + $0x1090] sm:$0xff] }
 0x431   :  { %v7131_v53 = vpop.f32.mrf.mxu1  ;;  %7376 = vmatmul.mubr.bf16.vlgmr.msra.gmra.mxu1 %v10128_v61  ;;  %7466 = vmatprep.subr.bf16.mxu0 %v9324_v45  ;;  %v9163_v45 = vcombine.low %v835_v30, %v839_v28  ;;  %v1063_v26 = vld [vmem:[#allocation7 + $0x17f0] sm:$0xff] }
 0x432   :  { %v7132_v55 = vadd.f32 %v7131_v53, %v10243_v54  ;;  %7426 = vmatpush1.bf16.msra.mxu1 %v9195_v36  ;;  %7457 = vmatprep.mubr.bf16.mxu1 %v10153_v21  ;;  %v9315_v54 = vcombine.low %v987_v46, %v991_v47  ;;  %v955_v36 = vld [vmem:[#allocation7 + $0x1490] sm:$0xff]  ;;  %v9156_v47 = vcombine.high %v827_v39, %v831_v16 }
 0x433   :  { %v7133_v60 = vpop.f32.mrf.mxu1  ;;  %v7172_v0 = vpop.f32.mrf.mxu0  ;;  %7417 = vmatmul.mubr.bf16.vlgmr.msra.gmra.mxu0 %v10163_v42  ;;  %7427 = vmatprep.subr.bf16.mxu1 %v9188_v48  ;;  %v959_v46 = vld [vmem:[#allocation7 + $0x14b0] sm:$0xff]  ;;  %v9291_v48 = vcombine.low %v963_v19, %v967_v22  ;;  %v9155_v53 = vcombine.low %v827_v39, %v831_v16  ;;  %v9388_v30 = vcombine.high %v1059_v25, %v1063_v26 }
 0x434   :  { %v7134_v3 = vadd.f32 %v7133_v60, %v10246_v63  ;;  %v10253_v5 = vadd.f32 %v7172_v0, %v7132_v55  ;;  %7467 = vmatpush1.bf16.msra.mxu0 %v9323_v49  ;;  %7498 = vmatprep.mubr.bf16.mxu0 %v10168_v44  ;;  %v819_v49 = vld [vmem:[#allocation7 + $0x1050] sm:$0xff]  ;;  %v9284_v52 = vcombine.high %v955_v36, %v959_v46 }
 0x435   :  { %v7135_v8 = vpop.f32.mrf.mxu1  ;;  %v7174_v9 = vpop.f32.mrf.mxu0  ;;  %7468 = vmatprep.subr.bf16.mxu0 %v9316_v43  ;;  %v947_v43 = vld [vmem:[#allocation7 + $0x1450] sm:$0xff]  ;;  %v9283_v57 = vcombine.low %v955_v36, %v959_v46  ;;  %v9387_v19 = vcombine.low %v1059_v25, %v1063_v26 }
 0x436   :  { %v10256_v13 = vadd.f32 %v7174_v9, %v7134_v3  ;;  %7428 = vmatpush1.bf16.msra.mxu1 %v9187_v56  ;;  %v951_v55 = vld [vmem:[#allocation7 + $0x1470] sm:$0xff]  ;;  %v9148_v56 = vcombine.high %v819_v49, %v823_v51 }
 0x437   :  { %v7136_v27 = vpop.f32.mrf.mxu1  ;;  %v7176_v63 = vpop.f32.mrf.mxu0  ;;  %7429 = vmatprep.subr.bf16.mxu1 %v9180_v2  ;;  %v815_v60 = vld [vmem:[#allocation7 + $0x1030] sm:$0xff]  ;;  %v9276_v0 = vcombine.high %v947_v43, %v951_v55  ;;  %v9147_v2 = vcombine.low %v819_v49, %v823_v51  ;;  %v9275_v7 = vcombine.low %v947_v43, %v951_v55 }
 0x438   :  { %7469 = vmatpush1.bf16.msra.mxu0 %v9315_v54  ;;  %v939_v3 = vld [vmem:[#allocation7 + $0x1410] sm:$0xff]  ;;  %v9140_v50 = vcombine.high %v811_v58, %v815_v60 }
 0x439   :  { %v7177_v33 = vpop.f32.mrf.mxu0  ;;  %7470 = vmatprep.subr.bf16.mxu0 %v9308_v10  ;;  %v943_v54 = vld [vmem:[#allocation7 + $0x1430] sm:$0xff] }
 0x43a   :  { %7430 = vmatpush1.bf16.msra.mxu1 %v9179_v14  ;;  %v931_v8 = vld [vmem:[#allocation7 + $0x13d0] sm:$0xff]  ;;  %v9268_v10 = vcombine.high %v939_v3, %v943_v54  ;;  %v9139_v14 = vcombine.low %v811_v58, %v815_v60  ;;  %v9267_v63 = vcombine.low %v939_v3, %v943_v54 }
 0x43b   :  { %7431 = vmatprep.subr.bf16.mxu1 %v9172_v20  ;;  %v935_v9 = vld [vmem:[#allocation7 + $0x13f0] sm:$0xff] }
 0x43c   :  { %7471 = vmatpush1.bf16.msra.mxu0 %v9307_v29  ;;  %v9260_v27 = vcombine.high %v931_v8, %v935_v9  ;;  %v923_v20 = vld [vmem:[#allocation7 + $0x1390] sm:$0xff]  ;;  %v9259_v28 = vcombine.low %v931_v8, %v935_v9 }
 0x43d   :  { %7472 = vmatprep.subr.bf16.mxu0 %v9300_v35  ;;  %v927_v29 = vld [vmem:[#allocation7 + $0x13b0] sm:$0xff] }
 0x43e   :  { %7432 = vmatpush1.bf16.msra.mxu1 %v9171_v32  ;;  %v1051_v33 = vld [vmem:[#allocation7 + $0x1790] sm:$0xff]  ;;  %v9252_v32 = vcombine.high %v923_v20, %v927_v29  ;;  %v9251_v39 = vcombine.low %v923_v20, %v927_v29 }
 0x43f   :  { %7433 = vmatprep.subr.bf16.mxu1 %v9164_v31  ;;  %v1055_v35 = vld [vmem:[#allocation7 + $0x17b0] sm:$0xff] }
 0x440   :  { %7473 = vmatpush1.bf16.msra.mxu0 %v9299_v37  ;;  %v915_v22 = vld [vmem:[#allocation7 + $0x1350] sm:$0xff]  ;;  %v9380_v37 = vcombine.high %v1051_v33, %v1055_v35  ;;  %v9379_v36 = vcombine.low %v1051_v33, %v1055_v35 }
 0x441   :  { %7474 = vmatprep.subr.bf16.mxu0 %v9292_v41  ;;  %v919_v31 = vld [vmem:[#allocation7 + $0x1370] sm:$0xff] }
 0x442   :  { %7434 = vmatpush1.bf16.msra.mxu1 %v9163_v45  ;;  %v1043_v16 = vld [vmem:[#allocation7 + $0x1750] sm:$0xff]  ;;  %v9244_v45 = vcombine.high %v915_v22, %v919_v31  ;;  %v9243_v49 = vcombine.low %v915_v22, %v919_v31 }
 0x443   :  { %7435 = vmatprep.subr.bf16.mxu1 %v9156_v47  ;;  %v1047_v41 = vld [vmem:[#allocation7 + $0x1770] sm:$0xff] }
 0x444   :  { %7475 = vmatpush1.bf16.msra.mxu0 %v9291_v48  ;;  %v907_v46 = vld [vmem:[#allocation7 + $0x1310] sm:$0xff]  ;;  %v9372_v48 = vcombine.high %v1043_v16, %v1047_v41  ;;  %v9371_v43 = vcombine.low %v1043_v16, %v1047_v41 }
 0x445   :  { %7476 = vmatprep.subr.bf16.mxu0 %v9284_v52  ;;  %v911_v47 = vld [vmem:[#allocation7 + $0x1330] sm:$0xff] }
 0x446   :  { %7436 = vmatpush1.bf16.msra.mxu1 %v9155_v53  ;;  %v1035_v51 = vld [vmem:[#allocation7 + $0x1710] sm:$0xff]  ;;  %v9236_v53 = vcombine.high %v907_v46, %v911_v47  ;;  %v9235_v58 = vcombine.low %v907_v46, %v911_v47 }
 0x447   :  { %7437 = vmatprep.subr.bf16.mxu1 %v9148_v56  ;;  %v1039_v52 = vld [vmem:[#allocation7 + $0x1730] sm:$0xff] }
 0x448   :  { %7477 = vmatpush1.bf16.msra.mxu0 %v9283_v57  ;;  %v899_v55 = vld [vmem:[#allocation7 + $0x12d0] sm:$0xff]  ;;  %v9364_v57 = vcombine.high %v1035_v51, %v1039_v52  ;;  %v9363_v3 = vcombine.low %v1035_v51, %v1039_v52 }
 0x449   :  { %7478 = vmatprep.subr.bf16.mxu0 %v9276_v0  ;;  %v903_v56 = vld [vmem:[#allocation7 + $0x12f0] sm:$0xff] }
 0x44a   :  { %7438 = vmatpush1.bf16.msra.mxu1 %v9147_v2  ;;  %v1027_v60 = vld [vmem:[#allocation7 + $0x16d0] sm:$0xff]  ;;  %v9228_v2 = vcombine.high %v899_v55, %v903_v56  ;;  %v9227_v8 = vcombine.low %v899_v55, %v903_v56 }
 0x44b   :  { %7439 = vmatprep.subr.bf16.mxu1 %v9140_v50  ;;  %v1031_v0 = vld [vmem:[#allocation7 + $0x16f0] sm:$0xff] }
 0x44c   :  { %7479 = vmatpush1.bf16.msra.mxu0 %v9275_v7  ;;  %v891_v54 = vld [vmem:[#allocation7 + $0x1290] sm:$0xff]  ;;  %v9356_v7 = vcombine.high %v1027_v60, %v1031_v0  ;;  %v9355_v25 = vcombine.low %v1027_v60, %v1031_v0 }
 0x44d   :  { %7480 = vmatprep.subr.bf16.mxu0 %v9268_v10  ;;  %v895_v50 = vld [vmem:[#allocation7 + $0x12b0] sm:$0xff] }
 0x44e   :  { %7440 = vmatpush1.bf16.msra.mxu1 %v9139_v14  ;;  %v1019_v9 = vld [vmem:[#allocation7 + $0x1690] sm:$0xff]  ;;  %v9220_v14 = vcombine.high %v891_v54, %v895_v50  ;;  %v9219_v20 = vcombine.low %v891_v54, %v895_v50 }
 0x44f   :  { %7441 = vmatprep.subr.bf16.mxu1 %v9260_v27  ;;  %v1023_v10 = vld [vmem:[#allocation7 + $0x16b0] sm:$0xff] }
 0x450   :  { %7481 = vmatpush1.bf16.msra.mxu0 %v9267_v63  ;;  %v883_v26 = vld [vmem:[#allocation7 + $0x1250] sm:$0xff]  ;;  %v9348_v63 = vcombine.high %v1019_v9, %v1023_v10  ;;  %v9347_v33 = vcombine.low %v1019_v9, %v1023_v10 }
 0x451   :  { %7482 = vmatprep.subr.bf16.mxu0 %v9388_v30  ;;  %v887_v27 = vld [vmem:[#allocation7 + $0x1270] sm:$0xff] }
 0x452   :  { %7442 = vmatpush2.bf16.msra.mxu1 %v9259_v28  ;;  %v1011_v29 = vld [vmem:[#allocation7 + $0x1650] sm:$0xff]  ;;  %v9212_v28 = vcombine.high %v883_v26, %v887_v27  ;;  %v9211_v22 = vcombine.low %v883_v26, %v887_v27 }
 0x453   :  { %7443 = vmatprep.subr.bf16.mxu1 %v9252_v32  ;;  %v1015_v30 = vld [vmem:[#allocation7 + $0x1670] sm:$0xff] }
 0x454   :  { %7483 = vmatpush2.bf16.msra.mxu0 %v9387_v19  ;;  %v875_v35 = vld [vmem:[#allocation7 + $0x1210] sm:$0xff]  ;;  %v9340_v19 = vcombine.high %v1011_v29, %v1015_v30  ;;  %v9339_v16 = vcombine.low %v1011_v29, %v1015_v30 }
 0x455   :  { %7484 = vmatprep.subr.bf16.mxu0 %v9380_v37  ;;  %v879_v32 = vld [vmem:[#allocation7 + $0x1230] sm:$0xff] }
 0x456   :  { %7444 = vmatpush2.bf16.msra.mxu1 %v9251_v39  ;;  %v1003_v31 = vld [vmem:[#allocation7 + $0x1610] sm:$0xff]  ;;  %v9204_v39 = vcombine.high %v875_v35, %v879_v32  ;;  %v9203_v46 = vcombine.low %v875_v35, %v879_v32 }
 0x457   :  { %7445 = vmatprep.subr.bf16.mxu1 %v9244_v45  ;;  %v1007_v37 = vld [vmem:[#allocation7 + $0x1630] sm:$0xff] }
 0x458   :  { %7485 = vmatpush2.bf16.msra.mxu0 %v9379_v36  ;;  %v1123_v41 = vld [vmem:[#allocation7 + $0x19d0] sm:$0xff]  ;;  %v9332_v36 = vcombine.high %v1003_v31, %v1007_v37  ;;  %v9331_v51 = vcombine.low %v1003_v31, %v1007_v37 }
 0x459   :  { %7486 = vmatprep.subr.bf16.mxu0 %v9372_v48  ;;  %v1127_v45 = vld [vmem:[#allocation7 + $0x19f0] sm:$0xff] }
 0x45a   :  { %7446 = vmatpush2.bf16.msra.mxu1 %v9243_v49  ;;  %v1251_v47 = vld [vmem:[#allocation7 + $0x1dd0] sm:$0xff]  ;;  %v9452_v49 = vcombine.high %v1123_v41, %v1127_v45  ;;  %v9451_v55 = vcombine.low %v1123_v41, %v1127_v45 }
 0x45b   :  { %7447 = vmatprep.subr.bf16.mxu1 %v9236_v53  ;;  %v1255_v48 = vld [vmem:[#allocation7 + $0x1df0] sm:$0xff] }
 0x45c   :  { %7487 = vmatpush2.bf16.msra.mxu0 %v9371_v43  ;;  %v1115_v52 = vld [vmem:[#allocation7 + $0x1990] sm:$0xff]  ;;  %v9580_v43 = vcombine.high %v1251_v47, %v1255_v48  ;;  %v9579_v60 = vcombine.low %v1251_v47, %v1255_v48 }
 0x45d   :  { %7488 = vmatprep.subr.bf16.mxu0 %v9364_v57  ;;  %v1119_v53 = vld [vmem:[#allocation7 + $0x19b0] sm:$0xff] }
 0x45e   :  { %7448 = vmatpush2.bf16.msra.mxu1 %v9235_v58  ;;  %v1243_v56 = vld [vmem:[#allocation7 + $0x1d90] sm:$0xff]  ;;  %v9444_v58 = vcombine.high %v1115_v52, %v1119_v53 }
 0x45f   :  { %7449 = vmatprep.subr.bf16.mxu1 %v9228_v2  ;;  %v1247_v57 = vld [vmem:[#allocation7 + $0x1db0] sm:$0xff] }
 0x460   :  { %7489 = vmatpush2.bf16.msra.mxu0 %v9363_v3  ;;  %v1107_v0 = vld [vmem:[#allocation7 + $0x1950] sm:$0xff]  ;;  %v9572_v54 = vcombine.high %v1243_v56, %v1247_v57 }
 0x461   :  { %7490 = vmatprep.subr.bf16.mxu0 %v9356_v7  ;;  %v1111_v2 = vld [vmem:[#allocation7 + $0x1970] sm:$0xff]  ;;  %v9443_v7 = vcombine.low %v1115_v52, %v1119_v53 }
 0x462   :  { %7450 = vmatpush2.bf16.msra.mxu1 %v9227_v8  ;;  %v1235_v8 = vld [vmem:[#allocation7 + $0x1d50] sm:$0xff]  ;;  %v9435_v35 = vcombine.low %v1107_v0, %v1111_v2 }
 0x463   :  { %7451 = vmatprep.subr.bf16.mxu1 %v9220_v14  ;;  %v1239_v9 = vld [vmem:[#allocation7 + $0x1d70] sm:$0xff] }
 0x464   :  { %7491 = vmatpush2.bf16.msra.mxu0 %v9355_v25  ;;  %v9436_v25 = vcombine.high %v1107_v0, %v1111_v2  ;;  %v1227_v32 = vld [vmem:[#allocation7 + $0x1d10] sm:$0xff]  ;;  %v9563_v37 = vcombine.low %v1235_v8, %v1239_v9 }
 0x465   :  { %7492 = vmatprep.subr.bf16.mxu0 %v9348_v63  ;;  %v1099_v63 = vld [vmem:[#allocation7 + $0x1910] sm:$0xff] }
 0x466   :  { %7452 = vmatpush2.bf16.msra.mxu1 %v9219_v20  ;;  %v1103_v20 = vld [vmem:[#allocation7 + $0x1930] sm:$0xff] }
 0x467   :  { %7453 = vmatprep.subr.bf16.mxu1 %v9212_v28  ;;  %v9564_v28 = vcombine.high %v1235_v8, %v1239_v9  ;;  %v9428_v31 = vcombine.high %v1099_v63, %v1103_v20  ;;  %v1223_v47 = vld [vmem:[#allocation7 + $0x1cf0] sm:$0xff] }
 0x468   :  { %7493 = vmatpush2.bf16.msra.mxu0 %v9347_v33  ;;  %v1087_v52 = vld [vmem:[#allocation7 + $0x18b0] sm:$0xff] }
 0x469   :  { %7494 = vmatprep.subr.bf16.mxu0 %v9340_v19  ;;  %v1231_v19 = vld [vmem:[#allocation7 + $0x1d30] sm:$0xff] }
 0x46a   :  { %7454 = vmatpush2.bf16.msra.mxu1 %v9211_v22  ;;  %v9556_v45 = vcombine.high %v1227_v32, %v1231_v19  ;;  %v1079_v0 = vld [vmem:[#allocation7 + $0x1870] sm:$0xff] }
 0x46b   :  { %7455 = vmatprep.subr.bf16.mxu1 %v9204_v39  ;;  %v1091_v39 = vld [vmem:[#allocation7 + $0x18d0] sm:$0xff] }
 0x46c   :  { %7495 = vmatpush2.bf16.msra.mxu0 %v9339_v16  ;;  %v1095_v16 = vld [vmem:[#allocation7 + $0x18f0] sm:$0xff] }
 0x46d   :  { %7496 = vmatprep.subr.bf16.mxu0 %v9332_v36  ;;  %v9427_v36 = vcombine.low %v1099_v63, %v1103_v20  ;;  %v9420_v48 = vcombine.high %v1091_v39, %v1095_v16  ;;  %v1067_v9 = vld [vmem:[#allocation7 + $0x1810] sm:$0xff] }
 0x46e   :  { %7456 = vmatpush2.bf16.msra.mxu1 %v9203_v46  ;;  %v1219_v46 = vld [vmem:[#allocation7 + $0x1cd0] sm:$0xff] }
 0x46f   :  { %7507 = vmatprep.subr.bf16.mxu1 %v9452_v49  ;;  %v9555_v49 = vcombine.low %v1227_v32, %v1231_v19  ;;  %v9548_v53 = vcombine.high %v1219_v46, %v1223_v47  ;;  %v1315_v32 = vld [vmem:[#allocation7 + $0x1fd0] sm:$0xff] }
 0x470   :  { %7497 = vmatpush2.bf16.msra.mxu0 %v9331_v51  ;;  %v1083_v51 = vld [vmem:[#allocation7 + $0x1890] sm:$0xff] }
 0x471   :  { %v7213_v3 = vpop.f32.mrf.mxu1  ;;  %7458 = vmatmul.mubr.bf16.vlgmr.msra.gmra.mxu1 %v10139_v11  ;;  %7548 = vmatprep.subr.bf16.mxu0 %v9580_v43  ;;  %v9419_v43 = vcombine.low %v1091_v39, %v1095_v16  ;;  %v1319_v19 = vld [vmem:[#allocation7 + $0x1ff0] sm:$0xff] }
 0x472   :  { %v7214_v50 = vadd.f32 %v7213_v3, %v10253_v5  ;;  %7508 = vmatpush1.bf16.msra.mxu1 %v9451_v55  ;;  %7539 = vmatprep.mubr.bf16.mxu1 %v10157_v24  ;;  %v9571_v5 = vcombine.low %v1243_v56, %v1247_v57  ;;  %v1211_v55 = vld [vmem:[#allocation7 + $0x1c90] sm:$0xff]  ;;  %v9412_v57 = vcombine.high %v1083_v51, %v1087_v52 }
 0x473   :  { %v7215_v10 = vpop.f32.mrf.mxu1  ;;  %v7254_v14 = vpop.f32.mrf.mxu0  ;;  %7499 = vmatmul.mubr.bf16.vlgmr.msra.gmra.mxu0 %v10175_v18  ;;  %7509 = vmatprep.subr.bf16.mxu1 %v9444_v58  ;;  %v1215_v56 = vld [vmem:[#allocation7 + $0x1cb0] sm:$0xff]  ;;  %v9547_v58 = vcombine.low %v1219_v46, %v1223_v47  ;;  %v9411_v3 = vcombine.low %v1083_v51, %v1087_v52  ;;  %v9644_v39 = vcombine.high %v1315_v32, %v1319_v19 }
 0x474   :  { %v7216_v26 = vadd.f32 %v7215_v10, %v10256_v13  ;;  %v10263_v27 = vadd.f32 %v7254_v14, %v7214_v50  ;;  %7549 = vmatpush1.bf16.msra.mxu0 %v9579_v60  ;;  %7580 = vmatprep.mubr.bf16.mxu0 %v10180_v23  ;;  %v1075_v60 = vld [vmem:[#allocation7 + $0x1850] sm:$0xff]  ;;  %v9540_v2 = vcombine.high %v1211_v55, %v1215_v56 }
 0x475   :  { %v7217_v29 = vpop.f32.mrf.mxu1  ;;  %v7256_v30 = vpop.f32.mrf.mxu0  ;;  %7550 = vmatprep.subr.bf16.mxu0 %v9572_v54  ;;  %v1203_v54 = vld [vmem:[#allocation7 + $0x1c50] sm:$0xff]  ;;  %v9539_v8 = vcombine.low %v1211_v55, %v1215_v56  ;;  %v9643_v46 = vcombine.low %v1315_v32, %v1319_v19 }
 0x476   :  { %v10266_v33 = vadd.f32 %v7256_v30, %v7216_v26  ;;  %7510 = vmatpush1.bf16.msra.mxu1 %v9443_v7  ;;  %v1207_v50 = vld [vmem:[#allocation7 + $0x1c70] sm:$0xff]  ;;  %v9404_v7 = vcombine.high %v1075_v60, %v1079_v0 }
 0x477   :  { %v7218_v22 = vpop.f32.mrf.mxu1  ;;  %v7258_v13 = vpop.f32.mrf.mxu0  ;;  %7511 = vmatprep.subr.bf16.mxu1 %v9436_v25  ;;  %v1071_v10 = vld [vmem:[#allocation7 + $0x1830] sm:$0xff]  ;;  %v9532_v14 = vcombine.high %v1203_v54, %v1207_v50  ;;  %v9403_v25 = vcombine.low %v1075_v60, %v1079_v0  ;;  %v9531_v20 = vcombine.low %v1203_v54, %v1207_v50 }
 0x478   :  { %7551 = vmatpush1.bf16.msra.mxu0 %v9571_v5  ;;  %v1195_v26 = vld [vmem:[#allocation7 + $0x1c10] sm:$0xff]  ;;  %v9396_v63 = vcombine.high %v1067_v9, %v1071_v10 }
 0x479   :  { %v7259_v41 = vpop.f32.mrf.mxu0  ;;  %7552 = vmatprep.subr.bf16.mxu0 %v9564_v28  ;;  %v1199_v5 = vld [vmem:[#allocation7 + $0x1c30] sm:$0xff] }
 0x47a   :  { %7512 = vmatpush1.bf16.msra.mxu1 %v9435_v35  ;;  %v1187_v29 = vld [vmem:[#allocation7 + $0x1bd0] sm:$0xff]  ;;  %v9524_v28 = vcombine.high %v1195_v26, %v1199_v5  ;;  %v9395_v35 = vcombine.low %v1067_v9, %v1071_v10  ;;  %v9523_v13 = vcombine.low %v1195_v26, %v1199_v5 }
 0x47b   :  { %7513 = vmatprep.subr.bf16.mxu1 %v9428_v31  ;;  %v1191_v30 = vld [vmem:[#allocation7 + $0x1bf0] sm:$0xff] }
 0x47c   :  { %7553 = vmatpush1.bf16.msra.mxu0 %v9563_v37  ;;  %v9516_v22 = vcombine.high %v1187_v29, %v1191_v30  ;;  %v1179_v31 = vld [vmem:[#allocation7 + $0x1b90] sm:$0xff]  ;;  %v9515_v16 = vcombine.low %v1187_v29, %v1191_v30 }
 0x47d   :  { %7554 = vmatprep.subr.bf16.mxu0 %v9556_v45  ;;  %v1183_v37 = vld [vmem:[#allocation7 + $0x1bb0] sm:$0xff] }
 0x47e   :  { %7514 = vmatpush1.bf16.msra.mxu1 %v9427_v36  ;;  %v1307_v41 = vld [vmem:[#allocation7 + $0x1f90] sm:$0xff]  ;;  %v9508_v36 = vcombine.high %v1179_v31, %v1183_v37  ;;  %v9507_v51 = vcombine.low %v1179_v31, %v1183_v37 }
 0x47f   :  { %7515 = vmatprep.subr.bf16.mxu1 %v9420_v48  ;;  %v1311_v45 = vld [vmem:[#allocation7 + $0x1fb0] sm:$0xff] }
 0x480   :  { %7555 = vmatpush1.bf16.msra.mxu0 %v9555_v49  ;;  %v1171_v47 = vld [vmem:[#allocation7 + $0x1b50] sm:$0xff]  ;;  %v9636_v49 = vcombine.high %v1307_v41, %v1311_v45  ;;  %v9635_v55 = vcombine.low %v1307_v41, %v1311_v45 }
 0x481   :  { %7556 = vmatprep.subr.bf16.mxu0 %v9548_v53  ;;  %v1175_v48 = vld [vmem:[#allocation7 + $0x1b70] sm:$0xff] }
 0x482   :  { %7516 = vmatpush1.bf16.msra.mxu1 %v9419_v43  ;;  %v1299_v52 = vld [vmem:[#allocation7 + $0x1f50] sm:$0xff]  ;;  %v9500_v43 = vcombine.high %v1171_v47, %v1175_v48  ;;  %v9499_v60 = vcombine.low %v1171_v47, %v1175_v48 }
 0x483   :  { %7517 = vmatprep.subr.bf16.mxu1 %v9412_v57  ;;  %v1303_v53 = vld [vmem:[#allocation7 + $0x1f70] sm:$0xff] }
 0x484   :  { %7557 = vmatpush1.bf16.msra.mxu0 %v9547_v58  ;;  %v1163_v56 = vld [vmem:[#allocation7 + $0x1b10] sm:$0xff]  ;;  %v9628_v58 = vcombine.high %v1299_v52, %v1303_v53  ;;  %v9627_v54 = vcombine.low %v1299_v52, %v1303_v53  ;;  %v356_v53 = vld [vmem:[#allocation7 + $0x1d8] sm:$0xff] }
 0x485   :  { %7558 = vmatprep.subr.bf16.mxu0 %v9540_v2  ;;  %v1167_v57 = vld [vmem:[#allocation7 + $0x1b30] sm:$0xff] }
 0x486   :  { %7518 = vmatpush1.bf16.msra.mxu1 %v9411_v3  ;;  %v1291_v0 = vld [vmem:[#allocation7 + $0x1f10] sm:$0xff]  ;;  %v9492_v3 = vcombine.high %v1163_v56, %v1167_v57  ;;  %v9491_v9 = vcombine.low %v1163_v56, %v1167_v57  ;;  %v1341_v57 = vsub.s32 4, %v10123_v38 }
 0x487   :  { %7519 = vmatprep.subr.bf16.mxu1 %v9404_v7  ;;  %v1295_v2 = vld [vmem:[#allocation7 + $0x1f30] sm:$0xff] }
 0x488   :  { %7559 = vmatpush1.bf16.msra.mxu0 %v9539_v8  ;;  %v1155_v50 = vld [vmem:[#allocation7 + $0x1ad0] sm:$0xff]  ;;  %v9620_v8 = vcombine.high %v1291_v0, %v1295_v2  ;;  %v9619_v26 = vcombine.low %v1291_v0, %v1295_v2 }
 0x489   :  { %7560 = vmatprep.subr.bf16.mxu0 %v9532_v14  ;;  %v1159_v7 = vld [vmem:[#allocation7 + $0x1af0] sm:$0xff] }
 0x48a   :  { %7520 = vmatpush1.bf16.msra.mxu1 %v9403_v25  ;;  %v1283_v10 = vld [vmem:[#allocation7 + $0x1ed0] sm:$0xff]  ;;  %v9484_v25 = vcombine.high %v1155_v50, %v1159_v7  ;;  %v9483_v29 = vcombine.low %v1155_v50, %v1159_v7  ;;  %v352_v50 = vld [vmem:[#allocation7 + $0x1b8] sm:$0xff] }
 0x48b   :  { %7521 = vmatprep.subr.bf16.mxu1 %v9396_v63  ;;  %v1287_v14 = vld [vmem:[#allocation7 + $0x1ef0] sm:$0xff] }
 0x48c   :  { %7561 = vmatpush1.bf16.msra.mxu0 %v9531_v20  ;;  %v1147_v5 = vld [vmem:[#allocation7 + $0x1a90] sm:$0xff]  ;;  %v9612_v20 = vcombine.high %v1283_v10, %v1287_v14  ;;  %v9611_v32 = vcombine.low %v1283_v10, %v1287_v14  ;;  %v476_v14 = vld [vmem:[#allocation7 + $0x598] sm:$0xff] }
 0x48d   :  { %7562 = vmatprep.subr.bf16.mxu0 %v9524_v28  ;;  %v1151_v63 = vld [vmem:[#allocation7 + $0x1ab0] sm:$0xff] }
 0x48e   :  { %7522 = vmatpush1.bf16.msra.mxu1 %v9395_v35  ;;  %v1275_v30 = vld [vmem:[#allocation7 + $0x1e90] sm:$0xff]  ;;  %v9476_v35 = vcombine.high %v1147_v5, %v1151_v63  ;;  %v9475_v31 = vcombine.low %v1147_v5, %v1151_v63 }
 0x48f   :  { %7523 = vmatprep.subr.bf16.mxu1 %v9516_v22  ;;  %v1279_v28 = vld [vmem:[#allocation7 + $0x1eb0] sm:$0xff] }
 0x490   :  { %7563 = vmatpush1.bf16.msra.mxu0 %v9523_v13  ;;  %v1139_v19 = vld [vmem:[#allocation7 + $0x1a50] sm:$0xff]  ;;  %v9604_v13 = vcombine.high %v1275_v30, %v1279_v28  ;;  %v9603_v41 = vcombine.low %v1275_v30, %v1279_v28 }
 0x491   :  { %7564 = vmatprep.subr.bf16.mxu0 %v9644_v39  ;;  %v1143_v22 = vld [vmem:[#allocation7 + $0x1a70] sm:$0xff] }
 0x492   :  { %7524 = vmatpush2.bf16.msra.mxu1 %v9515_v16  ;;  %v1267_v37 = vld [vmem:[#allocation7 + $0x1e50] sm:$0xff]  ;;  %v9468_v16 = vcombine.high %v1139_v19, %v1143_v22  ;;  %v9467_v47 = vcombine.low %v1139_v19, %v1143_v22  ;;  %v468_v19 = vld [vmem:[#allocation7 + $0x558] sm:$0xff] }
 0x493   :  { %7525 = vmatprep.subr.bf16.mxu1 %v9508_v36  ;;  %v1271_v39 = vld [vmem:[#allocation7 + $0x1e70] sm:$0xff]  ;;  %v472_v22 = vld [vmem:[#allocation7 + $0x578] sm:$0xff] }
 0x494   :  { %7565 = vmatpush2.bf16.msra.mxu0 %v9643_v46  ;;  %v1131_v45 = vld [vmem:[#allocation7 + $0x1a10] sm:$0xff]  ;;  %v9596_v46 = vcombine.high %v1267_v37, %v1271_v39  ;;  %v9595_v52 = vcombine.low %v1267_v37, %v1271_v39 }
 0x495   :  { %7566 = vmatprep.subr.bf16.mxu0 %v9636_v49  ;;  %v1135_v36 = vld [vmem:[#allocation7 + $0x1a30] sm:$0xff] }
 0x496   :  { %7526 = vmatpush2.bf16.msra.mxu1 %v9507_v51  ;;  %v1259_v48 = vld [vmem:[#allocation7 + $0x1e10] sm:$0xff]  ;;  %v9460_v51 = vcombine.high %v1131_v45, %v1135_v36  ;;  %v9459_v56 = vcombine.low %v1131_v45, %v1135_v36  ;;  %v332_v45 = vld [vmem:[#allocation7 + $0x118] sm:$0xff] }
 0x497   :  { %7527 = vmatprep.subr.bf16.mxu1 %v9500_v43  ;;  %v1263_v49 = vld [vmem:[#allocation7 + $0x1e30] sm:$0xff]  ;;  %v360_v43 = vld [vmem:[#allocation7 + $0x1f8] sm:$0xff] }
 0x498   :  { %7567 = vmatpush2.bf16.msra.mxu0 %v9635_v55  ;;  %v9588_v55 = vcombine.high %v1259_v48, %v1263_v49  ;;  %v8686_v0 = vcombine.high %v356_v53, %v360_v43  ;;  %v9587_v2 = vcombine.low %v1259_v48, %v1263_v49  ;;  %v8685_v10 = vcombine.low %v356_v53, %v360_v43  ;;  %v336_v36 = vld [vmem:[#allocation7 + $0x138] sm:$0xff] }
 0x499   :  { %7568 = vmatprep.subr.bf16.mxu0 %v9628_v58  ;;  %v484_v58 = vld [vmem:[#allocation7 + $0x5d8] sm:$0xff] }
 0x49a   :  { %7528 = vmatpush2.bf16.msra.mxu1 %v9499_v60  ;;  %v488_v60 = vld [vmem:[#allocation7 + $0x5f8] sm:$0xff] }
 0x49b   :  { %7529 = vmatprep.subr.bf16.mxu1 %v9492_v3  ;;  %v1345_v3 = vsub.s32 5, %v10123_v38  ;;  %v8814_v7 = vcombine.high %v484_v58, %v488_v60  ;;  %v8813_v63 = vcombine.low %v484_v58, %v488_v60 }
 0x49c   :  { %7569 = vmatpush2.bf16.msra.mxu0 %v9627_v54  ;;  %v348_v54 = vld [vmem:[#allocation7 + $0x198] sm:$0xff] }
 0x49d   :  { %7570 = vmatprep.subr.bf16.mxu0 %v9620_v8  ;;  %v9895_v8 = vld [vmem:[#allocation9] sm:$0xff] }
 0x49e   :  { %7530 = vmatpush2.bf16.msra.mxu1 %v9491_v9  ;;  %v1342_v9 = vrot.slane %v9895_v8, %v1341_v57  ;;  %v1346_v5 = vrot.slane %v9895_v8, %v1345_v3  ;;  %v328_v57 = vld [vmem:[#allocation7 + $0xf8] sm:$0xff] }
 0x49f   :  { %7531 = vmatprep.subr.bf16.mxu1 %v9484_v25  ;;  %v480_v25 = vld [vmem:[#allocation7 + $0x5b8] sm:$0xff] }
 0x4a0   :  { %7571 = vmatpush2.bf16.msra.mxu0 %v9619_v26  ;;  %v8678_v26 = vcombine.high %v348_v54, %v352_v50  ;;  %v8806_v28 = vcombine.high %v476_v14, %v480_v25  ;;  %v456_v3 = vld [vmem:[#allocation7 + $0x4f8] sm:$0xff] }
 0x4a1   :  { %7572 = vmatprep.subr.bf16.mxu0 %v9612_v20  ;;  %v340_v20 = vld [vmem:[#allocation7 + $0x158] sm:$0xff] }
 0x4a2   :  { %7532 = vmatpush2.bf16.msra.mxu1 %v9483_v29  ;;  %v344_v29 = vld [vmem:[#allocation7 + $0x178] sm:$0xff] }
 0x4a3   :  { %7533 = vmatprep.subr.bf16.mxu1 %v9476_v35  ;;  %v8670_v37 = vcombine.high %v340_v20, %v344_v29  ;;  %v8669_v49 = vcombine.low %v340_v20, %v344_v29  ;;  %v320_v8 = vld [vmem:[#allocation7 + $0xb8] sm:$0xff] }
 0x4a4   :  { %7573 = vmatpush2.bf16.msra.mxu0 %v9611_v32  ;;  %v8677_v32 = vcombine.low %v348_v54, %v352_v50  ;;  %v312_v20 = vld [vmem:[#allocation7 + $0x78] sm:$0xff] }
 0x4a5   :  { %7574 = vmatprep.subr.bf16.mxu0 %v9604_v13 }
 0x4a6   :  { %7534 = vmatpush2.bf16.msra.mxu1 %v9475_v31 }
 0x4a7   :  { %7535 = vmatprep.subr.bf16.mxu1 %v9468_v16 }
 0x4a8   :  { %7575 = vmatpush2.bf16.msra.mxu0 %v9603_v41  ;;  %v8805_v41 = vcombine.low %v476_v14, %v480_v25  ;;  %v444_v14 = vld [vmem:[#allocation7 + $0x498] sm:$0xff] }
 0x4a9   :  { %7576 = vmatprep.subr.bf16.mxu0 %v9596_v46  ;;  %v448_v25 = vld [vmem:[#allocation7 + $0x4b8] sm:$0xff] }
 0x4aa   :  { %7536 = vmatpush2.bf16.msra.mxu1 %v9467_v47  ;;  %v8798_v47 = vcombine.high %v468_v19, %v472_v22  ;;  %v8774_v29 = vcombine.high %v444_v14, %v448_v25 }
 0x4ab   :  { %7537 = vmatprep.subr.bf16.mxu1 %v9460_v51  ;;  %v460_v51 = vld [vmem:[#allocation7 + $0x518] sm:$0xff] }
 0x4ac   :  { %7577 = vmatpush2.bf16.msra.mxu0 %v9595_v52  ;;  %v464_v52 = vld [vmem:[#allocation7 + $0x538] sm:$0xff] }
 0x4ad   :  { %7578 = vmatprep.subr.bf16.mxu0 %v9588_v55  ;;  %v8662_v55 = vcombine.high %v332_v45, %v336_v36  ;;  %v8790_v60 = vcombine.high %v460_v51, %v464_v52  ;;  %v8789_v50 = vcombine.low %v460_v51, %v464_v52  ;;  %v548_v51 = vld [vmem:[#allocation7 + $0x7d8] sm:$0xff] }
 0x4ae   :  { %7538 = vmatpush2.bf16.msra.mxu1 %v9459_v56  ;;  %v8797_v56 = vcombine.low %v468_v19, %v472_v22  ;;  %v8773_v19 = vcombine.low %v444_v14, %v448_v25  ;;  %v300_v22 = vld [vmem:[#allocation7 + $0x18] sm:$0xff] }
 0x4af   :  { %7589 = vmatprep.subr.bf16.mxu1 %v8686_v0  ;;  %v8661_v0 = vcombine.low %v332_v45, %v336_v36  ;;  %v552_v52 = vld [vmem:[#allocation7 + $0x7f8] sm:$0xff] }
 0x4b0   :  { %7579 = vmatpush2.bf16.msra.mxu0 %v9587_v2  ;;  %v452_v2 = vld [vmem:[#allocation7 + $0x4d8] sm:$0xff] }
 0x4b1   :  { %v7295_v30 = vpop.f32.mrf.mxu1  ;;  %7540 = vmatmul.mubr.bf16.vlgmr.msra.gmra.mxu1 %v10146_v15  ;;  %7630 = vmatprep.subr.bf16.mxu0 %v8814_v7  ;;  %v316_v7 = vld [vmem:[#allocation7 + $0x98] sm:$0xff] }
 0x4b2   :  { %v7296_v35 = vadd.f32 %v7295_v30, %v1342_v9  ;;  %7590 = vmatpush1.bf16.msra.mxu1 %v8685_v10  ;;  %7621 = vmatprep.mubr.bf16.mxu1 %v10130_v62  ;;  %v8782_v9 = vcombine.high %v452_v2, %v456_v3  ;;  %v8645_v30 = vcombine.low %v316_v7, %v320_v8  ;;  %v396_v25 = vld [vmem:[#allocation7 + $0x318] sm:$0xff] }
 0x4b3   :  { %v7297_v13 = vpop.f32.mrf.mxu1  ;;  %v7336_v31 = vpop.f32.mrf.mxu0  ;;  %7581 = vmatmul.mubr.bf16.vlgmr.msra.gmra.mxu0 %v10189_v1  ;;  %7591 = vmatprep.subr.bf16.mxu1 %v8678_v26  ;;  %v8646_v26 = vcombine.high %v316_v7, %v320_v8  ;;  %v532_v8 = vld [vmem:[#allocation7 + $0x758] sm:$0xff] }
 0x4b4   :  { %v7298_v39 = vadd.f32 %v7297_v13, %v1346_v5  ;;  %v10273_v16 = vadd.f32 %v7336_v31, %v7296_v35  ;;  %7631 = vmatpush1.bf16.msra.mxu0 %v8813_v63  ;;  %7662 = vmatprep.mubr.bf16.mxu0 %v10137_v6  ;;  %v324_v6 = vld [vmem:[#allocation7 + $0xd8] sm:$0xff]  ;;  %v8781_v5 = vcombine.low %v452_v2, %v456_v3 }
 0x4b5   :  { %v7299_v46 = vpop.f32.mrf.mxu1  ;;  %v7338_v62 = vpop.f32.mrf.mxu0  ;;  %7632 = vmatprep.subr.bf16.mxu0 %v8806_v28  ;;  %v8654_v54 = vcombine.high %v324_v6, %v328_v57  ;;  %v8653_v10 = vcombine.low %v324_v6, %v328_v57  ;;  %v308_v63 = vld [vmem:[#allocation7 + $0x58] sm:$0xff]  ;;  %v8878_v6 = vcombine.high %v548_v51, %v552_v52  ;;  %v8877_v2 = vcombine.low %v548_v51, %v552_v52 }
 0x4b6   :  { %v10276_v48 = vadd.f32 %v7338_v62, %v7298_v39  ;;  %7592 = vmatpush1.bf16.msra.mxu1 %v8677_v32  ;;  %v436_v28 = vld [vmem:[#allocation7 + $0x458] sm:$0xff]  ;;  %v8638_v32 = vcombine.high %v308_v63, %v312_v20 }
 0x4b7   :  { %v7300_v53 = vpop.f32.mrf.mxu1  ;;  %v7340_v43 = vpop.f32.mrf.mxu0  ;;  %7593 = vmatprep.subr.bf16.mxu1 %v8670_v37  ;;  %v440_v35 = vld [vmem:[#allocation7 + $0x478] sm:$0xff]  ;;  %v8637_v37 = vcombine.low %v308_v63, %v312_v20 }
 0x4b8   :  { %7633 = vmatpush1.bf16.msra.mxu0 %v8805_v41  ;;  %v304_v13 = vld [vmem:[#allocation7 + $0x38] sm:$0xff]  ;;  %v8766_v31 = vcombine.high %v436_v28, %v440_v35  ;;  %v8765_v36 = vcombine.low %v436_v28, %v440_v35 }
 0x4b9   :  { %v7341_v58 = vpop.f32.mrf.mxu0  ;;  %7634 = vmatprep.subr.bf16.mxu0 %v8798_v47  ;;  %v428_v39 = vld [vmem:[#allocation7 + $0x418] sm:$0xff]  ;;  %v8630_v45 = vcombine.high %v300_v22, %v304_v13 }
 0x4ba   :  { %7594 = vmatpush1.bf16.msra.mxu1 %v8669_v49  ;;  %v432_v41 = vld [vmem:[#allocation7 + $0x438] sm:$0xff]  ;;  %v8629_v49 = vcombine.low %v300_v22, %v304_v13 }
 0x4bb   :  { %7595 = vmatprep.subr.bf16.mxu1 %v8662_v55  ;;  %v420_v46 = vld [vmem:[#allocation7 + $0x3d8] sm:$0xff]  ;;  %v8758_v47 = vcombine.high %v428_v39, %v432_v41  ;;  %v8757_v43 = vcombine.low %v428_v39, %v432_v41 }
 0x4bc   :  { %7635 = vmatpush1.bf16.msra.mxu0 %v8797_v56  ;;  %v424_v62 = vld [vmem:[#allocation7 + $0x3f8] sm:$0xff] }
 0x4bd   :  { %7636 = vmatprep.subr.bf16.mxu0 %v8790_v60  ;;  %v8750_v53 = vcombine.high %v420_v46, %v424_v62  ;;  %v412_v55 = vld [vmem:[#allocation7 + $0x398] sm:$0xff]  ;;  %v8749_v57 = vcombine.low %v420_v46, %v424_v62 }
 0x4be   :  { %7596 = vmatpush1.bf16.msra.mxu1 %v8661_v0  ;;  %v416_v56 = vld [vmem:[#allocation7 + $0x3b8] sm:$0xff] }
 0x4bf   :  { %7597 = vmatprep.subr.bf16.mxu1 %v8654_v54  ;;  %v540_v58 = vld [vmem:[#allocation7 + $0x798] sm:$0xff]  ;;  %v8742_v0 = vcombine.high %v412_v55, %v416_v56  ;;  %v8741_v7 = vcombine.low %v412_v55, %v416_v56 }
 0x4c0   :  { %7637 = vmatpush1.bf16.msra.mxu0 %v8789_v50  ;;  %v544_v60 = vld [vmem:[#allocation7 + $0x7b8] sm:$0xff] }
 0x4c1   :  { %7638 = vmatprep.subr.bf16.mxu0 %v8782_v9  ;;  %v404_v3 = vld [vmem:[#allocation7 + $0x358] sm:$0xff]  ;;  %v8870_v50 = vcombine.high %v540_v58, %v544_v60  ;;  %v8869_v14 = vcombine.low %v540_v58, %v544_v60 }
 0x4c2   :  { %7598 = vmatpush1.bf16.msra.mxu1 %v8653_v10  ;;  %v408_v54 = vld [vmem:[#allocation7 + $0x378] sm:$0xff] }
 0x4c3   :  { %7599 = vmatprep.subr.bf16.mxu1 %v8646_v26  ;;  %v536_v9 = vld [vmem:[#allocation7 + $0x778] sm:$0xff]  ;;  %v8734_v10 = vcombine.high %v404_v3, %v408_v54  ;;  %v8733_v63 = vcombine.low %v404_v3, %v408_v54 }
 0x4c4   :  { %7639 = vmatpush1.bf16.msra.mxu0 %v8781_v5  ;;  %v400_v26 = vld [vmem:[#allocation7 + $0x338] sm:$0xff]  ;;  %v8862_v5 = vcombine.high %v532_v8, %v536_v9  ;;  %v8861_v28 = vcombine.low %v532_v8, %v536_v9 }
 0x4c5   :  { %7640 = vmatprep.subr.bf16.mxu0 %v8774_v29  ;;  %v524_v20 = vld [vmem:[#allocation7 + $0x718] sm:$0xff]  ;;  %v8725_v22 = vcombine.low %v396_v25, %v400_v26 }
 0x4c6   :  { %7600 = vmatpush1.bf16.msra.mxu1 %v8645_v30  ;;  %v528_v29 = vld [vmem:[#allocation7 + $0x738] sm:$0xff]  ;;  %v8726_v30 = vcombine.high %v396_v25, %v400_v26 }
 0x4c7   :  { %7601 = vmatprep.subr.bf16.mxu1 %v8638_v32  ;;  %v388_v35 = vld [vmem:[#allocation7 + $0x2d8] sm:$0xff]  ;;  %v8853_v39 = vcombine.low %v524_v20, %v528_v29 }
 0x4c8   :  { %7641 = vmatpush1.bf16.msra.mxu0 %v8773_v19  ;;  %v392_v32 = vld [vmem:[#allocation7 + $0x2f8] sm:$0xff]  ;;  %v8854_v19 = vcombine.high %v524_v20, %v528_v29 }
 0x4c9   :  { %7642 = vmatprep.subr.bf16.mxu0 %v8766_v31  ;;  %v516_v13 = vld [vmem:[#allocation7 + $0x6d8] sm:$0xff]  ;;  %v8717_v46 = vcombine.low %v388_v35, %v392_v32 }
 0x4ca   :  { %7602 = vmatpush1.bf16.msra.mxu1 %v8637_v37  ;;  %v520_v31 = vld [vmem:[#allocation7 + $0x6f8] sm:$0xff]  ;;  %v8718_v37 = vcombine.high %v388_v35, %v392_v32 }
 0x4cb   :  { %7603 = vmatprep.subr.bf16.mxu1 %v8630_v45  ;;  %v380_v41 = vld [vmem:[#allocation7 + $0x298] sm:$0xff]  ;;  %v8845_v51 = vcombine.low %v516_v13, %v520_v31 }
 0x4cc   :  { %7643 = vmatpush1.bf16.msra.mxu0 %v8765_v36  ;;  %v384_v45 = vld [vmem:[#allocation7 + $0x2b8] sm:$0xff]  ;;  %v8846_v36 = vcombine.high %v516_v13, %v520_v31 }
 0x4cd   :  { %7644 = vmatprep.subr.bf16.mxu0 %v8758_v47  ;;  %v508_v62 = vld [vmem:[#allocation7 + $0x698] sm:$0xff]  ;;  %v8709_v55 = vcombine.low %v380_v41, %v384_v45 }
 0x4ce   :  { %7604 = vmatpush1.bf16.msra.mxu1 %v8629_v49  ;;  %v512_v47 = vld [vmem:[#allocation7 + $0x6b8] sm:$0xff]  ;;  %v8710_v49 = vcombine.high %v380_v41, %v384_v45 }
 0x4cf   :  { %7605 = vmatprep.subr.bf16.mxu1 %v8750_v53  ;;  %v372_v52 = vld [vmem:[#allocation7 + $0x258] sm:$0xff]  ;;  %v8837_v58 = vcombine.low %v508_v62, %v512_v47 }
 0x4d0   :  { %7645 = vmatpush1.bf16.msra.mxu0 %v8757_v43  ;;  %v376_v53 = vld [vmem:[#allocation7 + $0x278] sm:$0xff]  ;;  %v8838_v43 = vcombine.high %v508_v62, %v512_v47 }
 0x4d1   :  { %7646 = vmatprep.subr.bf16.mxu0 %v8878_v6  ;;  %v500_v56 = vld [vmem:[#allocation7 + $0x658] sm:$0xff]  ;;  %v8701_v3 = vcombine.low %v372_v52, %v376_v53 }
 0x4d2   :  { %7606 = vmatpush2.bf16.msra.mxu1 %v8749_v57  ;;  %v504_v6 = vld [vmem:[#allocation7 + $0x678] sm:$0xff]  ;;  %v8702_v57 = vcombine.high %v372_v52, %v376_v53 }
 0x4d3   :  { %7607 = vmatprep.subr.bf16.mxu1 %v8742_v0  ;;  %v364_v60 = vld [vmem:[#allocation7 + $0x218] sm:$0xff]  ;;  %v8829_v8 = vcombine.low %v500_v56, %v504_v6 }
 0x4d4   :  { %7647 = vmatpush2.bf16.msra.mxu0 %v8877_v2  ;;  %v368_v0 = vld [vmem:[#allocation7 + $0x238] sm:$0xff]  ;;  %v8830_v2 = vcombine.high %v500_v56, %v504_v6 }
 0x4d5   :  { %7648 = vmatprep.subr.bf16.mxu0 %v8870_v50  ;;  %v492_v54 = vld [vmem:[#allocation7 + $0x618] sm:$0xff]  ;;  %v8693_v25 = vcombine.low %v364_v60, %v368_v0 }
 0x4d6   :  { %7608 = vmatpush2.bf16.msra.mxu1 %v8741_v7  ;;  %v496_v50 = vld [vmem:[#allocation7 + $0x638] sm:$0xff]  ;;  %v8694_v7 = vcombine.high %v364_v60, %v368_v0 }
 0x4d7   :  { %7609 = vmatprep.subr.bf16.mxu1 %v8734_v10  ;;  %v612_v9 = vld [vmem:[#allocation7 + $0x9d8] sm:$0xff]  ;;  %v8821_v20 = vcombine.low %v492_v54, %v496_v50 }
 0x4d8   :  { %7649 = vmatpush2.bf16.msra.mxu0 %v8869_v14  ;;  %v616_v10 = vld [vmem:[#allocation7 + $0x9f8] sm:$0xff]  ;;  %v8822_v14 = vcombine.high %v492_v54, %v496_v50 }
 0x4d9   :  { %7650 = vmatprep.subr.bf16.mxu0 %v8862_v5  ;;  %v740_v26 = vld [vmem:[#allocation7 + $0xdd8] sm:$0xff]  ;;  %v8941_v35 = vcombine.low %v612_v9, %v616_v10 }
 0x4da   :  { %7610 = vmatpush2.bf16.msra.mxu1 %v8733_v63  ;;  %v744_v5 = vld [vmem:[#allocation7 + $0xdf8] sm:$0xff]  ;;  %v8942_v63 = vcombine.high %v612_v9, %v616_v10 }
 0x4db   :  { %7611 = vmatprep.subr.bf16.mxu1 %v8726_v30  ;;  %v604_v29 = vld [vmem:[#allocation7 + $0x998] sm:$0xff]  ;;  %v9069_v13 = vcombine.low %v740_v26, %v744_v5 }
 0x4dc   :  { %7651 = vmatpush2.bf16.msra.mxu0 %v8861_v28  ;;  %v608_v30 = vld [vmem:[#allocation7 + $0x9b8] sm:$0xff]  ;;  %v9070_v28 = vcombine.high %v740_v26, %v744_v5 }
 0x4dd   :  { %7652 = vmatprep.subr.bf16.mxu0 %v8854_v19  ;;  %v732_v32 = vld [vmem:[#allocation7 + $0xd98] sm:$0xff] }
 0x4de   :  { %7612 = vmatpush2.bf16.msra.mxu1 %v8725_v22  ;;  %v736_v19 = vld [vmem:[#allocation7 + $0xdb8] sm:$0xff]  ;;  %v8934_v22 = vcombine.high %v604_v29, %v608_v30 }
 0x4df   :  { %7613 = vmatprep.subr.bf16.mxu1 %v8718_v37  ;;  %v596_v31 = vld [vmem:[#allocation7 + $0x958] sm:$0xff]  ;;  %v9062_v41 = vcombine.high %v732_v32, %v736_v19 }
 0x4e0   :  { %7653 = vmatpush2.bf16.msra.mxu0 %v8853_v39  ;;  %v600_v37 = vld [vmem:[#allocation7 + $0x978] sm:$0xff] }
 0x4e1   :  { %7654 = vmatprep.subr.bf16.mxu0 %v8846_v36  ;;  %v8933_v36 = vcombine.low %v604_v29, %v608_v30  ;;  %v728_v62 = vld [vmem:[#allocation7 + $0xd78] sm:$0xff] }
 0x4e2   :  { %7614 = vmatpush2.bf16.msra.mxu1 %v8717_v46  ;;  %v724_v46 = vld [vmem:[#allocation7 + $0xd58] sm:$0xff] }
 0x4e3   :  { %7615 = vmatprep.subr.bf16.mxu1 %v8710_v49  ;;  %v9054_v56 = vcombine.high %v724_v46, %v728_v62  ;;  %v712_v9 = vld [vmem:[#allocation7 + $0xcf8] sm:$0xff] }
 0x4e4   :  { %7655 = vmatpush2.bf16.msra.mxu0 %v8845_v51  ;;  %v8926_v51 = vcombine.high %v596_v31, %v600_v37  ;;  %v576_v26 = vld [vmem:[#allocation7 + $0x8b8] sm:$0xff] }
 0x4e5   :  { %7656 = vmatprep.subr.bf16.mxu0 %v8838_v43  ;;  %v592_v43 = vld [vmem:[#allocation7 + $0x938] sm:$0xff] }
 0x4e6   :  { %7616 = vmatpush2.bf16.msra.mxu1 %v8709_v55  ;;  %v704_v29 = vld [vmem:[#allocation7 + $0xcb8] sm:$0xff] }
 0x4e7   :  { %7617 = vmatprep.subr.bf16.mxu1 %v8702_v57  ;;  %v716_v57 = vld [vmem:[#allocation7 + $0xd18] sm:$0xff] }
 0x4e8   :  { %7657 = vmatpush2.bf16.msra.mxu0 %v8837_v58  ;;  %v720_v58 = vld [vmem:[#allocation7 + $0xd38] sm:$0xff] }
 0x4e9   :  { %7658 = vmatprep.subr.bf16.mxu0 %v8830_v2  ;;  %v9053_v2 = vcombine.low %v724_v46, %v728_v62  ;;  %v9046_v50 = vcombine.high %v716_v57, %v720_v58  ;;  %v684_v62 = vld [vmem:[#allocation7 + $0xc18] sm:$0xff] }
 0x4ea   :  { %7618 = vmatpush2.bf16.msra.mxu1 %v8701_v3  ;;  %v584_v3 = vld [vmem:[#allocation7 + $0x8f8] sm:$0xff] }
 0x4eb   :  { %7619 = vmatprep.subr.bf16.mxu1 %v8694_v7 }
 0x4ec   :  { %7659 = vmatpush2.bf16.msra.mxu0 %v8829_v8  ;;  %v708_v8 = vld [vmem:[#allocation7 + $0xcd8] sm:$0xff] }
 0x4ed   :  { %7660 = vmatprep.subr.bf16.mxu0 %v8822_v14  ;;  %v9045_v14 = vcombine.low %v716_v57, %v720_v58  ;;  %v9038_v5 = vcombine.high %v708_v8, %v712_v9  ;;  %v668_v57 = vld [vmem:[#allocation7 + $0xb98] sm:$0xff] }
 0x4ee   :  { %7620 = vmatpush2.bf16.msra.mxu1 %v8693_v25  ;;  %v572_v25 = vld [vmem:[#allocation7 + $0x898] sm:$0xff] }
 0x4ef   :  { %7671 = vmatprep.subr.bf16.mxu1 %v8942_v63  ;;  %v8902_v30 = vcombine.high %v572_v25, %v576_v26  ;;  %v672_v58 = vld [vmem:[#allocation7 + $0xbb8] sm:$0xff] }
 0x4f0   :  { %7661 = vmatpush2.bf16.msra.mxu0 %v8821_v20  ;;  %v700_v20 = vld [vmem:[#allocation7 + $0xc98] sm:$0xff] }
 0x4f1   :  { %v7377_v39 = vpop.f32.mrf.mxu1  ;;  %7622 = vmatmul.mubr.bf16.vlgmr.msra.gmra.mxu1 %v10126_v59  ;;  %7712 = vmatprep.subr.bf16.mxu0 %v9070_v28  ;;  %v9061_v59 = vcombine.low %v732_v32, %v736_v19  ;;  %v9037_v28 = vcombine.low %v708_v8, %v712_v9  ;;  %v568_v32 = vld [vmem:[#allocation7 + $0x878] sm:$0xff]  ;;  %v9030_v19 = vcombine.high %v700_v20, %v704_v29 }
 0x4f2   :  { %v7378_v45 = vadd.f32 %v7377_v39, %v10273_v16  ;;  %7672 = vmatpush1.bf16.msra.mxu1 %v8941_v35  ;;  %7703 = vmatprep.mubr.bf16.mxu1 %v10132_v4  ;;  %v588_v16 = vld [vmem:[#allocation7 + $0x918] sm:$0xff]  ;;  %v9029_v39 = vcombine.low %v700_v20, %v704_v29  ;;  %v8997_v8 = vcombine.low %v668_v57, %v672_v58 }
 0x4f3   :  { %v7379_v47 = vpop.f32.mrf.mxu1  ;;  %v7418_v49 = vpop.f32.mrf.mxu0  ;;  %7663 = vmatmul.mubr.bf16.vlgmr.msra.gmra.mxu0 %v10144_v12  ;;  %7673 = vmatprep.subr.bf16.mxu1 %v8934_v22  ;;  %v8925_v12 = vcombine.low %v596_v31, %v600_v37  ;;  %v8918_v0 = vcombine.high %v588_v16, %v592_v43  ;;  %v8917_v7 = vcombine.low %v588_v16, %v592_v43  ;;  %v564_v35 = vld [vmem:[#allocation7 + $0x858] sm:$0xff] }
 0x4f4   :  { %v7380_v52 = vadd.f32 %v7379_v47, %v10276_v48  ;;  %v10283_v53 = vadd.f32 %v7418_v49, %v7378_v45  ;;  %7713 = vmatpush1.bf16.msra.mxu0 %v9069_v13  ;;  %7744 = vmatprep.mubr.bf16.mxu0 %v10151_v17  ;;  %v580_v17 = vld [vmem:[#allocation7 + $0x8d8] sm:$0xff]  ;;  %v8901_v22 = vcombine.low %v572_v25, %v576_v26 }
 0x4f5   :  { %v7381_v4 = vpop.f32.mrf.mxu1  ;;  %v7420_v55 = vpop.f32.mrf.mxu0  ;;  %7714 = vmatprep.subr.bf16.mxu0 %v9062_v41  ;;  %v8910_v10 = vcombine.high %v580_v17, %v584_v3  ;;  %v8909_v63 = vcombine.low %v580_v17, %v584_v3  ;;  %v692_v13 = vld [vmem:[#allocation7 + $0xc58] sm:$0xff]  ;;  %v8894_v37 = vcombine.high %v564_v35, %v568_v32  ;;  %v8893_v46 = vcombine.low %v564_v35, %v568_v32 }
 0x4f6   :  { %v10286_v6 = vadd.f32 %v7420_v55, %v7380_v52  ;;  %7674 = vmatpush1.bf16.msra.mxu1 %v8933_v36  ;;  %v696_v31 = vld [vmem:[#allocation7 + $0xc78] sm:$0xff]  ;;  %v8998_v17 = vcombine.high %v668_v57, %v672_v58 }
 0x4f7   :  { %v7382_v60 = vpop.f32.mrf.mxu1  ;;  %v7422_v48 = vpop.f32.mrf.mxu0  ;;  %7675 = vmatprep.subr.bf16.mxu1 %v8926_v51  ;;  %v556_v41 = vld [vmem:[#allocation7 + $0x818] sm:$0xff]  ;;  %v9022_v36 = vcombine.high %v692_v13, %v696_v31  ;;  %v9021_v51 = vcombine.low %v692_v13, %v696_v31 }
 0x4f8   :  { %7715 = vmatpush1.bf16.msra.mxu0 %v9061_v59  ;;  %v560_v45 = vld [vmem:[#allocation7 + $0x838] sm:$0xff] }
 0x4f9   :  { %v7423_v54 = vpop.f32.mrf.mxu0  ;;  %7716 = vmatprep.subr.bf16.mxu0 %v9054_v56  ;;  %v688_v47 = vld [vmem:[#allocation7 + $0xc38] sm:$0xff]  ;;  %v8886_v49 = vcombine.high %v556_v41, %v560_v45  ;;  %v8885_v43 = vcombine.low %v556_v41, %v560_v45 }
 0x4fa   :  { %7676 = vmatpush1.bf16.msra.mxu1 %v8925_v12  ;;  %v676_v52 = vld [vmem:[#allocation7 + $0xbd8] sm:$0xff]  ;;  %v9014_v16 = vcombine.high %v684_v62, %v688_v47  ;;  %v9013_v12 = vcombine.low %v684_v62, %v688_v47 }
 0x4fb   :  { %7677 = vmatprep.subr.bf16.mxu1 %v8918_v0  ;;  %v680_v59 = vld [vmem:[#allocation7 + $0xbf8] sm:$0xff] }
 0x4fc   :  { %7717 = vmatpush1.bf16.msra.mxu0 %v9053_v2  ;;  %v804_v4 = vld [vmem:[#allocation7 + $0xfd8] sm:$0xff]  ;;  %v9006_v56 = vcombine.high %v676_v52, %v680_v59  ;;  %v9005_v48 = vcombine.low %v676_v52, %v680_v59 }
 0x4fd   :  { %7718 = vmatprep.subr.bf16.mxu0 %v9046_v50  ;;  %v808_v55 = vld [vmem:[#allocation7 + $0xff8] sm:$0xff] }
 0x4fe   :  { %7678 = vmatpush1.bf16.msra.mxu1 %v8917_v7  ;;  %v9134_v60 = vcombine.high %v804_v4, %v808_v55  ;;  %v796_v0 = vld [vmem:[#allocation7 + $0xf98] sm:$0xff]  ;;  %v9133_v3 = vcombine.low %v804_v4, %v808_v55 }
 0x4ff   :  { %7679 = vmatprep.subr.bf16.mxu1 %v8910_v10  ;;  %v800_v2 = vld [vmem:[#allocation7 + $0xfb8] sm:$0xff] }
 0x500   :  { %7719 = vmatpush1.bf16.msra.mxu0 %v9045_v14  ;;  %v660_v54 = vld [vmem:[#allocation7 + $0xb58] sm:$0xff]  ;;  %v9126_v7 = vcombine.high %v796_v0, %v800_v2  ;;  %v9125_v25 = vcombine.low %v796_v0, %v800_v2 }
 0x501   :  { %7720 = vmatprep.subr.bf16.mxu0 %v9038_v5  ;;  %v664_v50 = vld [vmem:[#allocation7 + $0xb78] sm:$0xff] }
 0x502   :  { %7680 = vmatpush1.bf16.msra.mxu1 %v8909_v63  ;;  %v788_v9 = vld [vmem:[#allocation7 + $0xf58] sm:$0xff]  ;;  %v8990_v14 = vcombine.high %v660_v54, %v664_v50  ;;  %v8989_v20 = vcombine.low %v660_v54, %v664_v50 }
 0x503   :  { %7681 = vmatprep.subr.bf16.mxu1 %v8902_v30  ;;  %v792_v10 = vld [vmem:[#allocation7 + $0xf78] sm:$0xff] }
 0x504   :  { %7721 = vmatpush1.bf16.msra.mxu0 %v9037_v28  ;;  %v652_v26 = vld [vmem:[#allocation7 + $0xb18] sm:$0xff]  ;;  %v9118_v63 = vcombine.high %v788_v9, %v792_v10  ;;  %v9117_v35 = vcombine.low %v788_v9, %v792_v10 }
 0x505   :  { %7722 = vmatprep.subr.bf16.mxu0 %v9030_v19  ;;  %v656_v5 = vld [vmem:[#allocation7 + $0xb38] sm:$0xff] }
 0x506   :  { %7682 = vmatpush1.bf16.msra.mxu1 %v8901_v22  ;;  %v780_v29 = vld [vmem:[#allocation7 + $0xf18] sm:$0xff]  ;;  %v8982_v28 = vcombine.high %v652_v26, %v656_v5  ;;  %v8981_v13 = vcombine.low %v652_v26, %v656_v5 }
 0x507   :  { %7683 = vmatprep.subr.bf16.mxu1 %v8894_v37  ;;  %v784_v30 = vld [vmem:[#allocation7 + $0xf38] sm:$0xff] }
 0x508   :  { %7723 = vmatpush1.bf16.msra.mxu0 %v9029_v39  ;;  %v644_v32 = vld [vmem:[#allocation7 + $0xad8] sm:$0xff]  ;;  %v9110_v22 = vcombine.high %v780_v29, %v784_v30  ;;  %v9109_v41 = vcombine.low %v780_v29, %v784_v30 }
 0x509   :  { %7724 = vmatprep.subr.bf16.mxu0 %v9022_v36  ;;  %v648_v19 = vld [vmem:[#allocation7 + $0xaf8] sm:$0xff] }
 0x50a   :  { %7684 = vmatpush1.bf16.msra.mxu1 %v8893_v46  ;;  %v772_v31 = vld [vmem:[#allocation7 + $0xed8] sm:$0xff]  ;;  %v8974_v39 = vcombine.high %v644_v32, %v648_v19  ;;  %v8973_v62 = vcombine.low %v644_v32, %v648_v19 }
 0x50b   :  { %7685 = vmatprep.subr.bf16.mxu1 %v8886_v49  ;;  %v776_v37 = vld [vmem:[#allocation7 + $0xef8] sm:$0xff] }
 0x50c   :  { %7725 = vmatpush1.bf16.msra.mxu0 %v9021_v51  ;;  %v636_v45 = vld [vmem:[#allocation7 + $0xa98] sm:$0xff]  ;;  %v9102_v46 = vcombine.high %v772_v31, %v776_v37  ;;  %v9101_v52 = vcombine.low %v772_v31, %v776_v37 }
 0x50d   :  { %7726 = vmatprep.subr.bf16.mxu0 %v9014_v16  ;;  %v640_v36 = vld [vmem:[#allocation7 + $0xab8] sm:$0xff] }
 0x50e   :  { %7686 = vmatpush1.bf16.msra.mxu1 %v8885_v43  ;;  %v764_v47 = vld [vmem:[#allocation7 + $0xe98] sm:$0xff]  ;;  %v8966_v51 = vcombine.high %v636_v45, %v640_v36  ;;  %v8965_v4 = vcombine.low %v636_v45, %v640_v36 }
 0x50f   :  { %7687 = vmatprep.subr.bf16.mxu1 %v9006_v56  ;;  %v768_v49 = vld [vmem:[#allocation7 + $0xeb8] sm:$0xff] }
 0x510   :  { %7727 = vmatpush1.bf16.msra.mxu0 %v9013_v12  ;;  %v628_v59 = vld [vmem:[#allocation7 + $0xa58] sm:$0xff]  ;;  %v9094_v43 = vcombine.high %v764_v47, %v768_v49  ;;  %v9093_v57 = vcombine.low %v764_v47, %v768_v49 }
 0x511   :  { %7728 = vmatprep.subr.bf16.mxu0 %v9134_v60  ;;  %v632_v16 = vld [vmem:[#allocation7 + $0xa78] sm:$0xff] }
 0x512   :  { %7688 = vmatpush2.bf16.msra.mxu1 %v9005_v48  ;;  %v756_v55 = vld [vmem:[#allocation7 + $0xe58] sm:$0xff]  ;;  %v8958_v12 = vcombine.high %v628_v59, %v632_v16  ;;  %v8957_v0 = vcombine.low %v628_v59, %v632_v16 }
 0x513   :  { %7689 = vmatprep.subr.bf16.mxu1 %v8998_v17  ;;  %v760_v56 = vld [vmem:[#allocation7 + $0xe78] sm:$0xff] }
 0x514   :  { %7729 = vmatpush2.bf16.msra.mxu0 %v9133_v3  ;;  %v620_v58 = vld [vmem:[#allocation7 + $0xa18] sm:$0xff]  ;;  %v9086_v48 = vcombine.high %v756_v55, %v760_v56  ;;  %v9085_v54 = vcombine.low %v756_v55, %v760_v56 }
 0x515   :  { %7730 = vmatprep.subr.bf16.mxu0 %v9126_v7  ;;  %v624_v60 = vld [vmem:[#allocation7 + $0xa38] sm:$0xff] }
 0x516   :  { %7690 = vmatpush2.bf16.msra.mxu1 %v8997_v8  ;;  %v748_v2 = vld [vmem:[#allocation7 + $0xe18] sm:$0xff]  ;;  %v8950_v3 = vcombine.high %v620_v58, %v624_v60  ;;  %v8949_v9 = vcombine.low %v620_v58, %v624_v60 }
 0x517   :  { %7691 = vmatprep.subr.bf16.mxu1 %v8990_v14  ;;  %v752_v17 = vld [vmem:[#allocation7 + $0xe38] sm:$0xff] }
 0x518   :  { %7731 = vmatpush2.bf16.msra.mxu0 %v9125_v25  ;;  %v868_v50 = vld [vmem:[#allocation7 + $0x11d8] sm:$0xff]  ;;  %v9078_v8 = vcombine.high %v748_v2, %v752_v17  ;;  %v9077_v26 = vcombine.low %v748_v2, %v752_v17 }
 0x519   :  { %7732 = vmatprep.subr.bf16.mxu0 %v9118_v63  ;;  %v872_v7 = vld [vmem:[#allocation7 + $0x11f8] sm:$0xff] }
 0x51a   :  { %7692 = vmatpush2.bf16.msra.mxu1 %v8989_v20  ;;  %v996_v10 = vld [vmem:[#allocation7 + $0x15d8] sm:$0xff]  ;;  %v9198_v25 = vcombine.high %v868_v50, %v872_v7  ;;  %v9197_v29 = vcombine.low %v868_v50, %v872_v7 }
 0x51b   :  { %7693 = vmatprep.subr.bf16.mxu1 %v8982_v28  ;;  %v1000_v14 = vld [vmem:[#allocation7 + $0x15f8] sm:$0xff] }
 0x51c   :  { %7733 = vmatpush2.bf16.msra.mxu0 %v9117_v35  ;;  %v860_v5 = vld [vmem:[#allocation7 + $0x1198] sm:$0xff]  ;;  %v9326_v20 = vcombine.high %v996_v10, %v1000_v14  ;;  %v9325_v32 = vcombine.low %v996_v10, %v1000_v14 }
 0x51d   :  { %7734 = vmatprep.subr.bf16.mxu0 %v9110_v22  ;;  %v864_v63 = vld [vmem:[#allocation7 + $0x11b8] sm:$0xff] }
 0x51e   :  { %7694 = vmatpush2.bf16.msra.mxu1 %v8981_v13  ;;  %v988_v30 = vld [vmem:[#allocation7 + $0x1598] sm:$0xff]  ;;  %v9190_v35 = vcombine.high %v860_v5, %v864_v63 }
 0x51f   :  { %7695 = vmatprep.subr.bf16.mxu1 %v8974_v39  ;;  %v992_v28 = vld [vmem:[#allocation7 + $0x15b8] sm:$0xff]  ;;  %v9189_v39 = vcombine.low %v860_v5, %v864_v63 }
 0x520   :  { %7735 = vmatpush2.bf16.msra.mxu0 %v9109_v41  ;;  %v852_v19 = vld [vmem:[#allocation7 + $0x1158] sm:$0xff]  ;;  %v9318_v31 = vcombine.high %v988_v30, %v992_v28 }
 0x521   :  { %7736 = vmatprep.subr.bf16.mxu0 %v9102_v46  ;;  %v856_v22 = vld [vmem:[#allocation7 + $0x1178] sm:$0xff] }
 0x522   :  { %7696 = vmatpush2.bf16.msra.mxu1 %v8973_v62  ;;  %v980_v41 = vld [vmem:[#allocation7 + $0x1558] sm:$0xff]  ;;  %v9182_v62 = vcombine.high %v852_v19, %v856_v22 }
 0x523   :  { %7697 = vmatprep.subr.bf16.mxu1 %v8966_v51  ;;  %v984_v45 = vld [vmem:[#allocation7 + $0x1578] sm:$0xff] }
 0x524   :  { %7737 = vmatpush2.bf16.msra.mxu0 %v9101_v52  ;;  %v848_v51 = vld [vmem:[#allocation7 + $0x1138] sm:$0xff]  ;;  %v9310_v59 = vcombine.high %v980_v41, %v984_v45 }
 0x525   :  { %7738 = vmatprep.subr.bf16.mxu0 %v9094_v43  ;;  %v972_v43 = vld [vmem:[#allocation7 + $0x1518] sm:$0xff] }
 0x526   :  { %7698 = vmatpush2.bf16.msra.mxu1 %v8965_v4  ;;  %v976_v4 = vld [vmem:[#allocation7 + $0x1538] sm:$0xff] }
 0x527   :  { %7699 = vmatprep.subr.bf16.mxu1 %v8958_v12  ;;  %v9309_v12 = vcombine.low %v980_v41, %v984_v45  ;;  %v9302_v60 = vcombine.high %v972_v43, %v976_v4  ;;  %v968_v2 = vld [vmem:[#allocation7 + $0x14f8] sm:$0xff] }
 0x528   :  { %7739 = vmatpush2.bf16.msra.mxu0 %v9093_v57  ;;  %v840_v57 = vld [vmem:[#allocation7 + $0x10f8] sm:$0xff] }
 0x529   :  { %7740 = vmatprep.subr.bf16.mxu0 %v9086_v48  ;;  %v832_v50 = vld [vmem:[#allocation7 + $0x10b8] sm:$0xff] }
 0x52a   :  { %7700 = vmatpush2.bf16.msra.mxu1 %v8957_v0  ;;  %v964_v0 = vld [vmem:[#allocation7 + $0x14d8] sm:$0xff] }
 0x52b   :  { %7701 = vmatprep.subr.bf16.mxu1 %v8950_v3  ;;  %v9301_v3 = vcombine.low %v972_v43, %v976_v4  ;;  %v9294_v7 = vcombine.high %v964_v0, %v968_v2  ;;  %v960_v10 = vld [vmem:[#allocation7 + $0x14b8] sm:$0xff] }
 0x52c   :  { %7741 = vmatpush2.bf16.msra.mxu0 %v9085_v54  ;;  %v828_v54 = vld [vmem:[#allocation7 + $0x1098] sm:$0xff] }
 0x52d   :  { %7742 = vmatprep.subr.bf16.mxu0 %v9078_v8  ;;  %v9158_v14 = vcombine.high %v828_v54, %v832_v50  ;;  %v824_v5 = vld [vmem:[#allocation7 + $0x1078] sm:$0xff] }
 0x52e   :  { %7702 = vmatpush2.bf16.msra.mxu1 %v8949_v9  ;;  %v956_v9 = vld [vmem:[#allocation7 + $0x1498] sm:$0xff] }
 0x52f   :  { %7753 = vmatprep.subr.bf16.mxu1 %v9198_v25  ;;  %v9293_v25 = vcombine.low %v964_v0, %v968_v2  ;;  %v9286_v63 = vcombine.high %v956_v9, %v960_v10  ;;  %v932_v45 = vld [vmem:[#allocation7 + $0x13d8] sm:$0xff] }
 0x530   :  { %7743 = vmatpush2.bf16.msra.mxu0 %v9077_v26  ;;  %v820_v26 = vld [vmem:[#allocation7 + $0x1058] sm:$0xff] }
 0x531   :  { %v7459_v13 = vpop.f32.mrf.mxu1  ;;  %7704 = vmatmul.mubr.bf16.vlgmr.msra.gmra.mxu1 %v10128_v61  ;;  %7794 = vmatprep.subr.bf16.mxu0 %v9326_v20  ;;  %v9317_v61 = vcombine.low %v988_v30, %v992_v28  ;;  %v9157_v20 = vcombine.low %v828_v54, %v832_v50  ;;  %v952_v30 = vld [vmem:[#allocation7 + $0x1478] sm:$0xff]  ;;  %v9150_v28 = vcombine.high %v820_v26, %v824_v5 }
 0x532   :  { %v7460_v37 = vadd.f32 %v7459_v13, %v10283_v53  ;;  %7754 = vmatpush1.bf16.msra.mxu1 %v9197_v29  ;;  %7785 = vmatprep.mubr.bf16.mxu1 %v10153_v21  ;;  %v844_v53 = vld [vmem:[#allocation7 + $0x1118] sm:$0xff]  ;;  %v9149_v13 = vcombine.low %v820_v26, %v824_v5 }
 0x533   :  { %v7461_v36 = vpop.f32.mrf.mxu1  ;;  %v7500_v46 = vpop.f32.mrf.mxu0  ;;  %7745 = vmatmul.mubr.bf16.vlgmr.msra.gmra.mxu0 %v10163_v42  ;;  %7755 = vmatprep.subr.bf16.mxu1 %v9190_v35  ;;  %v9181_v42 = vcombine.low %v852_v19, %v856_v22  ;;  %v9174_v56 = vcombine.high %v844_v53, %v848_v51  ;;  %v9173_v48 = vcombine.low %v844_v53, %v848_v51  ;;  %v948_v29 = vld [vmem:[#allocation7 + $0x1458] sm:$0xff] }
 0x534   :  { %v7462_v47 = vadd.f32 %v7461_v36, %v10286_v6  ;;  %v10293_v49 = vadd.f32 %v7500_v46, %v7460_v37  ;;  %7795 = vmatpush1.bf16.msra.mxu0 %v9325_v32  ;;  %7826 = vmatprep.mubr.bf16.mxu0 %v10168_v44  ;;  %v836_v44 = vld [vmem:[#allocation7 + $0x10d8] sm:$0xff]  ;;  %v9285_v35 = vcombine.low %v956_v9, %v960_v10 }
 0x535   :  { %v7463_v21 = vpop.f32.mrf.mxu1  ;;  %v7502_v52 = vpop.f32.mrf.mxu0  ;;  %7796 = vmatprep.subr.bf16.mxu0 %v9318_v31  ;;  %v9166_v17 = vcombine.high %v836_v44, %v840_v57  ;;  %v9165_v8 = vcombine.low %v836_v44, %v840_v57  ;;  %v812_v32 = vld [vmem:[#allocation7 + $0x1018] sm:$0xff]  ;;  %v9278_v22 = vcombine.high %v948_v29, %v952_v30  ;;  %v9277_v41 = vcombine.low %v948_v29, %v952_v30 }
 0x536   :  { %v10296_v16 = vadd.f32 %v7502_v52, %v7462_v47  ;;  %7756 = vmatpush1.bf16.msra.mxu1 %v9189_v39  ;;  %v816_v19 = vld [vmem:[#allocation7 + $0x1038] sm:$0xff] }
 0x537   :  { %v7464_v55 = vpop.f32.mrf.mxu1  ;;  %v7504_v6 = vpop.f32.mrf.mxu0  ;;  %7757 = vmatprep.subr.bf16.mxu1 %v9182_v62  ;;  %v940_v31 = vld [vmem:[#allocation7 + $0x1418] sm:$0xff]  ;;  %v9142_v39 = vcombine.high %v812_v32, %v816_v19  ;;  %v9141_v62 = vcombine.low %v812_v32, %v816_v19 }
 0x538   :  { %7797 = vmatpush1.bf16.msra.mxu0 %v9317_v61  ;;  %v944_v37 = vld [vmem:[#allocation7 + $0x1438] sm:$0xff] }
 0x539   :  { %v7505_v58 = vpop.f32.mrf.mxu0  ;;  %7798 = vmatprep.subr.bf16.mxu0 %v9310_v59  ;;  %v936_v36 = vld [vmem:[#allocation7 + $0x13f8] sm:$0xff]  ;;  %v9270_v46 = vcombine.high %v940_v31, %v944_v37  ;;  %v9269_v51 = vcombine.low %v940_v31, %v944_v37 }
 0x53a   :  { %7758 = vmatpush1.bf16.msra.mxu1 %v9181_v42  ;;  %v1060_v47 = vld [vmem:[#allocation7 + $0x17d8] sm:$0xff]  ;;  %v9262_v53 = vcombine.high %v932_v45, %v936_v36  ;;  %v9261_v42 = vcombine.low %v932_v45, %v936_v36 }
 0x53b   :  { %7759 = vmatprep.subr.bf16.mxu1 %v9174_v56  ;;  %v1064_v61 = vld [vmem:[#allocation7 + $0x17f8] sm:$0xff] }
 0x53c   :  { %7799 = vmatpush1.bf16.msra.mxu0 %v9309_v12  ;;  %v924_v21 = vld [vmem:[#allocation7 + $0x1398] sm:$0xff]  ;;  %v9390_v59 = vcombine.high %v1060_v47, %v1064_v61  ;;  %v9389_v6 = vcombine.low %v1060_v47, %v1064_v61 }
 0x53d   :  { %7800 = vmatprep.subr.bf16.mxu0 %v9302_v60  ;;  %v928_v52 = vld [vmem:[#allocation7 + $0x13b8] sm:$0xff] }
 0x53e   :  { %7760 = vmatpush1.bf16.msra.mxu1 %v9173_v48  ;;  %v1052_v43 = vld [vmem:[#allocation7 + $0x1798] sm:$0xff]  ;;  %v9254_v55 = vcombine.high %v924_v21, %v928_v52  ;;  %v9253_v57 = vcombine.low %v924_v21, %v928_v52 }
 0x53f   :  { %7761 = vmatprep.subr.bf16.mxu1 %v9166_v17  ;;  %v1056_v4 = vld [vmem:[#allocation7 + $0x17b8] sm:$0xff] }
 0x540   :  { %7801 = vmatpush1.bf16.msra.mxu0 %v9301_v3  ;;  %v916_v56 = vld [vmem:[#allocation7 + $0x1358] sm:$0xff]  ;;  %v9382_v44 = vcombine.high %v1052_v43, %v1056_v4  ;;  %v9381_v0 = vcombine.low %v1052_v43, %v1056_v4 }
 0x541   :  { %7802 = vmatprep.subr.bf16.mxu0 %v9294_v7  ;;  %v920_v12 = vld [vmem:[#allocation7 + $0x1378] sm:$0xff] }
 0x542   :  { %7762 = vmatpush1.bf16.msra.mxu1 %v9165_v8  ;;  %v1044_v58 = vld [vmem:[#allocation7 + $0x1758] sm:$0xff]  ;;  %v9246_v48 = vcombine.high %v916_v56, %v920_v12  ;;  %v9245_v54 = vcombine.low %v916_v56, %v920_v12 }
 0x543   :  { %7763 = vmatprep.subr.bf16.mxu1 %v9158_v14  ;;  %v1048_v60 = vld [vmem:[#allocation7 + $0x1778] sm:$0xff] }
 0x544   :  { %7803 = vmatpush1.bf16.msra.mxu0 %v9293_v25  ;;  %v908_v2 = vld [vmem:[#allocation7 + $0x1318] sm:$0xff]  ;;  %v9374_v3 = vcombine.high %v1044_v58, %v1048_v60  ;;  %v9373_v9 = vcombine.low %v1044_v58, %v1048_v60 }
 0x545   :  { %7804 = vmatprep.subr.bf16.mxu0 %v9286_v63  ;;  %v912_v17 = vld [vmem:[#allocation7 + $0x1338] sm:$0xff] }
 0x546   :  { %7764 = vmatpush1.bf16.msra.mxu1 %v9157_v20  ;;  %v1036_v50 = vld [vmem:[#allocation7 + $0x1718] sm:$0xff]  ;;  %v9238_v8 = vcombine.high %v908_v2, %v912_v17  ;;  %v9237_v26 = vcombine.low %v908_v2, %v912_v17 }
 0x547   :  { %7765 = vmatprep.subr.bf16.mxu1 %v9150_v28  ;;  %v1040_v7 = vld [vmem:[#allocation7 + $0x1738] sm:$0xff] }
 0x548   :  { %7805 = vmatpush1.bf16.msra.mxu0 %v9285_v35  ;;  %v900_v10 = vld [vmem:[#allocation7 + $0x12d8] sm:$0xff]  ;;  %v9366_v25 = vcombine.high %v1036_v50, %v1040_v7  ;;  %v9365_v29 = vcombine.low %v1036_v50, %v1040_v7 }
 0x549   :  { %7806 = vmatprep.subr.bf16.mxu0 %v9278_v22  ;;  %v904_v14 = vld [vmem:[#allocation7 + $0x12f8] sm:$0xff] }
 0x54a   :  { %7766 = vmatpush1.bf16.msra.mxu1 %v9149_v13  ;;  %v1028_v5 = vld [vmem:[#allocation7 + $0x16d8] sm:$0xff]  ;;  %v9230_v20 = vcombine.high %v900_v10, %v904_v14  ;;  %v9229_v32 = vcombine.low %v900_v10, %v904_v14 }
 0x54b   :  { %7767 = vmatprep.subr.bf16.mxu1 %v9142_v39  ;;  %v1032_v63 = vld [vmem:[#allocation7 + $0x16f8] sm:$0xff] }
 0x54c   :  { %7807 = vmatpush1.bf16.msra.mxu0 %v9277_v41  ;;  %v892_v30 = vld [vmem:[#allocation7 + $0x1298] sm:$0xff]  ;;  %v9358_v35 = vcombine.high %v1028_v5, %v1032_v63  ;;  %v9357_v31 = vcombine.low %v1028_v5, %v1032_v63 }
 0x54d   :  { %7808 = vmatprep.subr.bf16.mxu0 %v9270_v46  ;;  %v896_v28 = vld [vmem:[#allocation7 + $0x12b8] sm:$0xff] }
 0x54e   :  { %7768 = vmatpush1.bf16.msra.mxu1 %v9141_v62  ;;  %v1020_v19 = vld [vmem:[#allocation7 + $0x1698] sm:$0xff]  ;;  %v9222_v13 = vcombine.high %v892_v30, %v896_v28  ;;  %v9221_v45 = vcombine.low %v892_v30, %v896_v28 }
 0x54f   :  { %7769 = vmatprep.subr.bf16.mxu1 %v9262_v53  ;;  %v1024_v22 = vld [vmem:[#allocation7 + $0x16b8] sm:$0xff] }
 0x550   :  { %7809 = vmatpush1.bf16.msra.mxu0 %v9269_v51  ;;  %v884_v37 = vld [vmem:[#allocation7 + $0x1258] sm:$0xff]  ;;  %v9350_v41 = vcombine.high %v1020_v19, %v1024_v22  ;;  %v9349_v47 = vcombine.low %v1020_v19, %v1024_v22 }
 0x551   :  { %7810 = vmatprep.subr.bf16.mxu0 %v9390_v59  ;;  %v888_v39 = vld [vmem:[#allocation7 + $0x1278] sm:$0xff] }
 0x552   :  { %7770 = vmatpush2.bf16.msra.mxu1 %v9261_v42  ;;  %v1012_v36 = vld [vmem:[#allocation7 + $0x1658] sm:$0xff]  ;;  %v9214_v62 = vcombine.high %v884_v37, %v888_v39  ;;  %v9213_v21 = vcombine.low %v884_v37, %v888_v39 }
 0x553   :  { %7771 = vmatprep.subr.bf16.mxu1 %v9254_v55  ;;  %v1016_v46 = vld [vmem:[#allocation7 + $0x1678] sm:$0xff] }
 0x554   :  { %7811 = vmatpush2.bf16.msra.mxu0 %v9389_v6  ;;  %v876_v61 = vld [vmem:[#allocation7 + $0x1218] sm:$0xff]  ;;  %v9342_v51 = vcombine.high %v1012_v36, %v1016_v46  ;;  %v9341_v43 = vcombine.low %v1012_v36, %v1016_v46 }
 0x555   :  { %7812 = vmatprep.subr.bf16.mxu0 %v9382_v44  ;;  %v880_v53 = vld [vmem:[#allocation7 + $0x1238] sm:$0xff] }
 0x556   :  { %7772 = vmatpush2.bf16.msra.mxu1 %v9253_v57  ;;  %v1004_v52 = vld [vmem:[#allocation7 + $0x1618] sm:$0xff]  ;;  %v9206_v42 = vcombine.high %v876_v61, %v880_v53  ;;  %v9205_v56 = vcombine.low %v876_v61, %v880_v53 }
 0x557   :  { %7773 = vmatprep.subr.bf16.mxu1 %v9246_v48  ;;  %v1008_v59 = vld [vmem:[#allocation7 + $0x1638] sm:$0xff] }
 0x558   :  { %7813 = vmatpush2.bf16.msra.mxu0 %v9381_v0  ;;  %v1124_v4 = vld [vmem:[#allocation7 + $0x19d8] sm:$0xff]  ;;  %v9334_v6 = vcombine.high %v1004_v52, %v1008_v59  ;;  %v9333_v58 = vcombine.low %v1004_v52, %v1008_v59 }
 0x559   :  { %7814 = vmatprep.subr.bf16.mxu0 %v9374_v3  ;;  %v1128_v55 = vld [vmem:[#allocation7 + $0x19f8] sm:$0xff] }
 0x55a   :  { %7774 = vmatpush2.bf16.msra.mxu1 %v9245_v54  ;;  %v1252_v12 = vld [vmem:[#allocation7 + $0x1dd8] sm:$0xff]  ;;  %v9454_v57 = vcombine.high %v1124_v4, %v1128_v55  ;;  %v9453_v2 = vcombine.low %v1124_v4, %v1128_v55 }
 0x55b   :  { %7775 = vmatprep.subr.bf16.mxu1 %v9238_v8  ;;  %v1256_v44 = vld [vmem:[#allocation7 + $0x1df8] sm:$0xff] }
 0x55c   :  { %7815 = vmatpush2.bf16.msra.mxu0 %v9373_v9  ;;  %v1116_v60 = vld [vmem:[#allocation7 + $0x1998] sm:$0xff]  ;;  %v9582_v0 = vcombine.high %v1252_v12, %v1256_v44  ;;  %v9581_v50 = vcombine.low %v1252_v12, %v1256_v44 }
 0x55d   :  { %7816 = vmatprep.subr.bf16.mxu0 %v9366_v25  ;;  %v1120_v48 = vld [vmem:[#allocation7 + $0x19b8] sm:$0xff] }
 0x55e   :  { %7776 = vmatpush2.bf16.msra.mxu1 %v9237_v26  ;;  %v1244_v17 = vld [vmem:[#allocation7 + $0x1d98] sm:$0xff]  ;;  %v9446_v54 = vcombine.high %v1116_v60, %v1120_v48  ;;  %v9445_v25 = vcombine.low %v1116_v60, %v1120_v48 }
 0x55f   :  { %7777 = vmatprep.subr.bf16.mxu1 %v9230_v20  ;;  %v1248_v3 = vld [vmem:[#allocation7 + $0x1db8] sm:$0xff] }
 0x560   :  { %7817 = vmatpush2.bf16.msra.mxu0 %v9365_v29  ;;  %v1108_v7 = vld [vmem:[#allocation7 + $0x1958] sm:$0xff]  ;;  %v9574_v10 = vcombine.high %v1244_v17, %v1248_v3 }
 0x561   :  { %7818 = vmatprep.subr.bf16.mxu0 %v9358_v35  ;;  %v1112_v8 = vld [vmem:[#allocation7 + $0x1978] sm:$0xff] }
 0x562   :  { %7778 = vmatpush2.bf16.msra.mxu1 %v9229_v32  ;;  %v1236_v26 = vld [vmem:[#allocation7 + $0x1d58] sm:$0xff]  ;;  %v9438_v29 = vcombine.high %v1108_v7, %v1112_v8 }
 0x563   :  { %7779 = vmatprep.subr.bf16.mxu1 %v9222_v13  ;;  %v1240_v5 = vld [vmem:[#allocation7 + $0x1d78] sm:$0xff] }
 0x564   :  { %7819 = vmatpush2.bf16.msra.mxu0 %v9357_v31  ;;  %v1104_v35 = vld [vmem:[#allocation7 + $0x1938] sm:$0xff]  ;;  %v9566_v19 = vcombine.high %v1236_v26, %v1240_v5 }
 0x565   :  { %7820 = vmatprep.subr.bf16.mxu0 %v9350_v41  ;;  %v1228_v13 = vld [vmem:[#allocation7 + $0x1d18] sm:$0xff]  ;;  %v9565_v41 = vcombine.low %v1236_v26, %v1240_v5 }
 0x566   :  { %7780 = vmatpush2.bf16.msra.mxu1 %v9221_v45  ;;  %v1232_v31 = vld [vmem:[#allocation7 + $0x1d38] sm:$0xff] }
 0x567   :  { %7781 = vmatprep.subr.bf16.mxu1 %v9214_v62  ;;  %v1096_v45 = vld [vmem:[#allocation7 + $0x18f8] sm:$0xff]  ;;  %v9558_v46 = vcombine.high %v1228_v13, %v1232_v31 }
 0x568   :  { %7821 = vmatpush2.bf16.msra.mxu0 %v9349_v47  ;;  %v1220_v47 = vld [vmem:[#allocation7 + $0x1cd8] sm:$0xff] }
 0x569   :  { %7822 = vmatprep.subr.bf16.mxu0 %v9342_v51  ;;  %v1224_v61 = vld [vmem:[#allocation7 + $0x1cf8] sm:$0xff]  ;;  %v9557_v51 = vcombine.low %v1228_v13, %v1232_v31 }
 0x56a   :  { %7782 = vmatpush2.bf16.msra.mxu1 %v9213_v21  ;;  %v1084_v21 = vld [vmem:[#allocation7 + $0x1898] sm:$0xff]  ;;  %v9550_v59 = vcombine.high %v1220_v47, %v1224_v61 }
 0x56b   :  { %7783 = vmatprep.subr.bf16.mxu1 %v9206_v42  ;;  %v1088_v52 = vld [vmem:[#allocation7 + $0x18b8] sm:$0xff] }
 0x56c   :  { %7823 = vmatpush2.bf16.msra.mxu0 %v9341_v43  ;;  %v1212_v43 = vld [vmem:[#allocation7 + $0x1c98] sm:$0xff]  ;;  %v9414_v55 = vcombine.high %v1084_v21, %v1088_v52 }
 0x56d   :  { %7824 = vmatprep.subr.bf16.mxu0 %v9334_v6  ;;  %v1216_v4 = vld [vmem:[#allocation7 + $0x1cb8] sm:$0xff]  ;;  %v9549_v6 = vcombine.low %v1220_v47, %v1224_v61 }
 0x56e   :  { %7784 = vmatpush2.bf16.msra.mxu1 %v9205_v56  ;;  %v1076_v56 = vld [vmem:[#allocation7 + $0x1858] sm:$0xff]  ;;  %v9542_v44 = vcombine.high %v1212_v43, %v1216_v4 }
 0x56f   :  { %7835 = vmatprep.subr.bf16.mxu1 %v9454_v57  ;;  %v1080_v12 = vld [vmem:[#allocation7 + $0x1878] sm:$0xff]  ;;  %v9413_v57 = vcombine.low %v1084_v21, %v1088_v52 }
 0x570   :  { %7825 = vmatpush2.bf16.msra.mxu0 %v9333_v58  ;;  %v1204_v58 = vld [vmem:[#allocation7 + $0x1c58] sm:$0xff]  ;;  %v9406_v48 = vcombine.high %v1076_v56, %v1080_v12 }
 0x571   :  { %v7541_v9 = vpop.f32.mrf.mxu1  ;;  %7786 = vmatmul.mubr.bf16.vlgmr.msra.gmra.mxu1 %v10139_v11  ;;  %7876 = vmatprep.subr.bf16.mxu0 %v9582_v0  ;;  %v9573_v11 = vcombine.low %v1244_v17, %v1248_v3  ;;  %v1208_v60 = vld [vmem:[#allocation7 + $0x1c78] sm:$0xff]  ;;  %v9541_v0 = vcombine.low %v1212_v43, %v1216_v4 }
 0x572   :  { %v7542_v14 = vadd.f32 %v7541_v9, %v10293_v49  ;;  %7836 = vmatpush1.bf16.msra.mxu1 %v9453_v2  ;;  %7867 = vmatprep.mubr.bf16.mxu1 %v10157_v24  ;;  %v1100_v49 = vld [vmem:[#allocation7 + $0x1918] sm:$0xff]  ;;  %v9534_v3 = vcombine.high %v1204_v58, %v1208_v60  ;;  %v9533_v9 = vcombine.low %v1204_v58, %v1208_v60 }
 0x573   :  { %v7543_v63 = vpop.f32.mrf.mxu1  ;;  %v7582_v20 = vpop.f32.mrf.mxu0  ;;  %7827 = vmatmul.mubr.bf16.vlgmr.msra.gmra.mxu0 %v10175_v18  ;;  %7837 = vmatprep.subr.bf16.mxu1 %v9446_v54  ;;  %v9437_v18 = vcombine.low %v1108_v7, %v1112_v8  ;;  %v9430_v39 = vcombine.high %v1100_v49, %v1104_v35  ;;  %v9429_v62 = vcombine.low %v1100_v49, %v1104_v35  ;;  %v1068_v2 = vld [vmem:[#allocation7 + $0x1818] sm:$0xff] }
 0x574   :  { %v7544_v30 = vadd.f32 %v7543_v63, %v10296_v16  ;;  %v10303_v28 = vadd.f32 %v7582_v20, %v7542_v14  ;;  %7877 = vmatpush1.bf16.msra.mxu0 %v9581_v50  ;;  %7908 = vmatprep.mubr.bf16.mxu0 %v10180_v23  ;;  %v1092_v23 = vld [vmem:[#allocation7 + $0x18d8] sm:$0xff]  ;;  %v9405_v54 = vcombine.low %v1076_v56, %v1080_v12 }
 0x575   :  { %v7545_v24 = vpop.f32.mrf.mxu1  ;;  %v7584_v32 = vpop.f32.mrf.mxu0  ;;  %7878 = vmatprep.subr.bf16.mxu0 %v9574_v10  ;;  %v9422_v53 = vcombine.high %v1092_v23, %v1096_v45  ;;  %v9421_v42 = vcombine.low %v1092_v23, %v1096_v45  ;;  %v1072_v17 = vld [vmem:[#allocation7 + $0x1838] sm:$0xff] }
 0x576   :  { %v10306_v22 = vadd.f32 %v7584_v32, %v7544_v30  ;;  %7838 = vmatpush1.bf16.msra.mxu1 %v9445_v25  ;;  %v1196_v50 = vld [vmem:[#allocation7 + $0x1c18] sm:$0xff]  ;;  %v9398_v8 = vcombine.high %v1068_v2, %v1072_v17  ;;  %v9397_v26 = vcombine.low %v1068_v2, %v1072_v17 }
 0x577   :  { %v7546_v37 = vpop.f32.mrf.mxu1  ;;  %v7586_v16 = vpop.f32.mrf.mxu0  ;;  %7839 = vmatprep.subr.bf16.mxu1 %v9438_v29  ;;  %v1200_v7 = vld [vmem:[#allocation7 + $0x1c38] sm:$0xff] }
 0x578   :  { %7879 = vmatpush1.bf16.msra.mxu0 %v9573_v11  ;;  %v1188_v10 = vld [vmem:[#allocation7 + $0x1bd8] sm:$0xff]  ;;  %v9526_v25 = vcombine.high %v1196_v50, %v1200_v7  ;;  %v9525_v29 = vcombine.low %v1196_v50, %v1200_v7 }
 0x579   :  { %v7587_v36 = vpop.f32.mrf.mxu0  ;;  %7880 = vmatprep.subr.bf16.mxu0 %v9566_v19  ;;  %v1192_v14 = vld [vmem:[#allocation7 + $0x1bf8] sm:$0xff] }
 0x57a   :  { %7840 = vmatpush1.bf16.msra.mxu1 %v9437_v18  ;;  %v1316_v5 = vld [vmem:[#allocation7 + $0x1fd8] sm:$0xff]  ;;  %v9518_v20 = vcombine.high %v1188_v10, %v1192_v14  ;;  %v9517_v35 = vcombine.low %v1188_v10, %v1192_v14 }
 0x57b   :  { %7841 = vmatprep.subr.bf16.mxu1 %v9430_v39  ;;  %v1320_v63 = vld [vmem:[#allocation7 + $0x1ff8] sm:$0xff] }
 0x57c   :  { %7881 = vmatpush1.bf16.msra.mxu0 %v9565_v41  ;;  %v1180_v30 = vld [vmem:[#allocation7 + $0x1b98] sm:$0xff]  ;;  %v9646_v49 = vcombine.high %v1316_v5, %v1320_v63  ;;  %v9645_v18 = vcombine.low %v1316_v5, %v1320_v63 }
 0x57d   :  { %7882 = vmatprep.subr.bf16.mxu0 %v9558_v46  ;;  %v1184_v11 = vld [vmem:[#allocation7 + $0x1bb8] sm:$0xff] }
 0x57e   :  { %7842 = vmatpush1.bf16.msra.mxu1 %v9429_v62  ;;  %v1308_v24 = vld [vmem:[#allocation7 + $0x1f98] sm:$0xff]  ;;  %v9510_v19 = vcombine.high %v1180_v30, %v1184_v11  ;;  %v9509_v16 = vcombine.low %v1180_v30, %v1184_v11 }
 0x57f   :  { %7843 = vmatprep.subr.bf16.mxu1 %v9422_v53  ;;  %v1312_v32 = vld [vmem:[#allocation7 + $0x1fb8] sm:$0xff] }
 0x580   :  { %7883 = vmatpush1.bf16.msra.mxu0 %v9557_v51  ;;  %v1172_v13 = vld [vmem:[#allocation7 + $0x1b58] sm:$0xff]  ;;  %v9638_v37 = vcombine.high %v1308_v24, %v1312_v32  ;;  %v9637_v45 = vcombine.low %v1308_v24, %v1312_v32  ;;  %v9830_v24 = vld [vmem:[#allocation10 + $0x78] sm:$0xff]   ;;  %v7918_v32 = vmax.f32 %v10226_v40, 0.0 }
 0x581   :  { %7884 = vmatprep.subr.bf16.mxu0 %v9550_v59  ;;  %v1176_v31 = vld [vmem:[#allocation7 + $0x1b78] sm:$0xff] }
 0x582   :  { %7844 = vmatpush1.bf16.msra.mxu1 %v9421_v42  ;;  %v1300_v39 = vld [vmem:[#allocation7 + $0x1f58] sm:$0xff]  ;;  %v9502_v23 = vcombine.high %v1172_v13, %v1176_v31  ;;  %v9501_v47 = vcombine.low %v1172_v13, %v1176_v31  ;;  %v9832_v13 = vld [vmem:[#allocation10 + $0xf8] sm:$0xff]   ;;  %v7920_v31 = vmax.f32 %v10266_v33, 0.0 }
 0x583   :  { %7845 = vmatprep.subr.bf16.mxu1 %v9414_v55  ;;  %v1304_v41 = vld [vmem:[#allocation7 + $0x1f78] sm:$0xff] }
 0x584   :  { %7885 = vmatpush1.bf16.msra.mxu0 %v9549_v6  ;;  %v1164_v36 = vld [vmem:[#allocation7 + $0x1b18] sm:$0xff]  ;;  %v9630_v62 = vcombine.high %v1300_v39, %v1304_v41  ;;  %v9629_v21 = vcombine.low %v1300_v39, %v1304_v41  ;;  %v9831_v39 = vld [vmem:[#allocation10 + $0x38] sm:$0xff]  }
 0x585   :  { %7886 = vmatprep.subr.bf16.mxu0 %v9542_v44  ;;  %v1168_v46 = vld [vmem:[#allocation7 + $0x1b38] sm:$0xff] }
 0x586   :  { %7846 = vmatpush1.bf16.msra.mxu1 %v9413_v57  ;;  %v1292_v61 = vld [vmem:[#allocation7 + $0x1f18] sm:$0xff]  ;;  %v9494_v51 = vcombine.high %v1164_v36, %v1168_v46  ;;  %v9493_v43 = vcombine.low %v1164_v36, %v1168_v46  ;;  %v9833_v36 = vld [vmem:[#allocation10 + $0xb8] sm:$0xff]  }
 0x587   :  { %7847 = vmatprep.subr.bf16.mxu1 %v9406_v48  ;;  %v1296_v53 = vld [vmem:[#allocation7 + $0x1f38] sm:$0xff] }
 0x588   :  { %7887 = vmatpush1.bf16.msra.mxu0 %v9541_v0  ;;  %v1156_v52 = vld [vmem:[#allocation7 + $0x1ad8] sm:$0xff]  ;;  %v9622_v42 = vcombine.high %v1292_v61, %v1296_v53  ;;  %v9621_v56 = vcombine.low %v1292_v61, %v1296_v53  ;;  %v9838_v53 = vld [vmem:[#allocation10 + $0x68] sm:$0xff]  }
 0x589   :  { %7888 = vmatprep.subr.bf16.mxu0 %v9534_v3  ;;  %v1160_v59 = vld [vmem:[#allocation7 + $0x1af8] sm:$0xff] }
 0x58a   :  { %7848 = vmatpush1.bf16.msra.mxu1 %v9405_v54  ;;  %v1284_v4 = vld [vmem:[#allocation7 + $0x1ed8] sm:$0xff]  ;;  %v9486_v6 = vcombine.high %v1156_v52, %v1160_v59  ;;  %v9485_v58 = vcombine.low %v1156_v52, %v1160_v59 }
 0x58b   :  { %7849 = vmatprep.subr.bf16.mxu1 %v9398_v8  ;;  %v1288_v55 = vld [vmem:[#allocation7 + $0x1ef8] sm:$0xff] }
 0x58c   :  { %7889 = vmatpush1.bf16.msra.mxu0 %v9533_v9  ;;  %v1148_v12 = vld [vmem:[#allocation7 + $0x1a98] sm:$0xff]  ;;  %v9614_v57 = vcombine.high %v1284_v4, %v1288_v55  ;;  %v9613_v2 = vcombine.low %v1284_v4, %v1288_v55  ;;  %v9839_v4 = vld [vmem:[#allocation10 + $0x28] sm:$0xff]  }
 0x58d   :  { %7890 = vmatprep.subr.bf16.mxu0 %v9526_v25  ;;  %v1152_v44 = vld [vmem:[#allocation7 + $0x1ab8] sm:$0xff] }
 0x58e   :  { %7850 = vmatpush1.bf16.msra.mxu1 %v9397_v26  ;;  %v1276_v60 = vld [vmem:[#allocation7 + $0x1e98] sm:$0xff]  ;;  %v9478_v0 = vcombine.high %v1148_v12, %v1152_v44  ;;  %v9477_v50 = vcombine.low %v1148_v12, %v1152_v44  ;;  %v9844_v44 = vld [vmem:[#allocation10 + $0xe0] sm:$0xff]  }
 0x58f   :  { %7851 = vmatprep.subr.bf16.mxu1 %v9518_v20  ;;  %v1280_v48 = vld [vmem:[#allocation7 + $0x1eb8] sm:$0xff] }
 0x590   :  { %7891 = vmatpush1.bf16.msra.mxu0 %v9525_v29  ;;  %v1140_v17 = vld [vmem:[#allocation7 + $0x1a58] sm:$0xff]  ;;  %v9606_v54 = vcombine.high %v1276_v60, %v1280_v48  ;;  %v9605_v10 = vcombine.low %v1276_v60, %v1280_v48  ;;  %v9845_v60 = vld [vmem:[#allocation10 + $0xa0] sm:$0xff]   ;;  %v9848_v48 = vld [vmem:[#allocation10 + $0xd8] sm:$0xff]  }
 0x591   :  { %7892 = vmatprep.subr.bf16.mxu0 %v9646_v49  ;;  %v1144_v3 = vld [vmem:[#allocation7 + $0x1a78] sm:$0xff] }
 0x592   :  { %7852 = vmatpush2.bf16.msra.mxu1 %v9517_v35  ;;  %v1268_v7 = vld [vmem:[#allocation7 + $0x1e58] sm:$0xff]  ;;  %v9470_v9 = vcombine.high %v1140_v17, %v1144_v3  ;;  %v9469_v5 = vcombine.low %v1140_v17, %v1144_v3  ;;  %v1349_v35 = vsub.s32 6, %v10123_v38  ;;  %v9849_v17 = vld [vmem:[#allocation10 + $0x98] sm:$0xff]  }
 0x593   :  { %7853 = vmatprep.subr.bf16.mxu1 %v9510_v19  ;;  %v1272_v8 = vld [vmem:[#allocation7 + $0x1e78] sm:$0xff] }
 0x594   :  { %7893 = vmatpush2.bf16.msra.mxu0 %v9645_v18  ;;  %v1132_v14 = vld [vmem:[#allocation7 + $0x1a18] sm:$0xff]  ;;  %v9598_v26 = vcombine.high %v1268_v7, %v1272_v8  ;;  %v9597_v30 = vcombine.low %v1268_v7, %v1272_v8  ;;  %v1353_v18 = vsub.s32 7, %v10123_v38  ;;  %v7928_v38 = vpack.c.bf16 %v7920_v31, %v7920_v31  ;;  %v9856_v8 = vld [vmem:[#allocation10 + $0xc8] sm:$0xff]  }
 0x595   :  { %7894 = vmatprep.subr.bf16.mxu0 %v9638_v37  ;;  %v1136_v25 = vld [vmem:[#allocation7 + $0x1a38] sm:$0xff]  ;;  %v9896_v37 = vld [vmem:[#allocation9] sm:$0xff]  ;;  %v9882_v31 = vld [vmem:[#allocation10 + $0x1e8] sm:$0xff]  }
 0x596   :  { %7854 = vmatpush2.bf16.msra.mxu1 %v9509_v16  ;;  %v1260_v63 = vld [vmem:[#allocation7 + $0x1e18] sm:$0xff]  ;;  %v9462_v29 = vcombine.high %v1132_v14, %v1136_v25  ;;  %v9461_v49 = vcombine.low %v1132_v14, %v1136_v25  ;;  %v1350_v16 = vrot.slane %v9896_v37, %v1349_v35  ;;  %v9857_v14 = vld [vmem:[#allocation10 + $0x88] sm:$0xff]   ;;  %v9860_v25 = vld [vmem:[#allocation10 + $0xc0] sm:$0xff]  }
 0x597   :  { %7855 = vmatprep.subr.bf16.mxu1 %v9502_v23  ;;  %v1264_v20 = vld [vmem:[#allocation7 + $0x1e38] sm:$0xff]  ;;  %v7926_v23 = vpack.c.bf16 %v7918_v32, %v7918_v32 }
 0x598   :  { %7895 = vmatpush2.bf16.msra.mxu0 %v9637_v45  ;;  %v9590_v11 = vcombine.high %v1260_v63, %v1264_v20  ;;  %v9589_v19 = vcombine.low %v1260_v63, %v1264_v20  ;;  %v9834_v41 = vld [vmem:[#allocation10 + $0x70] sm:$0xff]   ;;  %v1354_v45 = vrot.slane %v9896_v37, %v1353_v18  ;;  %v9862_v63 = vld [vmem:[#allocation10 + $0x178] sm:$0xff]   ;;  %v7922_v20 = vmax.f32 %v10306_v22, 0.0  ;;  %v9867_v37 = vld [vmem:[#allocation10 + $0x128] sm:$0xff]  }
 0x599   :  { %7896 = vmatprep.subr.bf16.mxu0 %v9630_v62  ;;  %v9836_v40 = vld [vmem:[#allocation10 + $0xf0] sm:$0xff]  }
 0x59a   :  { %7856 = vmatpush2.bf16.msra.mxu1 %v9501_v47  ;;  %v9835_v33 = vld [vmem:[#allocation10 + $0x30] sm:$0xff]   ;;  %v7930_v32 = vpack.c.bf16 %v7922_v20, %v7922_v20 }
 0x59b   :  { %7857 = vmatprep.subr.bf16.mxu1 %v9494_v51  ;;  %v9837_v52 = vld [vmem:[#allocation10 + $0xb0] sm:$0xff]  }
 0x59c   :  { %7897 = vmatpush2.bf16.msra.mxu0 %v9629_v21  ;;  %v9852_v3 = vld [vmem:[#allocation10 + $0xd0] sm:$0xff]  }
 0x59d   :  { %7898 = vmatprep.subr.bf16.mxu0 %v9622_v42  ;;  %v9840_v42 = vld [vmem:[#allocation10 + $0xe8] sm:$0xff]   ;;  %v9853_v7 = vld [vmem:[#allocation10 + $0x90] sm:$0xff]  }
 0x59e   :  { %7858 = vmatpush2.bf16.msra.mxu1 %v9493_v43  ;;  %v9865_v22 = vld [vmem:[#allocation10 + $0x130] sm:$0xff]  }
 0x59f   :  { %7859 = vmatprep.subr.bf16.mxu1 %v9486_v6 }
 0x5a0   :  { %7899 = vmatpush2.bf16.msra.mxu0 %v9621_v56  ;;  %v9841_v56 = vld [vmem:[#allocation10 + $0xa8] sm:$0xff]  }
 0x5a1   :  { %7900 = vmatprep.subr.bf16.mxu0 %v9614_v57  ;;  %v9843_v57 = vld [vmem:[#allocation10 + $0x20] sm:$0xff]  }
 0x5a2   :  { %7860 = vmatpush2.bf16.msra.mxu1 %v9485_v58  ;;  %v9846_v58 = vld [vmem:[#allocation10 + $0x58] sm:$0xff]  }
 0x5a3   :  { %7861 = vmatprep.subr.bf16.mxu1 %v9478_v0  ;;  %v9847_v0 = vld [vmem:[#allocation10 + $0x18] sm:$0xff]  }
 0x5a4   :  { %7901 = vmatpush2.bf16.msra.mxu0 %v9613_v2  ;;  %v9850_v2 = vld [vmem:[#allocation10 + $0x50] sm:$0xff]  }
 0x5a5   :  { %7902 = vmatprep.subr.bf16.mxu0 %v9606_v54  ;;  %v9851_v54 = vld [vmem:[#allocation10 + $0x10] sm:$0xff]  }
 0x5a6   :  { %7862 = vmatpush2.bf16.msra.mxu1 %v9477_v50  ;;  %v9854_v50 = vld [vmem:[#allocation10 + $0x48] sm:$0xff]  }
 0x5a7   :  { %7863 = vmatprep.subr.bf16.mxu1 %v9470_v9  ;;  %v9855_v9 = vld [vmem:[#allocation10 + $0x8] sm:$0xff]  }
 0x5a8   :  { %7903 = vmatpush2.bf16.msra.mxu0 %v9605_v10  ;;  %v9858_v10 = vld [vmem:[#allocation10 + $0x40] sm:$0xff]  }
 0x5a9   :  { %7904 = vmatprep.subr.bf16.mxu0 %v9598_v26  ;;  %v9859_v26 = vld [vmem:[#allocation10] sm:$0xff]  }
 0x5aa   :  { %7864 = vmatpush2.bf16.msra.mxu1 %v9469_v5  ;;  %v7917_v5 = vmax.f32 %v10223_v34, 0.0  ;;  %v9880_v34 = vld [vmem:[#allocation10 + $0x1f0] sm:$0xff]  }
 0x5ab   :  { %7865 = vmatprep.subr.bf16.mxu1 %v9462_v29  ;;  %v9861_v29 = vld [vmem:[#allocation10 + $0x80] sm:$0xff]  }
 0x5ac   :  { %7905 = vmatpush2.bf16.msra.mxu0 %v9597_v30  ;;  %v7919_v30 = vmax.f32 %v10263_v27, 0.0  ;;  %v7925_v35 = vpack.c.bf16 %v7917_v5, %v7917_v5  ;;  %v9866_v27 = vld [vmem:[#allocation10 + $0x168] sm:$0xff]  }
 0x5ad   :  { %7906 = vmatprep.subr.bf16.mxu0 %v9590_v11  ;;  %v9878_v11 = vld [vmem:[#allocation10 + $0x1f8] sm:$0xff]  }
 0x5ae   :  { %7866 = vmatpush2.bf16.msra.mxu1 %v9461_v49  ;;  %v9863_v49 = vld [vmem:[#allocation10 + $0x138] sm:$0xff]   ;;  %v7927_v18 = vpack.c.bf16 %v7919_v30, %v7919_v30 }
 0x5af   :  { %9714 = vmatprep.subr.bf16.mxu1 %v9830_v24  ;;  %v9864_v24 = vld [vmem:[#allocation10 + $0x170] sm:$0xff]  }
 0x5b0   :  { %7907 = vmatpush2.bf16.msra.mxu0 %v9589_v19  ;;  %v9879_v19 = vld [vmem:[#allocation10 + $0x1b8] sm:$0xff]  }
 0x5b1   :  { %v7623_v46 = vpop.f32.mrf.mxu1  ;;  %7868 = vmatmul.mubr.bf16.vlgmr.msra.gmra.mxu1 %v10146_v15  ;;  %9736 = vmatprep.subr.bf16.mxu0 %v9832_v13  ;;  %v9881_v13 = vld [vmem:[#allocation10 + $0x1b0] sm:$0xff]  }
 0x5b2   :  { %v7624_v62 = vadd.f32 %v7623_v46, %v1350_v16  ;;  %9715 = vmatpush3.bf16.msra.mxu1 %v9831_v39  ;;  %8477 = vmatprep.mubr.bf16.mxu1 %v7926_v23  ;;  %v9868_v16 = vld [vmem:[#allocation10 + $0x160] sm:$0xff]   ;;  %v9883_v39 = vld [vmem:[#allocation10 + $0x1a8] sm:$0xff]   ;;  %v9886_v46 = vld [vmem:[#allocation10 + $0x1d8] sm:$0xff]  }
 0x5b3   :  { %v7625_v47 = vpop.f32.mrf.mxu1  ;;  %v7664_v61 = vpop.f32.mrf.mxu0  ;;  %7909 = vmatmul.mubr.bf16.vlgmr.msra.gmra.mxu0 %v10189_v1  ;;  %9716 = vmatprep.subr.bf16.mxu1 %v9834_v41  ;;  %v9842_v1 = vld [vmem:[#allocation10 + $0x60] sm:$0xff]  }
 0x5b4   :  { %v7626_v51 = vadd.f32 %v7625_v47, %v1354_v45  ;;  %v10314_v21 = vadd.f32 %v7664_v61, %v7624_v62  ;;  %9737 = vmatpush3.bf16.msra.mxu0 %v9833_v36  ;;  %8517 = vmatprep.mubr.bf16.mxu0 %v7928_v38  ;;  %v9884_v41 = vld [vmem:[#allocation10 + $0x1e0] sm:$0xff]   ;;  %v9870_v45 = vld [vmem:[#allocation10 + $0x158] sm:$0xff]   ;;  %v9872_v38 = vld [vmem:[#allocation10 + $0x150] sm:$0xff]  }
 0x5b5   :  { %v7627_v15 = vpop.f32.mrf.mxu1  ;;  %v7666_v59 = vpop.f32.mrf.mxu0  ;;  %9738 = vmatprep.subr.bf16.mxu0 %v9836_v40  ;;  %v9869_v23 = vld [vmem:[#allocation10 + $0x120] sm:$0xff]   ;;  %v9871_v40 = vld [vmem:[#allocation10 + $0x118] sm:$0xff]   ;;  %v9874_v47 = vld [vmem:[#allocation10 + $0x148] sm:$0xff]  }
 0x5b6   :  { %v10316_v43 = vadd.f32 %v7666_v59, %v7626_v51  ;;  %9717 = vmatpush3.bf16.msra.mxu1 %v9835_v33  ;;  %v9885_v36 = vld [vmem:[#allocation10 + $0x1a0] sm:$0xff]   ;;  %v9887_v62 = vld [vmem:[#allocation10 + $0x198] sm:$0xff]   ;;  %v9873_v33 = vld [vmem:[#allocation10 + $0x110] sm:$0xff]  }
 0x5b7   :  { %v7628_v55 = vpop.f32.mrf.mxu1  ;;  %v7668_v6 = vpop.f32.mrf.mxu0  ;;  %9718 = vmatprep.subr.bf16.mxu1 %v9838_v53  ;;  %v9875_v61 = vld [vmem:[#allocation10 + $0x108] sm:$0xff]   ;;  %v9876_v53 = vld [vmem:[#allocation10 + $0x140] sm:$0xff]   ;;  %v9888_v59 = vld [vmem:[#allocation10 + $0x1d0] sm:$0xff]  }
 0x5b8   :  { %9739 = vmatpush3.bf16.msra.mxu0 %v9837_v52  ;;  %v9877_v51 = vld [vmem:[#allocation10 + $0x100] sm:$0xff]   ;;  %v7921_v52 = vmax.f32 %v10303_v28, 0.0 }
 0x5b9   :  { %v7669_v12 = vpop.f32.mrf.mxu0  ;;  %9740 = vmatprep.subr.bf16.mxu0 %v9840_v42  ;;  %v9889_v42 = vld [vmem:[#allocation10 + $0x190] sm:$0xff]  }
 0x5ba   :  { %9719 = vmatpush3.bf16.msra.mxu1 %v9839_v4  ;;  %v7929_v15 = vpack.c.bf16 %v7921_v52, %v7921_v52 }
 0x5bb   :  { %9720 = vmatprep.subr.bf16.mxu1 %v9842_v1 }
 0x5bc   :  { %9741 = vmatpush3.bf16.msra.mxu0 %v9841_v56  ;;  %v9890_v56 = vld [vmem:[#allocation10 + $0x1c8] sm:$0xff]  }
 0x5bd   :  { %9742 = vmatprep.subr.bf16.mxu0 %v9844_v44 }
 0x5be   :  { %9721 = vmatpush3.bf16.msra.mxu1 %v9843_v57  ;;  %v9891_v57 = vld [vmem:[#allocation10 + $0x188] sm:$0xff]  }
 0x5bf   :  { %9722 = vmatprep.subr.bf16.mxu1 %v9846_v58 }
 0x5c0   :  { %9743 = vmatpush3.bf16.msra.mxu0 %v9845_v60 }
 0x5c1   :  { %9744 = vmatprep.subr.bf16.mxu0 %v9848_v48 }
 0x5c2   :  { %9723 = vmatpush3.bf16.msra.mxu1 %v9847_v0 }
 0x5c3   :  { %9724 = vmatprep.subr.bf16.mxu1 %v9850_v2  ;;  %v9892_v2 = vld [vmem:[#allocation10 + $0x1c0] sm:$0xff]  }
 0x5c4   :  { %9745 = vmatpush3.bf16.msra.mxu0 %v9849_v17  ;;  %v9893_v17 = vld [vmem:[#allocation10 + $0x180] sm:$0xff]  }
 0x5c5   :  { %9746 = vmatprep.subr.bf16.mxu0 %v9852_v3 }
 0x5c6   :  { %9725 = vmatpush3.bf16.msra.mxu1 %v9851_v54 }
 0x5c7   :  { %9726 = vmatprep.subr.bf16.mxu1 %v9854_v50 }
 0x5c8   :  { %9747 = vmatpush3.bf16.msra.mxu0 %v9853_v7 }
 0x5c9   :  { %9748 = vmatprep.subr.bf16.mxu0 %v9856_v8 }
 0x5ca   :  { %9727 = vmatpush3.bf16.msra.mxu1 %v9855_v9 }
 0x5cb   :  { %9728 = vmatprep.subr.bf16.mxu1 %v9858_v10 }
 0x5cc   :  { %9749 = vmatpush3.bf16.msra.mxu0 %v9857_v14 }
 0x5cd   :  { %9750 = vmatprep.subr.bf16.mxu0 %v9860_v25 }
 0x5ce   :  { %9729 = vmatpush3.bf16.msra.mxu1 %v9859_v26 }
 0x5cf   :  { %9758 = vmatprep.subr.bf16.mxu1 %v9862_v63 }
 0x5d0   :  { %9751 = vmatpush3.bf16.msra.mxu0 %v9861_v29 }
 0x5d1   :  { %8478 = vmatmul.mubr.bf16.vlgmr.msra.gmra.mxu1 %v7925_v35  ;;  %9780 = vmatprep.subr.bf16.mxu0 %v9878_v11 }
 0x5d2   :  { %9759 = vmatpush3.bf16.msra.mxu1 %v9863_v49  ;;  %8557 = vmatprep.mubr.bf16.mxu1 %v7930_v32 }
 0x5d3   :  { %8518 = vmatmul.mubr.bf16.vlgmr.msra.gmra.mxu0 %v7927_v18  ;;  %9760 = vmatprep.subr.bf16.mxu1 %v9864_v24 }
 0x5d4   :  { %9781 = vmatpush3.bf16.msra.mxu0 %v9879_v19 }
 0x5d5   :  { %9782 = vmatprep.subr.bf16.mxu0 %v9880_v34 }
 0x5d6   :  { %9761 = vmatpush3.bf16.msra.mxu1 %v9865_v22 }
 0x5d7   :  { %9762 = vmatprep.subr.bf16.mxu1 %v9866_v27 }
 0x5d8   :  { %9783 = vmatpush3.bf16.msra.mxu0 %v9881_v13 }
 0x5d9   :  { %9784 = vmatprep.subr.bf16.mxu0 %v9882_v31 }
 0x5da   :  { %9763 = vmatpush3.bf16.msra.mxu1 %v9867_v37 }
 0x5db   :  { %9764 = vmatprep.subr.bf16.mxu1 %v9868_v16 }
 0x5dc   :  { %9785 = vmatpush3.bf16.msra.mxu0 %v9883_v39 }
 0x5dd   :  { %9786 = vmatprep.subr.bf16.mxu0 %v9884_v41 }
 0x5de   :  { %9765 = vmatpush3.bf16.msra.mxu1 %v9869_v23 }
 0x5df   :  { %9766 = vmatprep.subr.bf16.mxu1 %v9870_v45 }
 0x5e0   :  { %9787 = vmatpush3.bf16.msra.mxu0 %v9885_v36 }
 0x5e1   :  { %9788 = vmatprep.subr.bf16.mxu0 %v9886_v46 }
 0x5e2   :  { %9767 = vmatpush3.bf16.msra.mxu1 %v9871_v40 }
 0x5e3   :  { %9768 = vmatprep.subr.bf16.mxu1 %v9872_v38 }
 0x5e4   :  { %9789 = vmatpush3.bf16.msra.mxu0 %v9887_v62 }
 0x5e5   :  { %9790 = vmatprep.subr.bf16.mxu0 %v9888_v59 }
 0x5e6   :  { %9769 = vmatpush3.bf16.msra.mxu1 %v9873_v33 }
 0x5e7   :  { %9770 = vmatprep.subr.bf16.mxu1 %v9874_v47 }
 0x5e8   :  { %9791 = vmatpush3.bf16.msra.mxu0 %v9889_v42 }
 0x5e9   :  { %9792 = vmatprep.subr.bf16.mxu0 %v9890_v56 }
 0x5ea   :  { %9771 = vmatpush3.bf16.msra.mxu1 %v9875_v61 }
 0x5eb   :  { %9772 = vmatprep.subr.bf16.mxu1 %v9876_v53 }
 0x5ec   :  { %9793 = vmatpush3.bf16.msra.mxu0 %v9891_v57 }
 0x5ed   :  { %9794 = vmatprep.subr.bf16.mxu0 %v9892_v2 }
 0x5ee   :  { %9773 = vmatpush3.bf16.msra.mxu1 %v9877_v51 }
 0x5f0   :  { %9795 = vmatpush3.bf16.msra.mxu0 %v9893_v17 }
 0x5f1   :  { %v7705_v4 = vpop.f32.mrf.mxu1  ;;  %8558 = vmatmul.mubr.bf16.vlgmr.msra.gmra.mxu1 %v7929_v15 }
 0x5f2   :  { %v7706_v55 = vadd.f32 %v7705_v4, %v10314_v21 }
 0x5f3   :  { %v7707_v6 = vpop.f32.mrf.mxu1  ;;  %v7746_v1 = vpop.f32.mrf.mxu0 }
 0x5f4   :  { %v7708_v12 = vadd.f32 %v7707_v6, %v10316_v43  ;;  %v7747_v44 = vadd.f32 %v7746_v1, %v7706_v55 }
 0x5f5   :  { %v7709_v58 = vpop.f32.mrf.mxu1  ;;  %v7748_v28 = vpop.f32.mrf.mxu0 }
 0x5f6   :  { %v7749_v60 = vadd.f32 %v7748_v28, %v7708_v12 }
 0x5f7   :  { %v7710_v48 = vpop.f32.mrf.mxu1  ;;  %v7750_v0 = vpop.f32.mrf.mxu0 }
 0x5f9   :  { %v7751_v3 = vpop.f32.mrf.mxu0 }
 0x631   :  { %v7787_v21 = vpop.f32.mrf.mxu1 }
 0x632   :  { %v7788_v14 = vadd.f32 %v7787_v21, %v7747_v44 }
 0x633   :  { %v7789_v54 = vpop.f32.mrf.mxu1  ;;  %v7828_v50 = vpop.f32.mrf.mxu0 }
 0x634   :  { %v7790_v25 = vadd.f32 %v7789_v54, %v7749_v60  ;;  %v7829_v26 = vadd.f32 %v7828_v50, %v7788_v14 }
 0x635   :  { %v7791_v7 = vpop.f32.mrf.mxu1  ;;  %v7830_v8 = vpop.f32.mrf.mxu0 }
 0x636   :  { %v7831_v63 = vadd.f32 %v7830_v8, %v7790_v25 }
 0x637   :  { %v7792_v43 = vpop.f32.mrf.mxu1  ;;  %v7832_v9 = vpop.f32.mrf.mxu0 }
 0x639   :  { %v7833_v10 = vpop.f32.mrf.mxu0 }
 0x671   :  { %v7869_v5 = vpop.f32.mrf.mxu1 }
 0x672   :  { %v7870_v20 = vadd.f32 %v7869_v5, %v7829_v26 }
 0x673   :  { %v7871_v29 = vpop.f32.mrf.mxu1  ;;  %v7910_v30 = vpop.f32.mrf.mxu0 }
 0x674   :  { %v7872_v11 = vadd.f32 %v7871_v29, %v7831_v63  ;;  %v7911_v49 = vadd.f32 %v7910_v30, %v7870_v20 }
 0x675   :  { %v7873_v35 = vpop.f32.mrf.mxu1  ;;  %v7912_v24 = vpop.f32.mrf.mxu0 }
 0x676   :  { %v7913_v32 = vadd.f32 %v7912_v24, %v7872_v11  ;;  %v7923_v19 = vmax.f32 %v7911_v49, 0.0 }
 0x677   :  { %v7874_v18 = vpop.f32.mrf.mxu1  ;;  %v7914_v34 = vpop.f32.mrf.mxu0 }
 0x678   :  { %v7924_v22 = vmax.f32 %v7913_v32, 0.0  ;;  %v7931_v31 = vpack.c.bf16 %v7923_v19, %v7923_v19 }
 0x679   :  { %v7915_v27 = vpop.f32.mrf.mxu0 }
 0x67a   :  { %v7932_v13 = vpack.c.bf16 %v7924_v22, %v7924_v22 }
 0x67c   :  { %8597 = vmatprep.mubr.bf16.mxu0 %v7932_v13 }
 0x67d   :  { %8598 = vmatmul.mubr.bf16.vlgmr.msra.gmra.mxu0 %v7931_v31 }
 0x691   :  { %v9730_v37 = vpop.f32.mrf.mxu1 }
 0x693   :  { %v9731_v16 = vpop.f32.mrf.mxu1  ;;  %v9752_v39 = vpop.f32.mrf.mxu0 }
 0x694   :  { %v9732_v41 = vadd.f32 %v9731_v16, %v9730_v37 }
 0x695   :  { %v9733_v23 = vpop.f32.mrf.mxu1  ;;  %v9753_v45 = vpop.f32.mrf.mxu0 }
 0x696   :  { %v9754_v36 = vadd.f32 %v9753_v45, %v9752_v39 }
 0x697   :  { %v9734_v46 = vpop.f32.mrf.mxu1  ;;  %v9755_v40 = vpop.f32.mrf.mxu0 }
 0x698   :  { %v8520_v38 = vadd.f32 %v9754_v36, %v9732_v41 }
 0x699   :  { %v9756_v62 = vpop.f32.mrf.mxu0 }
 0x6b1   :  { %v9774_v33 = vpop.f32.mrf.mxu1 }
 0x6b3   :  { %v9775_v47 = vpop.f32.mrf.mxu1 }
 0x6b4   :  { %v9776_v61 = vadd.f32 %v9775_v47, %v9774_v33 }
 0x6b5   :  { %v9777_v53 = vpop.f32.mrf.mxu1 }
 0x6b6   :  { %v8560_v51 = vadd.f32 %v9776_v61, %v8520_v38 }
 0x6b7   :  { %v9778_v52 = vpop.f32.mrf.mxu1 }
 0x73d   :  { %v9796_v15 = vpop.f32.mrf.mxu0 }
 0x73f   :  { %v9797_v59 = vpop.f32.mrf.mxu0 }
 0x740   :  { %v9798_v42 = vadd.f32 %v9797_v59, %v9796_v15 }
 0x741   :  { %v9799_v4 = vpop.f32.mrf.mxu0 }
 0x742   :  { %v8600_v55 = vadd.f32 %v9798_v42, %v8560_v51 }
 0x743   :  { %v9800_v6 = vpop.f32.mrf.mxu0 }
 0x744   :  { %8605 = vst [vmem:[%s10334_s7] sm:$0x3] %v8600_v55 }
 0x745   :  { %8610 = vsyncpa [#allocation3], 1 }
 0x746   :  { %8611 = vsyncpa [#allocation5], 1 }
 0x747   :  { %8612 = vsyncpa [#allocation8], 1 }
 0x748   :  { %8613 = vsyncpa [#allocation11], 1 }

</bundles_post_ra>
